<compile_context>
chip_gen: v7x
topology: tpu7x:2x2x1
jax: 0.10.0
libtpu: 0.0.40
codegen_flags: <defaults>
</compile_context>

<pallas_src>
import jax
import jax.numpy as jnp
from jax.experimental import pallas as pl
from jax.experimental.pallas import tpu as pltpu

OUT_CH = 256
BN_EPS = 1e-5
VMEM_LIMIT = 32 * 1024 * 1024   # explicit scoped-VMEM ceiling (safe on v5e/v6e/v7x)


# ---------------------------------------------------------------------------
# Pallas kernels
# ---------------------------------------------------------------------------
def _conv_bn_relu_kernel(x_ref, w_ref, shift_ref, o_ref):
    """Direct 3x3 / stride-2 / pad-1 conv + folded BN + ReLU for one image.

    x_ref:     (Hp, 2, Wq, Cin)  bf16  1-pixel-padded input, columns split into
                                       even/odd phases (Hp = H+2, Wq = Wo+1)
    w_ref:     (3, 3, Cin, Cout) bf16  conv weight with BN scale folded in
    shift_ref: (1, Cout)         f32   folded BN shift
    o_ref:     (Ho, Wo, Cout)    bf16  output feature map
    """
    ho, wo, cout = o_ref.shape
    shift = shift_ref[...]

    def row_body(i, carry):
        acc = jnp.zeros((wo, cout), jnp.float32)
        for dy in range(3):
            for dx in range(3):
                # padded row 2*i+dy, padded cols 2*j+dx  <=>  phase dx%2,
                # within-phase cols [dx//2, dx//2 + Wo)
                patch = x_ref[2 * i + dy, dx % 2, pl.ds(dx // 2, wo), :]
                acc = acc + jnp.dot(patch, w_ref[dy, dx],
                                    preferred_element_type=jnp.float32)
        o_ref[i, :, :] = jnp.maximum(acc + shift, 0.0).astype(o_ref.dtype)
        return carry

    jax.lax.fori_loop(0, ho, row_body, 0)


def _conv_bn_relu_pool_fc_kernel(x_ref, w_ref, shift_ref, fcw_ref, fcb_ref,
                                 o_ref):
    """Last conv layer fused with global average pool + Linear(Cout, 1).

    fcw_ref: (Cout, 1) f32 FC weight pre-scaled by 1/(Ho*Wo); fcb_ref: (1, 1).
    o_ref:   (1, 1)    f32 per-image logit.
    """
    hp, _, wq, _ = x_ref.shape
    cout = w_ref.shape[-1]
    ho = (hp - 1) // 2
    wo = wq - 1
    shift = shift_ref[...]

    def row_body(i, pooled):
        acc = jnp.zeros((wo, cout), jnp.float32)
        for dy in range(3):
            for dx in range(3):
                patch = x_ref[2 * i + dy, dx % 2, pl.ds(dx // 2, wo), :]
                acc = acc + jnp.dot(patch, w_ref[dy, dx],
                                    preferred_element_type=jnp.float32)
        act = jnp.maximum(acc + shift, 0.0)                    # (Wo, Cout) f32
        return pooled + jnp.sum(act, axis=0, keepdims=True)    # (1, Cout)

    pooled = jax.lax.fori_loop(0, ho, row_body,
                               jnp.zeros((1, cout), jnp.float32))
    o_ref[...] = (jnp.dot(pooled, fcw_ref[...],
                          preferred_element_type=jnp.float32) + fcb_ref[...])


# ---------------------------------------------------------------------------
# Glue (padding / phase split / parameter folding)
# ---------------------------------------------------------------------------
def _prep_phases(x_nhwc):
    """Pad by 1 (conv padding) and split columns into even/odd phases.

    Returns (N, Hp, 2, Wq, C) bf16 with Hp = H+2, Wq = Wo+1, plus (Ho, Wo)."""
    n, h, w, c = x_nhwc.shape
    ho, wo = (h + 1) // 2, (w + 1) // 2
    hp, wq = h + 2, wo + 1
    xp = jnp.pad(x_nhwc.astype(jnp.bfloat16),
                 ((0, 0), (1, 1), (1, 2 * wq - w - 1), (0, 0)))
    xph = xp.reshape(n, hp, wq, 2, c).transpose(0, 1, 3, 2, 4)
    return xph, ho, wo


def _fold_bn(params, idx):
    """Fold eval-mode BatchNorm into the conv weight (scale) + a shift vector."""
    w_oihw = params[f"conv{idx}_w"]
    cout = w_oihw.shape[0]
    scale = params[f"bn{idx}_gamma"] / jnp.sqrt(params[f"bn{idx}_var"] + BN_EPS)
    shift = params[f"bn{idx}_beta"] - params[f"bn{idx}_mean"] * scale
    # (Cout, Cin, kh, kw) -> (kh, kw, Cin, Cout), fold BN scale into Cout axis.
    w = (jnp.transpose(w_oihw, (2, 3, 1, 0)) * scale).astype(jnp.bfloat16)
    return w, shift.reshape(1, cout).astype(jnp.float32)


def conv3x3_s2_bn_relu(x_nhwc, params, idx):
    """Fused conv3x3(stride=2, pad=1, bias=False) + BatchNorm(eval) + ReLU."""
    w, shift = _fold_bn(params, idx)
    phases, ho, wo = _prep_phases(x_nhwc)
    n, hp, _, wq, cin = phases.shape
    cout = w.shape[-1]
    return pl.pallas_call(
        _conv_bn_relu_kernel,
        out_shape=jax.ShapeDtypeStruct((n, ho, wo, cout), jnp.bfloat16),
        grid=(n,),
        in_specs=[
            pl.BlockSpec((None, hp, 2, wq, cin), lambda b: (b, 0, 0, 0, 0)),
            pl.BlockSpec((3, 3, cin, cout), lambda b: (0, 0, 0, 0)),
            pl.BlockSpec((1, cout), lambda b: (0, 0)),
        ],
        out_specs=pl.BlockSpec((None, ho, wo, cout), lambda b: (b, 0, 0, 0)),
        compiler_params=pltpu.CompilerParams(
            dimension_semantics=("parallel",),
            vmem_limit_bytes=VMEM_LIMIT),
    )(phases, w, shift)


def conv3x3_s2_bn_relu_pool_fc(x_nhwc, params, idx, fc_w, fc_b):
    """Last conv layer fused with global average pool and Linear(C, 1)."""
    w, shift = _fold_bn(params, idx)
    phases, ho, wo = _prep_phases(x_nhwc)
    n, hp, _, wq, cin = phases.shape
    cout = w.shape[-1]
    # Fold the 1/(Ho*Wo) mean into the FC weight so the kernel only sums.
    fcw = fc_w.astype(jnp.float32).T / float(ho * wo)          # (Cout, 1)
    fcb = fc_b.reshape(1, 1).astype(jnp.float32)
    out = pl.pallas_call(
        _conv_bn_relu_pool_fc_kernel,
        out_shape=jax.ShapeDtypeStruct((n, 1, 1), jnp.float32),
        grid=(n,),
        in_specs=[
            pl.BlockSpec((None, hp, 2, wq, cin), lambda b: (b, 0, 0, 0, 0)),
            pl.BlockSpec((3, 3, cin, cout), lambda b: (0, 0, 0, 0)),
            pl.BlockSpec((1, cout), lambda b: (0, 0)),
            pl.BlockSpec((cout, 1), lambda b: (0, 0)),
            pl.BlockSpec((1, 1), lambda b: (0, 0)),
        ],
        out_specs=pl.BlockSpec((None, 1, 1), lambda b: (b, 0, 0)),
        compiler_params=pltpu.CompilerParams(
            dimension_semantics=("parallel",),
            vmem_limit_bytes=VMEM_LIMIT),
    )(phases, w, shift, fcw, fcb)
    return out.reshape(n, 1)


def fcdiscriminator_img_forward(params, x_nchw):
    """Forward pass matching FCDiscriminator_img."""
    # TODO(synk): BatchNorm is applied in eval mode (running stats folded to a
    # per-channel affine); training-mode batch statistics are not computed.
    x = jnp.transpose(x_nchw, (0, 2, 3, 1))                    # NCHW -> NHWC
    x = conv3x3_s2_bn_relu(x, params, 1)
    x = conv3x3_s2_bn_relu(x, params, 2)
    return conv3x3_s2_bn_relu_pool_fc(x, params, 3,
                                      params["fc_w"], params["fc_b"])


# ---------------------------------------------------------------------------
# Deterministic parameter initialization (mirrors module __init__ shapes)
# ---------------------------------------------------------------------------
def init_params(key, input_ch):
    ks = jax.random.split(key, 5)

    def kaiming_conv(k, cout, cin):
        # kaiming_normal_, mode='fan_out', nonlinearity='relu'
        fan_out = cout * 3 * 3
        std = (2.0 / fan_out) ** 0.5
        return std * jax.random.normal(k, (cout, cin, 3, 3), jnp.float32)

    params = {
        "conv1_w": kaiming_conv(ks[0], OUT_CH, input_ch),
        "conv2_w": kaiming_conv(ks[1], OUT_CH, OUT_CH),
        "conv3_w": kaiming_conv(ks[2], OUT_CH, OUT_CH),
    }
    for i in (1, 2, 3):
        params[f"bn{i}_gamma"] = jnp.ones((OUT_CH,), jnp.float32)
        params[f"bn{i}_beta"] = jnp.zeros((OUT_CH,), jnp.float32)
        params[f"bn{i}_mean"] = jnp.zeros((OUT_CH,), jnp.float32)
        params[f"bn{i}_var"] = jnp.ones((OUT_CH,), jnp.float32)
    bound = 1.0 / (OUT_CH ** 0.5)  # PyTorch Linear default init bound
    params["fc_w"] = jax.random.uniform(ks[3], (1, OUT_CH), jnp.float32,
                                        -bound, bound)
    params["fc_b"] = jax.random.uniform(ks[4], (1,), jnp.float32,
                                        -bound, bound)
    return params


# ---------------------------------------------------------------------------
# Pure-JAX f32 reference for correctness checking
# ---------------------------------------------------------------------------
def reference_forward(params, x_nchw):
    x = jnp.transpose(x_nchw, (0, 2, 3, 1)).astype(jnp.float32)
    for i in (1, 2, 3):
        w_hwio = jnp.transpose(params[f"conv{i}_w"], (2, 3, 1, 0))
        x = jax.lax.conv_general_dilated(
            x, w_hwio, window_strides=(2, 2), padding=((1, 1), (1, 1)),
            dimension_numbers=("NHWC", "HWIO", "NHWC"))
        scale = params[f"bn{i}_gamma"] / jnp.sqrt(params[f"bn{i}_var"] + BN_EPS)
        shift = params[f"bn{i}_beta"] - params[f"bn{i}_mean"] * scale
        x = jnp.maximum(x * scale + shift, 0.0)
    pooled = jnp.mean(x, axis=(1, 2))
    return pooled @ params["fc_w"].T + params["fc_b"]


if __name__ == "__main__":
    key = jax.random.PRNGKey(0)
    pkey, xkey = jax.random.split(key)

    input_ch = 4
    params = init_params(pkey, input_ch)
    x = jax.random.normal(xkey, (2, input_ch, 16, 16), jnp.float32)  # NCHW

    fwd = jax.jit(fcdiscriminator_img_forward)
    out = jax.block_until_ready(fwd(params, x))
    ref = jax.block_until_ready(reference_forward(params, x))

    assert out.shape == (2, 1), out.shape
    # bf16 weights / bf16 inter-layer activations -> looser tolerance than a
    # pure-f32 comparison.
    assert jnp.allclose(out, ref, rtol=5e-2, atol=2e-2), (out, ref)
    print("KERNEL_OK")
</pallas_src>

<mosaic_0001>
module attributes {stable_mosaic.version = 11 : i64} {
  func.func @_conv_bn_relu_kernel(%arg0: i32, %arg1: memref<1x18x2x9x4xbf16, #tpu.memory_space<vmem>>, %arg2: memref<3x3x4x256xbf16, #tpu.memory_space<vmem>>, %arg3: memref<1x256xf32, #tpu.memory_space<vmem>>, %arg4: memref<1x8x8x256xbf16, #tpu.memory_space<vmem>>) attributes {dimension_semantics = [#tpu.dimension_semantics<parallel>], iteration_bounds = array<i64: 2>, scalar_prefetch = 0 : i64, scratch_operands = 0 : i64, tpu.core_type = #tpu.core_type<tc>, window_params = [{transform_indices = @transform_0, window_bounds = array<i64: 1, 18, 2, 9, 4>}, {pipeline_mode = #tpu.pipeline_mode<synchronous>, transform_indices = @transform_1, window_bounds = array<i64: 3, 3, 4, 256>}, {pipeline_mode = #tpu.pipeline_mode<synchronous>, transform_indices = @transform_2, window_bounds = array<i64: 1, 256>}, {transform_indices = @transform_3, window_bounds = array<i64: 1, 8, 8, 256>}]} {
    %c0 = arith.constant 0 : index
    %c0_0 = arith.constant 0 : index
    %0 = vector.load %arg3[%c0, %c0_0] : memref<1x256xf32, #tpu.memory_space<vmem>>, vector<1x256xf32>
    %c0_i32 = arith.constant 0 : i32
    %c8_i32 = arith.constant 8 : i32
    %1 = arith.addi %c0_i32, %c8_i32 : i32
    %c1_i32 = arith.constant 1 : i32
    scf.for %arg5 = %c0_i32 to %1 step %c1_i32  : i32 {
      %cst = arith.constant 0.000000e+00 : f32
      %2 = vector.broadcast %cst : f32 to vector<8x256xf32>
      %c2_i32 = arith.constant 2 : i32
      %3 = arith.muli %c2_i32, %arg5 : i32
      %c0_i32_2 = arith.constant 0 : i32
      %4 = arith.addi %3, %c0_i32_2 : i32
      %c0_3 = arith.constant 0 : index
      %5 = arith.index_cast %4 : i32 to index
      %c0_4 = arith.constant 0 : index
      %c0_5 = arith.constant 0 : index
      %c0_6 = arith.constant 0 : index
      %6 = vector.load %arg1[%c0_3, %5, %c0_4, %c0_5, %c0_6] : memref<1x18x2x9x4xbf16, #tpu.memory_space<vmem>>, vector<1x1x1x8x4xbf16>
      %7 = vector.shape_cast %6 : vector<1x1x1x8x4xbf16> to vector<8x4xbf16>
      %c0_7 = arith.constant 0 : index
      %c0_8 = arith.constant 0 : index
      %c0_9 = arith.constant 0 : index
      %c0_10 = arith.constant 0 : index
      %8 = vector.load %arg2[%c0_7, %c0_8, %c0_9, %c0_10] : memref<3x3x4x256xbf16, #tpu.memory_space<vmem>>, vector<1x1x4x256xbf16>
      %9 = vector.shape_cast %8 : vector<1x1x4x256xbf16> to vector<4x256xbf16>
      %cst_11 = arith.constant dense<0.000000e+00> : vector<8x256xf32>
      %10 = tpu.matmul %7, %9, %cst_11 {dimension_numbers = #tpu.dot_dimension_numbers<[1], [0], [0], [1], [0, 0, 1, 1], [], []>} : vector<8x4xbf16>, vector<4x256xbf16>, vector<8x256xf32> -> vector<8x256xf32>
      %11 = arith.addf %2, %10 : vector<8x256xf32>
      %c2_i32_12 = arith.constant 2 : i32
      %12 = arith.muli %c2_i32_12, %arg5 : i32
      %c0_i32_13 = arith.constant 0 : i32
      %13 = arith.addi %12, %c0_i32_13 : i32
      %c0_14 = arith.constant 0 : index
      %14 = arith.index_cast %13 : i32 to index
      %c1 = arith.constant 1 : index
      %c0_15 = arith.constant 0 : index
      %c0_16 = arith.constant 0 : index
      %15 = vector.load %arg1[%c0_14, %14, %c1, %c0_15, %c0_16] : memref<1x18x2x9x4xbf16, #tpu.memory_space<vmem>>, vector<1x1x1x8x4xbf16>
      %16 = vector.shape_cast %15 : vector<1x1x1x8x4xbf16> to vector<8x4xbf16>
      %c0_17 = arith.constant 0 : index
      %c1_18 = arith.constant 1 : index
      %c0_19 = arith.constant 0 : index
      %c0_20 = arith.constant 0 : index
      %17 = vector.load %arg2[%c0_17, %c1_18, %c0_19, %c0_20] : memref<3x3x4x256xbf16, #tpu.memory_space<vmem>>, vector<1x1x4x256xbf16>
      %18 = vector.shape_cast %17 : vector<1x1x4x256xbf16> to vector<4x256xbf16>
      %cst_21 = arith.constant dense<0.000000e+00> : vector<8x256xf32>
      %19 = tpu.matmul %16, %18, %cst_21 {dimension_numbers = #tpu.dot_dimension_numbers<[1], [0], [0], [1], [0, 0, 1, 1], [], []>} : vector<8x4xbf16>, vector<4x256xbf16>, vector<8x256xf32> -> vector<8x256xf32>
      %20 = arith.addf %11, %19 : vector<8x256xf32>
      %c2_i32_22 = arith.constant 2 : i32
      %21 = arith.muli %c2_i32_22, %arg5 : i32
      %c0_i32_23 = arith.constant 0 : i32
      %22 = arith.addi %21, %c0_i32_23 : i32
      %c0_24 = arith.constant 0 : index
      %23 = arith.index_cast %22 : i32 to index
      %c0_25 = arith.constant 0 : index
      %c1_26 = arith.constant 1 : index
      %c0_27 = arith.constant 0 : index
      %24 = vector.load %arg1[%c0_24, %23, %c0_25, %c1_26, %c0_27] : memref<1x18x2x9x4xbf16, #tpu.memory_space<vmem>>, vector<1x1x1x8x4xbf16>
      %25 = vector.shape_cast %24 : vector<1x1x1x8x4xbf16> to vector<8x4xbf16>
      %c0_28 = arith.constant 0 : index
      %c2 = arith.constant 2 : index
      %c0_29 = arith.constant 0 : index
      %c0_30 = arith.constant 0 : index
      %26 = vector.load %arg2[%c0_28, %c2, %c0_29, %c0_30] : memref<3x3x4x256xbf16, #tpu.memory_space<vmem>>, vector<1x1x4x256xbf16>
      %27 = vector.shape_cast %26 : vector<1x1x4x256xbf16> to vector<4x256xbf16>
      %cst_31 = arith.constant dense<0.000000e+00> : vector<8x256xf32>
      %28 = tpu.matmul %25, %27, %cst_31 {dimension_numbers = #tpu.dot_dimension_numbers<[1], [0], [0], [1], [0, 0, 1, 1], [], []>} : vector<8x4xbf16>, vector<4x256xbf16>, vector<8x256xf32> -> vector<8x256xf32>
      %29 = arith.addf %20, %28 : vector<8x256xf32>
      %c2_i32_32 = arith.constant 2 : i32
      %30 = arith.muli %c2_i32_32, %arg5 : i32
      %c1_i32_33 = arith.constant 1 : i32
      %31 = arith.addi %30, %c1_i32_33 : i32
      %c0_34 = arith.constant 0 : index
      %32 = arith.index_cast %31 : i32 to index
      %c0_35 = arith.constant 0 : index
      %c0_36 = arith.constant 0 : index
      %c0_37 = arith.constant 0 : index
      %33 = vector.load %arg1[%c0_34, %32, %c0_35, %c0_36, %c0_37] : memref<1x18x2x9x4xbf16, #tpu.memory_space<vmem>>, vector<1x1x1x8x4xbf16>
      %34 = vector.shape_cast %33 : vector<1x1x1x8x4xbf16> to vector<8x4xbf16>
      %c1_38 = arith.constant 1 : index
      %c0_39 = arith.constant 0 : index
      %c0_40 = arith.constant 0 : index
      %c0_41 = arith.constant 0 : index
      %35 = vector.load %arg2[%c1_38, %c0_39, %c0_40, %c0_41] : memref<3x3x4x256xbf16, #tpu.memory_space<vmem>>, vector<1x1x4x256xbf16>
      %36 = vector.shape_cast %35 : vector<1x1x4x256xbf16> to vector<4x256xbf16>
      %cst_42 = arith.constant dense<0.000000e+00> : vector<8x256xf32>
      %37 = tpu.matmul %34, %36, %cst_42 {dimension_numbers = #tpu.dot_dimension_numbers<[1], [0], [0], [1], [0, 0, 1, 1], [], []>} : vector<8x4xbf16>, vector<4x256xbf16>, vector<8x256xf32> -> vector<8x256xf32>
      %38 = arith.addf %29, %37 : vector<8x256xf32>
      %c2_i32_43 = arith.constant 2 : i32
      %39 = arith.muli %c2_i32_43, %arg5 : i32
      %c1_i32_44 = arith.constant 1 : i32
      %40 = arith.addi %39, %c1_i32_44 : i32
      %c0_45 = arith.constant 0 : index
      %41 = arith.index_cast %40 : i32 to index
      %c1_46 = arith.constant 1 : index
      %c0_47 = arith.constant 0 : index
      %c0_48 = arith.constant 0 : index
      %42 = vector.load %arg1[%c0_45, %41, %c1_46, %c0_47, %c0_48] : memref<1x18x2x9x4xbf16, #tpu.memory_space<vmem>>, vector<1x1x1x8x4xbf16>
      %43 = vector.shape_cast %42 : vector<1x1x1x8x4xbf16> to vector<8x4xbf16>
      %c1_49 = arith.constant 1 : index
      %c1_50 = arith.constant 1 : index
      %c0_51 = arith.constant 0 : index
      %c0_52 = arith.constant 0 : index
      %44 = vector.load %arg2[%c1_49, %c1_50, %c0_51, %c0_52] : memref<3x3x4x256xbf16, #tpu.memory_space<vmem>>, vector<1x1x4x256xbf16>
      %45 = vector.shape_cast %44 : vector<1x1x4x256xbf16> to vector<4x256xbf16>
      %cst_53 = arith.constant dense<0.000000e+00> : vector<8x256xf32>
      %46 = tpu.matmul %43, %45, %cst_53 {dimension_numbers = #tpu.dot_dimension_numbers<[1], [0], [0], [1], [0, 0, 1, 1], [], []>} : vector<8x4xbf16>, vector<4x256xbf16>, vector<8x256xf32> -> vector<8x256xf32>
      %47 = arith.addf %38, %46 : vector<8x256xf32>
      %c2_i32_54 = arith.constant 2 : i32
      %48 = arith.muli %c2_i32_54, %arg5 : i32
      %c1_i32_55 = arith.constant 1 : i32
      %49 = arith.addi %48, %c1_i32_55 : i32
      %c0_56 = arith.constant 0 : index
      %50 = arith.index_cast %49 : i32 to index
      %c0_57 = arith.constant 0 : index
      %c1_58 = arith.constant 1 : index
      %c0_59 = arith.constant 0 : index
      %51 = vector.load %arg1[%c0_56, %50, %c0_57, %c1_58, %c0_59] : memref<1x18x2x9x4xbf16, #tpu.memory_space<vmem>>, vector<1x1x1x8x4xbf16>
      %52 = vector.shape_cast %51 : vector<1x1x1x8x4xbf16> to vector<8x4xbf16>
      %c1_60 = arith.constant 1 : index
      %c2_61 = arith.constant 2 : index
      %c0_62 = arith.constant 0 : index
      %c0_63 = arith.constant 0 : index
      %53 = vector.load %arg2[%c1_60, %c2_61, %c0_62, %c0_63] : memref<3x3x4x256xbf16, #tpu.memory_space<vmem>>, vector<1x1x4x256xbf16>
      %54 = vector.shape_cast %53 : vector<1x1x4x256xbf16> to vector<4x256xbf16>
      %cst_64 = arith.constant dense<0.000000e+00> : vector<8x256xf32>
      %55 = tpu.matmul %52, %54, %cst_64 {dimension_numbers = #tpu.dot_dimension_numbers<[1], [0], [0], [1], [0, 0, 1, 1], [], []>} : vector<8x4xbf16>, vector<4x256xbf16>, vector<8x256xf32> -> vector<8x256xf32>
      %56 = arith.addf %47, %55 : vector<8x256xf32>
      %c2_i32_65 = arith.constant 2 : i32
      %57 = arith.muli %c2_i32_65, %arg5 : i32
      %c2_i32_66 = arith.constant 2 : i32
      %58 = arith.addi %57, %c2_i32_66 : i32
      %c0_67 = arith.constant 0 : index
      %59 = arith.index_cast %58 : i32 to index
      %c0_68 = arith.constant 0 : index
      %c0_69 = arith.constant 0 : index
      %c0_70 = arith.constant 0 : index
      %60 = vector.load %arg1[%c0_67, %59, %c0_68, %c0_69, %c0_70] : memref<1x18x2x9x4xbf16, #tpu.memory_space<vmem>>, vector<1x1x1x8x4xbf16>
      %61 = vector.shape_cast %60 : vector<1x1x1x8x4xbf16> to vector<8x4xbf16>
      %c2_71 = arith.constant 2 : index
      %c0_72 = arith.constant 0 : index
      %c0_73 = arith.constant 0 : index
      %c0_74 = arith.constant 0 : index
      %62 = vector.load %arg2[%c2_71, %c0_72, %c0_73, %c0_74] : memref<3x3x4x256xbf16, #tpu.memory_space<vmem>>, vector<1x1x4x256xbf16>
      %63 = vector.shape_cast %62 : vector<1x1x4x256xbf16> to vector<4x256xbf16>
      %cst_75 = arith.constant dense<0.000000e+00> : vector<8x256xf32>
      %64 = tpu.matmul %61, %63, %cst_75 {dimension_numbers = #tpu.dot_dimension_numbers<[1], [0], [0], [1], [0, 0, 1, 1], [], []>} : vector<8x4xbf16>, vector<4x256xbf16>, vector<8x256xf32> -> vector<8x256xf32>
      %65 = arith.addf %56, %64 : vector<8x256xf32>
      %c2_i32_76 = arith.constant 2 : i32
      %66 = arith.muli %c2_i32_76, %arg5 : i32
      %c2_i32_77 = arith.constant 2 : i32
      %67 = arith.addi %66, %c2_i32_77 : i32
      %c0_78 = arith.constant 0 : index
      %68 = arith.index_cast %67 : i32 to index
      %c1_79 = arith.constant 1 : index
      %c0_80 = arith.constant 0 : index
      %c0_81 = arith.constant 0 : index
      %69 = vector.load %arg1[%c0_78, %68, %c1_79, %c0_80, %c0_81] : memref<1x18x2x9x4xbf16, #tpu.memory_space<vmem>>, vector<1x1x1x8x4xbf16>
      %70 = vector.shape_cast %69 : vector<1x1x1x8x4xbf16> to vector<8x4xbf16>
      %c2_82 = arith.constant 2 : index
      %c1_83 = arith.constant 1 : index
      %c0_84 = arith.constant 0 : index
      %c0_85 = arith.constant 0 : index
      %71 = vector.load %arg2[%c2_82, %c1_83, %c0_84, %c0_85] : memref<3x3x4x256xbf16, #tpu.memory_space<vmem>>, vector<1x1x4x256xbf16>
      %72 = vector.shape_cast %71 : vector<1x1x4x256xbf16> to vector<4x256xbf16>
      %cst_86 = arith.constant dense<0.000000e+00> : vector<8x256xf32>
      %73 = tpu.matmul %70, %72, %cst_86 {dimension_numbers = #tpu.dot_dimension_numbers<[1], [0], [0], [1], [0, 0, 1, 1], [], []>} : vector<8x4xbf16>, vector<4x256xbf16>, vector<8x256xf32> -> vector<8x256xf32>
      %74 = arith.addf %65, %73 : vector<8x256xf32>
      %c2_i32_87 = arith.constant 2 : i32
      %75 = arith.muli %c2_i32_87, %arg5 : i32
      %c2_i32_88 = arith.constant 2 : i32
      %76 = arith.addi %75, %c2_i32_88 : i32
      %c0_89 = arith.constant 0 : index
      %77 = arith.index_cast %76 : i32 to index
      %c0_90 = arith.constant 0 : index
      %c1_91 = arith.constant 1 : index
      %c0_92 = arith.constant 0 : index
      %78 = vector.load %arg1[%c0_89, %77, %c0_90, %c1_91, %c0_92] : memref<1x18x2x9x4xbf16, #tpu.memory_space<vmem>>, vector<1x1x1x8x4xbf16>
      %79 = vector.shape_cast %78 : vector<1x1x1x8x4xbf16> to vector<8x4xbf16>
      %c2_93 = arith.constant 2 : index
      %c2_94 = arith.constant 2 : index
      %c0_95 = arith.constant 0 : index
      %c0_96 = arith.constant 0 : index
      %80 = vector.load %arg2[%c2_93, %c2_94, %c0_95, %c0_96] : memref<3x3x4x256xbf16, #tpu.memory_space<vmem>>, vector<1x1x4x256xbf16>
      %81 = vector.shape_cast %80 : vector<1x1x4x256xbf16> to vector<4x256xbf16>
      %cst_97 = arith.constant dense<0.000000e+00> : vector<8x256xf32>
      %82 = tpu.matmul %79, %81, %cst_97 {dimension_numbers = #tpu.dot_dimension_numbers<[1], [0], [0], [1], [0, 0, 1, 1], [], []>} : vector<8x4xbf16>, vector<4x256xbf16>, vector<8x256xf32> -> vector<8x256xf32>
      %83 = arith.addf %74, %82 : vector<8x256xf32>
      %84 = vector.broadcast %0 : vector<1x256xf32> to vector<8x256xf32>
      %85 = arith.addf %83, %84 : vector<8x256xf32>
      %cst_98 = arith.constant 0.000000e+00 : f32
      %86 = vector.broadcast %cst_98 : f32 to vector<8x256xf32>
      %87 = arith.maximumf %85, %86 : vector<8x256xf32>
      %88 = arith.truncf %87 : vector<8x256xf32> to vector<8x256xbf16>
      %c0_99 = arith.constant 0 : index
      %89 = arith.index_cast %arg5 : i32 to index
      %c0_100 = arith.constant 0 : index
      %c0_101 = arith.constant 0 : index
      %90 = vector.load %arg4[%c0_99, %89, %c0_100, %c0_101] : memref<1x8x8x256xbf16, #tpu.memory_space<vmem>>, vector<1x1x8x256xbf16>
      %91 = vector.shape_cast %90 : vector<1x1x8x256xbf16> to vector<8x256xbf16>
      %92 = vector.shape_cast %88 : vector<8x256xbf16> to vector<1x1x8x256xbf16>
      tpu.vector_store %arg4[%c0_99, %89, %c0_100, %c0_101], %92 {strides = array<i32>} : memref<1x8x8x256xbf16, #tpu.memory_space<vmem>>, vector<1x1x8x256xbf16>,
    }
    %c8_i32_1 = arith.constant 8 : i32
    return
  }
  func.func @transform_0(%arg0: i32) -> (i32, i32, i32, i32, i32) {
    %c0_i32 = arith.constant 0 : i32
    %c0_i32_0 = arith.constant 0 : i32
    %c0_i32_1 = arith.constant 0 : i32
    %c0_i32_2 = arith.constant 0 : i32
    %c0_i32_3 = arith.constant 0 : i32
    return %arg0, %c0_i32, %c0_i32_0, %c0_i32_1, %c0_i32_2 : i32, i32, i32, i32, i32
  }
  func.func @transform_1(%arg0: i32) -> (i32, i32, i32, i32) {
    %c0_i32 = arith.constant 0 : i32
    %c0_i32_0 = arith.constant 0 : i32
    %c0_i32_1 = arith.constant 0 : i32
    %c0_i32_2 = arith.constant 0 : i32
    %c0_i32_3 = arith.constant 0 : i32
    return %c0_i32, %c0_i32_0, %c0_i32_1, %c0_i32_2 : i32, i32, i32, i32
  }
  func.func @transform_2(%arg0: i32) -> (i32, i32) {
    %c0_i32 = arith.constant 0 : i32
    %c0_i32_0 = arith.constant 0 : i32
    %c0_i32_1 = arith.constant 0 : i32
    return %c0_i32, %c0_i32_0 : i32, i32
  }
  func.func @transform_3(%arg0: i32) -> (i32, i32, i32, i32) {
    %c0_i32 = arith.constant 0 : i32
    %c0_i32_0 = arith.constant 0 : i32
    %c0_i32_1 = arith.constant 0 : i32
    %c0_i32_2 = arith.constant 0 : i32
    return %arg0, %c0_i32, %c0_i32_0, %c0_i32_1 : i32, i32, i32, i32
  }
}

module attributes {stable_mosaic.version = 11 : i64} {
  func.func @_conv_bn_relu_kernel(%arg0: i32, %arg1: memref<1x10x2x5x256xbf16, #tpu.memory_space<vmem>>, %arg2: memref<3x3x256x256xbf16, #tpu.memory_space<vmem>>, %arg3: memref<1x256xf32, #tpu.memory_space<vmem>>, %arg4: memref<1x4x4x256xbf16, #tpu.memory_space<vmem>>) attributes {dimension_semantics = [#tpu.dimension_semantics<parallel>], iteration_bounds = array<i64: 2>, scalar_prefetch = 0 : i64, scratch_operands = 0 : i64, tpu.core_type = #tpu.core_type<tc>, window_params = [{transform_indices = @transform_0, window_bounds = array<i64: 1, 10, 2, 5, 256>}, {pipeline_mode = #tpu.pipeline_mode<synchronous>, transform_indices = @transform_1, window_bounds = array<i64: 3, 3, 256, 256>}, {pipeline_mode = #tpu.pipeline_mode<synchronous>, transform_indices = @transform_2, window_bounds = array<i64: 1, 256>}, {transform_indices = @transform_3, window_bounds = array<i64: 1, 4, 4, 256>}]} {
    %c0 = arith.constant 0 : index
    %c0_0 = arith.constant 0 : index
    %0 = vector.load %arg3[%c0, %c0_0] : memref<1x256xf32, #tpu.memory_space<vmem>>, vector<1x256xf32>
    %c0_i32 = arith.constant 0 : i32
    %c4_i32 = arith.constant 4 : i32
    %1 = arith.addi %c0_i32, %c4_i32 : i32
    %c1_i32 = arith.constant 1 : i32
    scf.for %arg5 = %c0_i32 to %1 step %c1_i32  : i32 {
      %cst = arith.constant 0.000000e+00 : f32
      %2 = vector.broadcast %cst : f32 to vector<4x256xf32>
      %c2_i32 = arith.constant 2 : i32
      %3 = arith.muli %c2_i32, %arg5 : i32
      %c0_i32_2 = arith.constant 0 : i32
      %4 = arith.addi %3, %c0_i32_2 : i32
      %c0_3 = arith.constant 0 : index
      %5 = arith.index_cast %4 : i32 to index
      %c0_4 = arith.constant 0 : index
      %c0_5 = arith.constant 0 : index
      %c0_6 = arith.constant 0 : index
      %6 = vector.load %arg1[%c0_3, %5, %c0_4, %c0_5, %c0_6] : memref<1x10x2x5x256xbf16, #tpu.memory_space<vmem>>, vector<1x1x1x4x256xbf16>
      %7 = vector.shape_cast %6 : vector<1x1x1x4x256xbf16> to vector<4x256xbf16>
      %c0_7 = arith.constant 0 : index
      %c0_8 = arith.constant 0 : index
      %c0_9 = arith.constant 0 : index
      %c0_10 = arith.constant 0 : index
      %8 = vector.load %arg2[%c0_7, %c0_8, %c0_9, %c0_10] : memref<3x3x256x256xbf16, #tpu.memory_space<vmem>>, vector<1x1x256x256xbf16>
      %9 = vector.shape_cast %8 : vector<1x1x256x256xbf16> to vector<256x256xbf16>
      %cst_11 = arith.constant dense<0.000000e+00> : vector<4x256xf32>
      %10 = tpu.matmul %7, %9, %cst_11 {dimension_numbers = #tpu.dot_dimension_numbers<[1], [0], [0], [1], [0, 0, 1, 1], [], []>} : vector<4x256xbf16>, vector<256x256xbf16>, vector<4x256xf32> -> vector<4x256xf32>
      %11 = arith.addf %2, %10 : vector<4x256xf32>
      %c2_i32_12 = arith.constant 2 : i32
      %12 = arith.muli %c2_i32_12, %arg5 : i32
      %c0_i32_13 = arith.constant 0 : i32
      %13 = arith.addi %12, %c0_i32_13 : i32
      %c0_14 = arith.constant 0 : index
      %14 = arith.index_cast %13 : i32 to index
      %c1 = arith.constant 1 : index
      %c0_15 = arith.constant 0 : index
      %c0_16 = arith.constant 0 : index
      %15 = vector.load %arg1[%c0_14, %14, %c1, %c0_15, %c0_16] : memref<1x10x2x5x256xbf16, #tpu.memory_space<vmem>>, vector<1x1x1x4x256xbf16>
      %16 = vector.shape_cast %15 : vector<1x1x1x4x256xbf16> to vector<4x256xbf16>
      %c0_17 = arith.constant 0 : index
      %c1_18 = arith.constant 1 : index
      %c0_19 = arith.constant 0 : index
      %c0_20 = arith.constant 0 : index
      %17 = vector.load %arg2[%c0_17, %c1_18, %c0_19, %c0_20] : memref<3x3x256x256xbf16, #tpu.memory_space<vmem>>, vector<1x1x256x256xbf16>
      %18 = vector.shape_cast %17 : vector<1x1x256x256xbf16> to vector<256x256xbf16>
      %cst_21 = arith.constant dense<0.000000e+00> : vector<4x256xf32>
      %19 = tpu.matmul %16, %18, %cst_21 {dimension_numbers = #tpu.dot_dimension_numbers<[1], [0], [0], [1], [0, 0, 1, 1], [], []>} : vector<4x256xbf16>, vector<256x256xbf16>, vector<4x256xf32> -> vector<4x256xf32>
      %20 = arith.addf %11, %19 : vector<4x256xf32>
      %c2_i32_22 = arith.constant 2 : i32
      %21 = arith.muli %c2_i32_22, %arg5 : i32
      %c0_i32_23 = arith.constant 0 : i32
      %22 = arith.addi %21, %c0_i32_23 : i32
      %c0_24 = arith.constant 0 : index
      %23 = arith.index_cast %22 : i32 to index
      %c0_25 = arith.constant 0 : index
      %c1_26 = arith.constant 1 : index
      %c0_27 = arith.constant 0 : index
      %24 = vector.load %arg1[%c0_24, %23, %c0_25, %c1_26, %c0_27] : memref<1x10x2x5x256xbf16, #tpu.memory_space<vmem>>, vector<1x1x1x4x256xbf16>
      %25 = vector.shape_cast %24 : vector<1x1x1x4x256xbf16> to vector<4x256xbf16>
      %c0_28 = arith.constant 0 : index
      %c2 = arith.constant 2 : index
      %c0_29 = arith.constant 0 : index
      %c0_30 = arith.constant 0 : index
      %26 = vector.load %arg2[%c0_28, %c2, %c0_29, %c0_30] : memref<3x3x256x256xbf16, #tpu.memory_space<vmem>>, vector<1x1x256x256xbf16>
      %27 = vector.shape_cast %26 : vector<1x1x256x256xbf16> to vector<256x256xbf16>
      %cst_31 = arith.constant dense<0.000000e+00> : vector<4x256xf32>
      %28 = tpu.matmul %25, %27, %cst_31 {dimension_numbers = #tpu.dot_dimension_numbers<[1], [0], [0], [1], [0, 0, 1, 1], [], []>} : vector<4x256xbf16>, vector<256x256xbf16>, vector<4x256xf32> -> vector<4x256xf32>
      %29 = arith.addf %20, %28 : vector<4x256xf32>
      %c2_i32_32 = arith.constant 2 : i32
      %30 = arith.muli %c2_i32_32, %arg5 : i32
      %c1_i32_33 = arith.constant 1 : i32
      %31 = arith.addi %30, %c1_i32_33 : i32
      %c0_34 = arith.constant 0 : index
      %32 = arith.index_cast %31 : i32 to index
      %c0_35 = arith.constant 0 : index
      %c0_36 = arith.constant 0 : index
      %c0_37 = arith.constant 0 : index
      %33 = vector.load %arg1[%c0_34, %32, %c0_35, %c0_36, %c0_37] : memref<1x10x2x5x256xbf16, #tpu.memory_space<vmem>>, vector<1x1x1x4x256xbf16>
      %34 = vector.shape_cast %33 : vector<1x1x1x4x256xbf16> to vector<4x256xbf16>
      %c1_38 = arith.constant 1 : index
      %c0_39 = arith.constant 0 : index
      %c0_40 = arith.constant 0 : index
      %c0_41 = arith.constant 0 : index
      %35 = vector.load %arg2[%c1_38, %c0_39, %c0_40, %c0_41] : memref<3x3x256x256xbf16, #tpu.memory_space<vmem>>, vector<1x1x256x256xbf16>
      %36 = vector.shape_cast %35 : vector<1x1x256x256xbf16> to vector<256x256xbf16>
      %cst_42 = arith.constant dense<0.000000e+00> : vector<4x256xf32>
      %37 = tpu.matmul %34, %36, %cst_42 {dimension_numbers = #tpu.dot_dimension_numbers<[1], [0], [0], [1], [0, 0, 1, 1], [], []>} : vector<4x256xbf16>, vector<256x256xbf16>, vector<4x256xf32> -> vector<4x256xf32>
      %38 = arith.addf %29, %37 : vector<4x256xf32>
      %c2_i32_43 = arith.constant 2 : i32
      %39 = arith.muli %c2_i32_43, %arg5 : i32
      %c1_i32_44 = arith.constant 1 : i32
      %40 = arith.addi %39, %c1_i32_44 : i32
      %c0_45 = arith.constant 0 : index
      %41 = arith.index_cast %40 : i32 to index
      %c1_46 = arith.constant 1 : index
      %c0_47 = arith.constant 0 : index
      %c0_48 = arith.constant 0 : index
      %42 = vector.load %arg1[%c0_45, %41, %c1_46, %c0_47, %c0_48] : memref<1x10x2x5x256xbf16, #tpu.memory_space<vmem>>, vector<1x1x1x4x256xbf16>
      %43 = vector.shape_cast %42 : vector<1x1x1x4x256xbf16> to vector<4x256xbf16>
      %c1_49 = arith.constant 1 : index
      %c1_50 = arith.constant 1 : index
      %c0_51 = arith.constant 0 : index
      %c0_52 = arith.constant 0 : index
      %44 = vector.load %arg2[%c1_49, %c1_50, %c0_51, %c0_52] : memref<3x3x256x256xbf16, #tpu.memory_space<vmem>>, vector<1x1x256x256xbf16>
      %45 = vector.shape_cast %44 : vector<1x1x256x256xbf16> to vector<256x256xbf16>
      %cst_53 = arith.constant dense<0.000000e+00> : vector<4x256xf32>
      %46 = tpu.matmul %43, %45, %cst_53 {dimension_numbers = #tpu.dot_dimension_numbers<[1], [0], [0], [1], [0, 0, 1, 1], [], []>} : vector<4x256xbf16>, vector<256x256xbf16>, vector<4x256xf32> -> vector<4x256xf32>
      %47 = arith.addf %38, %46 : vector<4x256xf32>
      %c2_i32_54 = arith.constant 2 : i32
      %48 = arith.muli %c2_i32_54, %arg5 : i32
      %c1_i32_55 = arith.constant 1 : i32
      %49 = arith.addi %48, %c1_i32_55 : i32
      %c0_56 = arith.constant 0 : index
      %50 = arith.index_cast %49 : i32 to index
      %c0_57 = arith.constant 0 : index
      %c1_58 = arith.constant 1 : index
      %c0_59 = arith.constant 0 : index
      %51 = vector.load %arg1[%c0_56, %50, %c0_57, %c1_58, %c0_59] : memref<1x10x2x5x256xbf16, #tpu.memory_space<vmem>>, vector<1x1x1x4x256xbf16>
      %52 = vector.shape_cast %51 : vector<1x1x1x4x256xbf16> to vector<4x256xbf16>
      %c1_60 = arith.constant 1 : index
      %c2_61 = arith.constant 2 : index
      %c0_62 = arith.constant 0 : index
      %c0_63 = arith.constant 0 : index
      %53 = vector.load %arg2[%c1_60, %c2_61, %c0_62, %c0_63] : memref<3x3x256x256xbf16, #tpu.memory_space<vmem>>, vector<1x1x256x256xbf16>
      %54 = vector.shape_cast %53 : vector<1x1x256x256xbf16> to vector<256x256xbf16>
      %cst_64 = arith.constant dense<0.000000e+00> : vector<4x256xf32>
      %55 = tpu.matmul %52, %54, %cst_64 {dimension_numbers = #tpu.dot_dimension_numbers<[1], [0], [0], [1], [0, 0, 1, 1], [], []>} : vector<4x256xbf16>, vector<256x256xbf16>, vector<4x256xf32> -> vector<4x256xf32>
      %56 = arith.addf %47, %55 : vector<4x256xf32>
      %c2_i32_65 = arith.constant 2 : i32
      %57 = arith.muli %c2_i32_65, %arg5 : i32
      %c2_i32_66 = arith.constant 2 : i32
      %58 = arith.addi %57, %c2_i32_66 : i32
      %c0_67 = arith.constant 0 : index
      %59 = arith.index_cast %58 : i32 to index
      %c0_68 = arith.constant 0 : index
      %c0_69 = arith.constant 0 : index
      %c0_70 = arith.constant 0 : index
      %60 = vector.load %arg1[%c0_67, %59, %c0_68, %c0_69, %c0_70] : memref<1x10x2x5x256xbf16, #tpu.memory_space<vmem>>, vector<1x1x1x4x256xbf16>
      %61 = vector.shape_cast %60 : vector<1x1x1x4x256xbf16> to vector<4x256xbf16>
      %c2_71 = arith.constant 2 : index
      %c0_72 = arith.constant 0 : index
      %c0_73 = arith.constant 0 : index
      %c0_74 = arith.constant 0 : index
      %62 = vector.load %arg2[%c2_71, %c0_72, %c0_73, %c0_74] : memref<3x3x256x256xbf16, #tpu.memory_space<vmem>>, vector<1x1x256x256xbf16>
      %63 = vector.shape_cast %62 : vector<1x1x256x256xbf16> to vector<256x256xbf16>
      %cst_75 = arith.constant dense<0.000000e+00> : vector<4x256xf32>
      %64 = tpu.matmul %61, %63, %cst_75 {dimension_numbers = #tpu.dot_dimension_numbers<[1], [0], [0], [1], [0, 0, 1, 1], [], []>} : vector<4x256xbf16>, vector<256x256xbf16>, vector<4x256xf32> -> vector<4x256xf32>
      %65 = arith.addf %56, %64 : vector<4x256xf32>
      %c2_i32_76 = arith.constant 2 : i32
      %66 = arith.muli %c2_i32_76, %arg5 : i32
      %c2_i32_77 = arith.constant 2 : i32
      %67 = arith.addi %66, %c2_i32_77 : i32
      %c0_78 = arith.constant 0 : index
      %68 = arith.index_cast %67 : i32 to index
      %c1_79 = arith.constant 1 : index
      %c0_80 = arith.constant 0 : index
      %c0_81 = arith.constant 0 : index
      %69 = vector.load %arg1[%c0_78, %68, %c1_79, %c0_80, %c0_81] : memref<1x10x2x5x256xbf16, #tpu.memory_space<vmem>>, vector<1x1x1x4x256xbf16>
      %70 = vector.shape_cast %69 : vector<1x1x1x4x256xbf16> to vector<4x256xbf16>
      %c2_82 = arith.constant 2 : index
      %c1_83 = arith.constant 1 : index
      %c0_84 = arith.constant 0 : index
      %c0_85 = arith.constant 0 : index
      %71 = vector.load %arg2[%c2_82, %c1_83, %c0_84, %c0_85] : memref<3x3x256x256xbf16, #tpu.memory_space<vmem>>, vector<1x1x256x256xbf16>
      %72 = vector.shape_cast %71 : vector<1x1x256x256xbf16> to vector<256x256xbf16>
      %cst_86 = arith.constant dense<0.000000e+00> : vector<4x256xf32>
      %73 = tpu.matmul %70, %72, %cst_86 {dimension_numbers = #tpu.dot_dimension_numbers<[1], [0], [0], [1], [0, 0, 1, 1], [], []>} : vector<4x256xbf16>, vector<256x256xbf16>, vector<4x256xf32> -> vector<4x256xf32>
      %74 = arith.addf %65, %73 : vector<4x256xf32>
      %c2_i32_87 = arith.constant 2 : i32
      %75 = arith.muli %c2_i32_87, %arg5 : i32
      %c2_i32_88 = arith.constant 2 : i32
      %76 = arith.addi %75, %c2_i32_88 : i32
      %c0_89 = arith.constant 0 : index
      %77 = arith.index_cast %76 : i32 to index
      %c0_90 = arith.constant 0 : index
      %c1_91 = arith.constant 1 : index
      %c0_92 = arith.constant 0 : index
      %78 = vector.load %arg1[%c0_89, %77, %c0_90, %c1_91, %c0_92] : memref<1x10x2x5x256xbf16, #tpu.memory_space<vmem>>, vector<1x1x1x4x256xbf16>
      %79 = vector.shape_cast %78 : vector<1x1x1x4x256xbf16> to vector<4x256xbf16>
      %c2_93 = arith.constant 2 : index
      %c2_94 = arith.constant 2 : index
      %c0_95 = arith.constant 0 : index
      %c0_96 = arith.constant 0 : index
      %80 = vector.load %arg2[%c2_93, %c2_94, %c0_95, %c0_96] : memref<3x3x256x256xbf16, #tpu.memory_space<vmem>>, vector<1x1x256x256xbf16>
      %81 = vector.shape_cast %80 : vector<1x1x256x256xbf16> to vector<256x256xbf16>
      %cst_97 = arith.constant dense<0.000000e+00> : vector<4x256xf32>
      %82 = tpu.matmul %79, %81, %cst_97 {dimension_numbers = #tpu.dot_dimension_numbers<[1], [0], [0], [1], [0, 0, 1, 1], [], []>} : vector<4x256xbf16>, vector<256x256xbf16>, vector<4x256xf32> -> vector<4x256xf32>
      %83 = arith.addf %74, %82 : vector<4x256xf32>
      %84 = vector.broadcast %0 : vector<1x256xf32> to vector<4x256xf32>
      %85 = arith.addf %83, %84 : vector<4x256xf32>
      %cst_98 = arith.constant 0.000000e+00 : f32
      %86 = vector.broadcast %cst_98 : f32 to vector<4x256xf32>
      %87 = arith.maximumf %85, %86 : vector<4x256xf32>
      %88 = arith.truncf %87 : vector<4x256xf32> to vector<4x256xbf16>
      %c0_99 = arith.constant 0 : index
      %89 = arith.index_cast %arg5 : i32 to index
      %c0_100 = arith.constant 0 : index
      %c0_101 = arith.constant 0 : index
      %90 = vector.load %arg4[%c0_99, %89, %c0_100, %c0_101] : memref<1x4x4x256xbf16, #tpu.memory_space<vmem>>, vector<1x1x4x256xbf16>
      %91 = vector.shape_cast %90 : vector<1x1x4x256xbf16> to vector<4x256xbf16>
      %92 = vector.shape_cast %88 : vector<4x256xbf16> to vector<1x1x4x256xbf16>
      tpu.vector_store %arg4[%c0_99, %89, %c0_100, %c0_101], %92 {strides = array<i32>} : memref<1x4x4x256xbf16, #tpu.memory_space<vmem>>, vector<1x1x4x256xbf16>,
    }
    %c4_i32_1 = arith.constant 4 : i32
    return
  }
  func.func @transform_0(%arg0: i32) -> (i32, i32, i32, i32, i32) {
    %c0_i32 = arith.constant 0 : i32
    %c0_i32_0 = arith.constant 0 : i32
    %c0_i32_1 = arith.constant 0 : i32
    %c0_i32_2 = arith.constant 0 : i32
    %c0_i32_3 = arith.constant 0 : i32
    return %arg0, %c0_i32, %c0_i32_0, %c0_i32_1, %c0_i32_2 : i32, i32, i32, i32, i32
  }
  func.func @transform_1(%arg0: i32) -> (i32, i32, i32, i32) {
    %c0_i32 = arith.constant 0 : i32
    %c0_i32_0 = arith.constant 0 : i32
    %c0_i32_1 = arith.constant 0 : i32
    %c0_i32_2 = arith.constant 0 : i32
    %c0_i32_3 = arith.constant 0 : i32
    return %c0_i32, %c0_i32_0, %c0_i32_1, %c0_i32_2 : i32, i32, i32, i32
  }
  func.func @transform_2(%arg0: i32) -> (i32, i32) {
    %c0_i32 = arith.constant 0 : i32
    %c0_i32_0 = arith.constant 0 : i32
    %c0_i32_1 = arith.constant 0 : i32
    return %c0_i32, %c0_i32_0 : i32, i32
  }
  func.func @transform_3(%arg0: i32) -> (i32, i32, i32, i32) {
    %c0_i32 = arith.constant 0 : i32
    %c0_i32_0 = arith.constant 0 : i32
    %c0_i32_1 = arith.constant 0 : i32
    %c0_i32_2 = arith.constant 0 : i32
    return %arg0, %c0_i32, %c0_i32_0, %c0_i32_1 : i32, i32, i32, i32
  }
}

module attributes {stable_mosaic.version = 11 : i64} {
  func.func @_conv_bn_relu_pool_fc_kernel(%arg0: i32, %arg1: memref<1x6x2x3x256xbf16, #tpu.memory_space<vmem>>, %arg2: memref<3x3x256x256xbf16, #tpu.memory_space<vmem>>, %arg3: memref<1x256xf32, #tpu.memory_space<vmem>>, %arg4: memref<256x1xf32, #tpu.memory_space<vmem>>, %arg5: memref<1x1xf32, #tpu.memory_space<vmem>>, %arg6: memref<1x1x1xf32, #tpu.memory_space<vmem>>) attributes {dimension_semantics = [#tpu.dimension_semantics<parallel>], iteration_bounds = array<i64: 2>, scalar_prefetch = 0 : i64, scratch_operands = 0 : i64, tpu.core_type = #tpu.core_type<tc>, window_params = [{transform_indices = @transform_0, window_bounds = array<i64: 1, 6, 2, 3, 256>}, {pipeline_mode = #tpu.pipeline_mode<synchronous>, transform_indices = @transform_1, window_bounds = array<i64: 3, 3, 256, 256>}, {pipeline_mode = #tpu.pipeline_mode<synchronous>, transform_indices = @transform_2, window_bounds = array<i64: 1, 256>}, {pipeline_mode = #tpu.pipeline_mode<synchronous>, transform_indices = @transform_3, window_bounds = array<i64: 256, 1>}, {pipeline_mode = #tpu.pipeline_mode<synchronous>, transform_indices = @transform_4, window_bounds = array<i64: 1, 1>}, {transform_indices = @transform_5, window_bounds = array<i64: 1, 1, 1>}]} {
    %c0 = arith.constant 0 : index
    %c0_0 = arith.constant 0 : index
    %0 = vector.load %arg3[%c0, %c0_0] : memref<1x256xf32, #tpu.memory_space<vmem>>, vector<1x256xf32>
    %cst = arith.constant 0.000000e+00 : f32
    %1 = vector.broadcast %cst : f32 to vector<1x256xf32>
    %c0_i32 = arith.constant 0 : i32
    %c2_i32 = arith.constant 2 : i32
    %2 = arith.addi %c0_i32, %c2_i32 : i32
    %c1_i32 = arith.constant 1 : i32
    %3 = scf.for %arg7 = %c0_i32 to %2 step %c1_i32 iter_args(%arg8 = %1) -> (vector<1x256xf32>)  : i32 {
      %cst_10 = arith.constant 0.000000e+00 : f32
      %11 = vector.broadcast %cst_10 : f32 to vector<2x256xf32>
      %c2_i32_11 = arith.constant 2 : i32
      %12 = arith.muli %c2_i32_11, %arg7 : i32
      %c0_i32_12 = arith.constant 0 : i32
      %13 = arith.addi %12, %c0_i32_12 : i32
      %c0_13 = arith.constant 0 : index
      %14 = arith.index_cast %13 : i32 to index
      %c0_14 = arith.constant 0 : index
      %c0_15 = arith.constant 0 : index
      %c0_16 = arith.constant 0 : index
      %15 = vector.load %arg1[%c0_13, %14, %c0_14, %c0_15, %c0_16] : memref<1x6x2x3x256xbf16, #tpu.memory_space<vmem>>, vector<1x1x1x2x256xbf16>
      %16 = vector.shape_cast %15 : vector<1x1x1x2x256xbf16> to vector<2x256xbf16>
      %c0_17 = arith.constant 0 : index
      %c0_18 = arith.constant 0 : index
      %c0_19 = arith.constant 0 : index
      %c0_20 = arith.constant 0 : index
      %17 = vector.load %arg2[%c0_17, %c0_18, %c0_19, %c0_20] : memref<3x3x256x256xbf16, #tpu.memory_space<vmem>>, vector<1x1x256x256xbf16>
      %18 = vector.shape_cast %17 : vector<1x1x256x256xbf16> to vector<256x256xbf16>
      %cst_21 = arith.constant dense<0.000000e+00> : vector<2x256xf32>
      %19 = tpu.matmul %16, %18, %cst_21 {dimension_numbers = #tpu.dot_dimension_numbers<[1], [0], [0], [1], [0, 0, 1, 1], [], []>} : vector<2x256xbf16>, vector<256x256xbf16>, vector<2x256xf32> -> vector<2x256xf32>
      %20 = arith.addf %11, %19 : vector<2x256xf32>
      %c2_i32_22 = arith.constant 2 : i32
      %21 = arith.muli %c2_i32_22, %arg7 : i32
      %c0_i32_23 = arith.constant 0 : i32
      %22 = arith.addi %21, %c0_i32_23 : i32
      %c0_24 = arith.constant 0 : index
      %23 = arith.index_cast %22 : i32 to index
      %c1 = arith.constant 1 : index
      %c0_25 = arith.constant 0 : index
      %c0_26 = arith.constant 0 : index
      %24 = vector.load %arg1[%c0_24, %23, %c1, %c0_25, %c0_26] : memref<1x6x2x3x256xbf16, #tpu.memory_space<vmem>>, vector<1x1x1x2x256xbf16>
      %25 = vector.shape_cast %24 : vector<1x1x1x2x256xbf16> to vector<2x256xbf16>
      %c0_27 = arith.constant 0 : index
      %c1_28 = arith.constant 1 : index
      %c0_29 = arith.constant 0 : index
      %c0_30 = arith.constant 0 : index
      %26 = vector.load %arg2[%c0_27, %c1_28, %c0_29, %c0_30] : memref<3x3x256x256xbf16, #tpu.memory_space<vmem>>, vector<1x1x256x256xbf16>
      %27 = vector.shape_cast %26 : vector<1x1x256x256xbf16> to vector<256x256xbf16>
      %cst_31 = arith.constant dense<0.000000e+00> : vector<2x256xf32>
      %28 = tpu.matmul %25, %27, %cst_31 {dimension_numbers = #tpu.dot_dimension_numbers<[1], [0], [0], [1], [0, 0, 1, 1], [], []>} : vector<2x256xbf16>, vector<256x256xbf16>, vector<2x256xf32> -> vector<2x256xf32>
      %29 = arith.addf %20, %28 : vector<2x256xf32>
      %c2_i32_32 = arith.constant 2 : i32
      %30 = arith.muli %c2_i32_32, %arg7 : i32
      %c0_i32_33 = arith.constant 0 : i32
      %31 = arith.addi %30, %c0_i32_33 : i32
      %c0_34 = arith.constant 0 : index
      %32 = arith.index_cast %31 : i32 to index
      %c0_35 = arith.constant 0 : index
      %c1_36 = arith.constant 1 : index
      %c0_37 = arith.constant 0 : index
      %33 = vector.load %arg1[%c0_34, %32, %c0_35, %c1_36, %c0_37] : memref<1x6x2x3x256xbf16, #tpu.memory_space<vmem>>, vector<1x1x1x2x256xbf16>
      %34 = vector.shape_cast %33 : vector<1x1x1x2x256xbf16> to vector<2x256xbf16>
      %c0_38 = arith.constant 0 : index
      %c2 = arith.constant 2 : index
      %c0_39 = arith.constant 0 : index
      %c0_40 = arith.constant 0 : index
      %35 = vector.load %arg2[%c0_38, %c2, %c0_39, %c0_40] : memref<3x3x256x256xbf16, #tpu.memory_space<vmem>>, vector<1x1x256x256xbf16>
      %36 = vector.shape_cast %35 : vector<1x1x256x256xbf16> to vector<256x256xbf16>
      %cst_41 = arith.constant dense<0.000000e+00> : vector<2x256xf32>
      %37 = tpu.matmul %34, %36, %cst_41 {dimension_numbers = #tpu.dot_dimension_numbers<[1], [0], [0], [1], [0, 0, 1, 1], [], []>} : vector<2x256xbf16>, vector<256x256xbf16>, vector<2x256xf32> -> vector<2x256xf32>
      %38 = arith.addf %29, %37 : vector<2x256xf32>
      %c2_i32_42 = arith.constant 2 : i32
      %39 = arith.muli %c2_i32_42, %arg7 : i32
      %c1_i32_43 = arith.constant 1 : i32
      %40 = arith.addi %39, %c1_i32_43 : i32
      %c0_44 = arith.constant 0 : index
      %41 = arith.index_cast %40 : i32 to index
      %c0_45 = arith.constant 0 : index
      %c0_46 = arith.constant 0 : index
      %c0_47 = arith.constant 0 : index
      %42 = vector.load %arg1[%c0_44, %41, %c0_45, %c0_46, %c0_47] : memref<1x6x2x3x256xbf16, #tpu.memory_space<vmem>>, vector<1x1x1x2x256xbf16>
      %43 = vector.shape_cast %42 : vector<1x1x1x2x256xbf16> to vector<2x256xbf16>
      %c1_48 = arith.constant 1 : index
      %c0_49 = arith.constant 0 : index
      %c0_50 = arith.constant 0 : index
      %c0_51 = arith.constant 0 : index
      %44 = vector.load %arg2[%c1_48, %c0_49, %c0_50, %c0_51] : memref<3x3x256x256xbf16, #tpu.memory_space<vmem>>, vector<1x1x256x256xbf16>
      %45 = vector.shape_cast %44 : vector<1x1x256x256xbf16> to vector<256x256xbf16>
      %cst_52 = arith.constant dense<0.000000e+00> : vector<2x256xf32>
      %46 = tpu.matmul %43, %45, %cst_52 {dimension_numbers = #tpu.dot_dimension_numbers<[1], [0], [0], [1], [0, 0, 1, 1], [], []>} : vector<2x256xbf16>, vector<256x256xbf16>, vector<2x256xf32> -> vector<2x256xf32>
      %47 = arith.addf %38, %46 : vector<2x256xf32>
      %c2_i32_53 = arith.constant 2 : i32
      %48 = arith.muli %c2_i32_53, %arg7 : i32
      %c1_i32_54 = arith.constant 1 : i32
      %49 = arith.addi %48, %c1_i32_54 : i32
      %c0_55 = arith.constant 0 : index
      %50 = arith.index_cast %49 : i32 to index
      %c1_56 = arith.constant 1 : index
      %c0_57 = arith.constant 0 : index
      %c0_58 = arith.constant 0 : index
      %51 = vector.load %arg1[%c0_55, %50, %c1_56, %c0_57, %c0_58] : memref<1x6x2x3x256xbf16, #tpu.memory_space<vmem>>, vector<1x1x1x2x256xbf16>
      %52 = vector.shape_cast %51 : vector<1x1x1x2x256xbf16> to vector<2x256xbf16>
      %c1_59 = arith.constant 1 : index
      %c1_60 = arith.constant 1 : index
      %c0_61 = arith.constant 0 : index
      %c0_62 = arith.constant 0 : index
      %53 = vector.load %arg2[%c1_59, %c1_60, %c0_61, %c0_62] : memref<3x3x256x256xbf16, #tpu.memory_space<vmem>>, vector<1x1x256x256xbf16>
      %54 = vector.shape_cast %53 : vector<1x1x256x256xbf16> to vector<256x256xbf16>
      %cst_63 = arith.constant dense<0.000000e+00> : vector<2x256xf32>
      %55 = tpu.matmul %52, %54, %cst_63 {dimension_numbers = #tpu.dot_dimension_numbers<[1], [0], [0], [1], [0, 0, 1, 1], [], []>} : vector<2x256xbf16>, vector<256x256xbf16>, vector<2x256xf32> -> vector<2x256xf32>
      %56 = arith.addf %47, %55 : vector<2x256xf32>
      %c2_i32_64 = arith.constant 2 : i32
      %57 = arith.muli %c2_i32_64, %arg7 : i32
      %c1_i32_65 = arith.constant 1 : i32
      %58 = arith.addi %57, %c1_i32_65 : i32
      %c0_66 = arith.constant 0 : index
      %59 = arith.index_cast %58 : i32 to index
      %c0_67 = arith.constant 0 : index
      %c1_68 = arith.constant 1 : index
      %c0_69 = arith.constant 0 : index
      %60 = vector.load %arg1[%c0_66, %59, %c0_67, %c1_68, %c0_69] : memref<1x6x2x3x256xbf16, #tpu.memory_space<vmem>>, vector<1x1x1x2x256xbf16>
      %61 = vector.shape_cast %60 : vector<1x1x1x2x256xbf16> to vector<2x256xbf16>
      %c1_70 = arith.constant 1 : index
      %c2_71 = arith.constant 2 : index
      %c0_72 = arith.constant 0 : index
      %c0_73 = arith.constant 0 : index
      %62 = vector.load %arg2[%c1_70, %c2_71, %c0_72, %c0_73] : memref<3x3x256x256xbf16, #tpu.memory_space<vmem>>, vector<1x1x256x256xbf16>
      %63 = vector.shape_cast %62 : vector<1x1x256x256xbf16> to vector<256x256xbf16>
      %cst_74 = arith.constant dense<0.000000e+00> : vector<2x256xf32>
      %64 = tpu.matmul %61, %63, %cst_74 {dimension_numbers = #tpu.dot_dimension_numbers<[1], [0], [0], [1], [0, 0, 1, 1], [], []>} : vector<2x256xbf16>, vector<256x256xbf16>, vector<2x256xf32> -> vector<2x256xf32>
      %65 = arith.addf %56, %64 : vector<2x256xf32>
      %c2_i32_75 = arith.constant 2 : i32
      %66 = arith.muli %c2_i32_75, %arg7 : i32
      %c2_i32_76 = arith.constant 2 : i32
      %67 = arith.addi %66, %c2_i32_76 : i32
      %c0_77 = arith.constant 0 : index
      %68 = arith.index_cast %67 : i32 to index
      %c0_78 = arith.constant 0 : index
      %c0_79 = arith.constant 0 : index
      %c0_80 = arith.constant 0 : index
      %69 = vector.load %arg1[%c0_77, %68, %c0_78, %c0_79, %c0_80] : memref<1x6x2x3x256xbf16, #tpu.memory_space<vmem>>, vector<1x1x1x2x256xbf16>
      %70 = vector.shape_cast %69 : vector<1x1x1x2x256xbf16> to vector<2x256xbf16>
      %c2_81 = arith.constant 2 : index
      %c0_82 = arith.constant 0 : index
      %c0_83 = arith.constant 0 : index
      %c0_84 = arith.constant 0 : index
      %71 = vector.load %arg2[%c2_81, %c0_82, %c0_83, %c0_84] : memref<3x3x256x256xbf16, #tpu.memory_space<vmem>>, vector<1x1x256x256xbf16>
      %72 = vector.shape_cast %71 : vector<1x1x256x256xbf16> to vector<256x256xbf16>
      %cst_85 = arith.constant dense<0.000000e+00> : vector<2x256xf32>
      %73 = tpu.matmul %70, %72, %cst_85 {dimension_numbers = #tpu.dot_dimension_numbers<[1], [0], [0], [1], [0, 0, 1, 1], [], []>} : vector<2x256xbf16>, vector<256x256xbf16>, vector<2x256xf32> -> vector<2x256xf32>
      %74 = arith.addf %65, %73 : vector<2x256xf32>
      %c2_i32_86 = arith.constant 2 : i32
      %75 = arith.muli %c2_i32_86, %arg7 : i32
      %c2_i32_87 = arith.constant 2 : i32
      %76 = arith.addi %75, %c2_i32_87 : i32
      %c0_88 = arith.constant 0 : index
      %77 = arith.index_cast %76 : i32 to index
      %c1_89 = arith.constant 1 : index
      %c0_90 = arith.constant 0 : index
      %c0_91 = arith.constant 0 : index
      %78 = vector.load %arg1[%c0_88, %77, %c1_89, %c0_90, %c0_91] : memref<1x6x2x3x256xbf16, #tpu.memory_space<vmem>>, vector<1x1x1x2x256xbf16>
      %79 = vector.shape_cast %78 : vector<1x1x1x2x256xbf16> to vector<2x256xbf16>
      %c2_92 = arith.constant 2 : index
      %c1_93 = arith.constant 1 : index
      %c0_94 = arith.constant 0 : index
      %c0_95 = arith.constant 0 : index
      %80 = vector.load %arg2[%c2_92, %c1_93, %c0_94, %c0_95] : memref<3x3x256x256xbf16, #tpu.memory_space<vmem>>, vector<1x1x256x256xbf16>
      %81 = vector.shape_cast %80 : vector<1x1x256x256xbf16> to vector<256x256xbf16>
      %cst_96 = arith.constant dense<0.000000e+00> : vector<2x256xf32>
      %82 = tpu.matmul %79, %81, %cst_96 {dimension_numbers = #tpu.dot_dimension_numbers<[1], [0], [0], [1], [0, 0, 1, 1], [], []>} : vector<2x256xbf16>, vector<256x256xbf16>, vector<2x256xf32> -> vector<2x256xf32>
      %83 = arith.addf %74, %82 : vector<2x256xf32>
      %c2_i32_97 = arith.constant 2 : i32
      %84 = arith.muli %c2_i32_97, %arg7 : i32
      %c2_i32_98 = arith.constant 2 : i32
      %85 = arith.addi %84, %c2_i32_98 : i32
      %c0_99 = arith.constant 0 : index
      %86 = arith.index_cast %85 : i32 to index
      %c0_100 = arith.constant 0 : index
      %c1_101 = arith.constant 1 : index
      %c0_102 = arith.constant 0 : index
      %87 = vector.load %arg1[%c0_99, %86, %c0_100, %c1_101, %c0_102] : memref<1x6x2x3x256xbf16, #tpu.memory_space<vmem>>, vector<1x1x1x2x256xbf16>
      %88 = vector.shape_cast %87 : vector<1x1x1x2x256xbf16> to vector<2x256xbf16>
      %c2_103 = arith.constant 2 : index
      %c2_104 = arith.constant 2 : index
      %c0_105 = arith.constant 0 : index
      %c0_106 = arith.constant 0 : index
      %89 = vector.load %arg2[%c2_103, %c2_104, %c0_105, %c0_106] : memref<3x3x256x256xbf16, #tpu.memory_space<vmem>>, vector<1x1x256x256xbf16>
      %90 = vector.shape_cast %89 : vector<1x1x256x256xbf16> to vector<256x256xbf16>
      %cst_107 = arith.constant dense<0.000000e+00> : vector<2x256xf32>
      %91 = tpu.matmul %88, %90, %cst_107 {dimension_numbers = #tpu.dot_dimension_numbers<[1], [0], [0], [1], [0, 0, 1, 1], [], []>} : vector<2x256xbf16>, vector<256x256xbf16>, vector<2x256xf32> -> vector<2x256xf32>
      %92 = arith.addf %83, %91 : vector<2x256xf32>
      %93 = vector.broadcast %0 : vector<1x256xf32> to vector<2x256xf32>
      %94 = arith.addf %92, %93 : vector<2x256xf32>
      %cst_108 = arith.constant 0.000000e+00 : f32
      %95 = vector.broadcast %cst_108 : f32 to vector<2x256xf32>
      %96 = arith.maximumf %94, %95 : vector<2x256xf32>
      %cst_109 = arith.constant dense<0.000000e+00> : vector<256xf32>
      %97 = vector.multi_reduction <add>, %96, %cst_109 [0] : vector<2x256xf32> to vector<256xf32>
      %98 = vector.shape_cast %97 : vector<256xf32> to vector<1x256xf32>
      %99 = arith.addf %arg8, %98 : vector<1x256xf32>
      scf.yield %99 : vector<1x256xf32>
    }
    %c2_i32_1 = arith.constant 2 : i32
    %c0_2 = arith.constant 0 : index
    %c0_3 = arith.constant 0 : index
    %4 = vector.load %arg4[%c0_2, %c0_3] : memref<256x1xf32, #tpu.memory_space<vmem>>, vector<256x1xf32>
    %cst_4 = arith.constant dense<0.000000e+00> : vector<1x1xf32>
    %5 = tpu.matmul %3, %4, %cst_4 {dimension_numbers = #tpu.dot_dimension_numbers<[1], [0], [0], [1], [0, 0, 1, 1], [], []>} : vector<1x256xf32>, vector<256x1xf32>, vector<1x1xf32> -> vector<1x1xf32>
    %c0_5 = arith.constant 0 : index
    %c0_6 = arith.constant 0 : index
    %6 = vector.load %arg5[%c0_5, %c0_6] : memref<1x1xf32, #tpu.memory_space<vmem>>, vector<1x1xf32>
    %7 = arith.addf %5, %6 : vector<1x1xf32>
    %c0_7 = arith.constant 0 : index
    %c0_8 = arith.constant 0 : index
    %c0_9 = arith.constant 0 : index
    %8 = vector.load %arg6[%c0_7, %c0_8, %c0_9] : memref<1x1x1xf32, #tpu.memory_space<vmem>>, vector<1x1x1xf32>
    %9 = vector.shape_cast %8 : vector<1x1x1xf32> to vector<1x1xf32>
    %10 = vector.shape_cast %7 : vector<1x1xf32> to vector<1x1x1xf32>
    tpu.vector_store %arg6[%c0_7, %c0_8, %c0_9], %10 {strides = array<i32>} : memref<1x1x1xf32, #tpu.memory_space<vmem>>, vector<1x1x1xf32>,
    return
  }
  func.func @transform_0(%arg0: i32) -> (i32, i32, i32, i32, i32) {
    %c0_i32 = arith.constant 0 : i32
    %c0_i32_0 = arith.constant 0 : i32
    %c0_i32_1 = arith.constant 0 : i32
    %c0_i32_2 = arith.constant 0 : i32
    %c0_i32_3 = arith.constant 0 : i32
    return %arg0, %c0_i32, %c0_i32_0, %c0_i32_1, %c0_i32_2 : i32, i32, i32, i32, i32
  }
  func.func @transform_1(%arg0: i32) -> (i32, i32, i32, i32) {
    %c0_i32 = arith.constant 0 : i32
    %c0_i32_0 = arith.constant 0 : i32
    %c0_i32_1 = arith.constant 0 : i32
    %c0_i32_2 = arith.constant 0 : i32
    %c0_i32_3 = arith.constant 0 : i32
    return %c0_i32, %c0_i32_0, %c0_i32_1, %c0_i32_2 : i32, i32, i32, i32
  }
  func.func @transform_2(%arg0: i32) -> (i32, i32) {
    %c0_i32 = arith.constant 0 : i32
    %c0_i32_0 = arith.constant 0 : i32
    %c0_i32_1 = arith.constant 0 : i32
    return %c0_i32, %c0_i32_0 : i32, i32
  }
  func.func @transform_3(%arg0: i32) -> (i32, i32) {
    %c0_i32 = arith.constant 0 : i32
    %c0_i32_0 = arith.constant 0 : i32
    %c0_i32_1 = arith.constant 0 : i32
    return %c0_i32, %c0_i32_0 : i32, i32
  }
  func.func @transform_4(%arg0: i32) -> (i32, i32) {
    %c0_i32 = arith.constant 0 : i32
    %c0_i32_0 = arith.constant 0 : i32
    %c0_i32_1 = arith.constant 0 : i32
    return %c0_i32, %c0_i32_0 : i32, i32
  }
  func.func @transform_5(%arg0: i32) -> (i32, i32, i32) {
    %c0_i32 = arith.constant 0 : i32
    %c0_i32_0 = arith.constant 0 : i32
    %c0_i32_1 = arith.constant 0 : i32
    return %arg0, %c0_i32, %c0_i32_0 : i32, i32, i32
  }
}

</mosaic_0001>

<bundles_post_ra>
// kernel: fcdiscriminator_img_forward.3
= control target key start
LH: loop header
LB: loop body
LE: loop exit
PB: predicated region body
PF: predicated region fallthrough
CT: control target
= control target key end

     0   :  { %s1068_s12 = smov 0   ;;  %s1182_s0 = inlined_call_operand.vmem [shape: bf16[2,18,2,9,4], index: 0, kind: input, shape index: {}]   ;;  %s1183_s1 = inlined_call_operand.vmem [shape: bf16[3,3,4,256], index: 1, kind: input, shape index: {}]   ;;  %s1184_s2 = inlined_call_operand.vmem [shape: f32[1,256], index: 2, kind: input, shape index: {}]   ;;  %s1185_s3 = inlined_call_operand.vmem [shape: bf16[2,8,8,256], index: 3, kind: output, shape index: {}]  }
   0x1 LB: > { %s924_s13 = sadd.s32 4294967295, %s1041_s12   ;;  %p928_p0 = scmp.ge.s32.totalorder %s1041_s12, 1  ;;  %s1041_s12 = sphi %s1068_s12, %s13_s12  }
   0x2   : > { %p137_p1 = scmp.lt.s32.totalorder %s1041_s12, 3 }
   0x4   : > { %p138_p2 = pnand %p928_p0, %p137_p1 }
   0x5   : > { %p161_p3 = scmp.lt.s32.totalorder (!%p138_p2), %s924_s13, 1  ;;  %v1079_v0 = vld [vmem:[%s1184_s2] sm:$0x3] (!%p138_p2)  ;;  %s1091_s24 = smov (!%p138_p2), 0  }
   0x6   : > { %141 = sbr.rel (%p138_p2) target bundleno = 278 (0x116), region = 32 }
   0xd   : > { %s1187_s13 = smov (!%p161_p3, %s924_s13), 1 }
   0xe   : > { %s1010_s16 = smul.u32 288, %s1187_s13  ;;  %s998_s17 = sshll.u32 %s1187_s13, 6 }
   0xf   : > { %s1084_s20 = scalar_lea.vmem %s1185_s3, %s998_s17 }
  0x10   : > { %s1089_s23 = scalar_lea.vmem %s1182_s0, %s1010_s16 }
  0x11 LB: >> { %v939_v1 = vld.sshfl [vmem:[%s1183_s1 + $0x4] sm:$0x33 pattern:$0x76325410]  ;;  %vm204_vm0 = vcmask 1041408   ;;  %v1047_v5 = vmov 0   ;;  %s1045_s24 = sphi %s1091_s24, %s178_s24  }
  0x12   : >> { %v199_v2 = vcombine.high %v939_v1, %v939_v1  ;;  %v942_v3 = vld.sshfl [vmem:[%s1183_s1] sm:$0x33 pattern:$0x76325410]  ;;  %v206_v4 = vsel %vm204_vm0, %v939_v1, 0  ;;  %243 = vmatprep.mubr.bf16.mxu0 %v1047_v5  ;;  %302 = vmatprep.mubr.bf16.mxu1 %v1047_v5  ;;  %s1000_s29 = sshll.u32 %s1045_s24, 5 }
  0x13   : >> { %v260_v6 = vcombine.high %v942_v3, %v942_v3  ;;  %v265_v7 = vsel %vm204_vm0, %v942_v3, 0  ;;  %v947_v8 = vld.sshfl [vmem:[%s1183_s1 + $0x8] sm:$0x33 pattern:$0x76325410]  ;;  %s1112_s5 = scalar_lea.vmem %s1089_s23, %s1000_s29  ;;  %vm200_vm1 = vcmask 31744  }
  0x14   : >> { %940 = vmatprep.subr.msk.bf16.mxu0 %vm204_vm0, %v199_v2  ;;  %v335_v9 = vcombine.high %v947_v8, %v947_v8  ;;  %v954_v10 = vld.sshfl [vmem:[%s1183_s1 + $0xc] sm:$0x33 pattern:$0x76325410]  ;;  %v937_v11 = vld [vmem:[%s1112_s5 + $0x8] sm:$0xf] }
  0x15   : >> { %943 = vmatprep.subr.msk.bf16.mxu1 %vm204_vm0, %v260_v6  ;;  %212 = vmatpush1.bf16.msra.mxu0 %v206_v4  ;;  %v183_v12 = vld [vmem:[%s1112_s5] sm:$0xf]  ;;  %v340_v13 = vsel %vm204_vm0, %v947_v8, 0  ;;  %v403_v14 = vcombine.high %v954_v10, %v954_v10  ;;  %v408_v16 = vsel %vm204_vm0, %v954_v10, 0  ;;  %v1029_v24 = vld [vmem:[%s1112_s5 + $0x10] sm:$0x1f]  }
  0x16   : >> { %271 = vmatpush1.bf16.msra.mxu1 %v265_v7  ;;  %948 = vmatprep.subr.msk.bf16.mxu0 %vm204_vm0, %v335_v9  ;;  %v1028_v15 = vld [vmem:[%s1112_s5] sm:$0x1f]   ;;  %v962_v17 = vld.sshfl [vmem:[%s1183_s1 + $0x10] sm:$0x33 pattern:$0x76325410] }
  0x17   : >> { %955 = vmatprep.subr.msk.bf16.mxu1 %vm204_vm0, %v403_v14  ;;  %v321_v18 = vshrl.u32 %v1028_v15, 16  ;;  %v323_v19 = vshll.u32 %v1028_v15, 16  ;;  %v470_v20 = vcombine.high %v962_v17, %v962_v17  ;;  %v969_v21 = vld.sshfl [vmem:[%s1183_s1 + $0x14] sm:$0x33 pattern:$0x76325410] }
  0x18   : >> { %941 = vmatmul.mubr.msk.bf16.vlgmr.msra.gmra.mrb[0].mxu0 %vm200_vm1, %v937_v11  ;;  %v547_v23 = vcombine.high %v969_v21, %v969_v21  ;;  %v976_v26 = vld.sshfl [vmem:[%s1183_s1 + $0x18] sm:$0x33 pattern:$0x76325410]  ;;  %v535_v27 = vshll.u32 %v1029_v24, 16  ;;  %v475_v29 = vsel %vm204_vm0, %v962_v17, 0 }
  0x19   : >> { %944 = vmatmul.mubr.msk.bf16.vlgmr.msra.gmra.mrb[0].mxu1 %vm200_vm1, %v183_v12  ;;  %346 = vmatpush1.bf16.msra.mxu0 %v340_v13  ;;  %v325_v22 = vrot.slane %v323_v19, 1  ;;  %v984_v28 = vld.sshfl [vmem:[%s1183_s1 + $0x1c] sm:$0x33 pattern:$0x76325410]  ;;  %v552_v31 = vsel %vm204_vm0, %v969_v21, 0  ;;  %v615_v32 = vcombine.high %v976_v26, %v976_v26  ;;  %v813_v19 = vlaneseq }
  0x1a   : >> { %377 = vmatprep.mubr.bf16.mxu0 %v1047_v5  ;;  %414 = vmatpush1.bf16.msra.mxu1 %v408_v16  ;;  %v952_v30 = vld [vmem:[%s1112_s5 + $0x10] sm:$0xf]  ;;  %v682_v33 = vcombine.high %v984_v28, %v984_v28  ;;  %v533_v34 = vshrl.u32 %v1029_v24, 16  ;;  %v537_v35 = vrot.slane %v535_v27, 1  ;;  %v960_v37 = vld [vmem:[%s1112_s5 + $0x18] sm:$0xf] }
  0x1b   : >> { %963 = vmatprep.subr.msk.bf16.mxu0 %vm204_vm0, %v470_v20  ;;  %445 = vmatprep.mubr.bf16.mxu1 %v1047_v5  ;;  %v326_v25 = vor.u32 %v325_v22, %v321_v18  ;;  %v991_v36 = vld.sshfl [vmem:[%s1183_s1 + $0x20] sm:$0x33 pattern:$0x76325410]  ;;  %v620_v39 = vsel %vm204_vm0, %v976_v26, 0  ;;  %v687_v40 = vsel %vm204_vm0, %v984_v28, 0 }
  0x1c   : >> { %970 = vmatprep.subr.msk.bf16.mxu1 %vm204_vm0, %v547_v23  ;;  %v538_v38 = vor.u32 %v537_v35, %v533_v34  ;;  %v759_v41 = vcombine.high %v991_v36, %v991_v36  ;;  %v1030_v42 = vld [vmem:[%s1112_s5 + $0x20] sm:$0x1f]   ;;  %v764_v45 = vsel %vm204_vm0, %v991_v36, 0  ;;  %v982_v46 = vld [vmem:[%s1112_s5 + $0x28] sm:$0xf]  ;;  %v814_v22 = vshrl.u32 %v813_v19, 7 }
  0x1d   : >> { %v747_v43 = vshll.u32 %v1030_v42, 16  ;;  %v974_v44 = vld [vmem:[%s1112_s5 + $0x20] sm:$0xf]  ;;  %v745_v47 = vshrl.u32 %v1030_v42, 16  ;;  %s1009_s19 = sshll.u32 %s1045_s24, 3  ;;  %s178_s24 = sadd.s32 1, %s1045_s24  }
  0x1e   : >> { %v819_v36 = vsub.s32 1, %v814_v22  ;;  %s836_s21 = scalar_lea.vmem %s1084_s20, %s1009_s19  ;;  %p175_p4 = scmp.ge.s32.totalorder %s178_s24, 8  }
  0x1f   : >> { %v749_v48 = vrot.slane %v747_v43, 1 }
  0x20   : >> { %949 = vmatmul.mubr.msk.bf16.vlgmr.msra.gmra.mrb[4].mxu0 %vm200_vm1, %v326_v25 }
  0x21   : >> { %481 = vmatpush1.bf16.msra.mxu0 %v475_v29  ;;  %956 = vmatmul.mubr.msk.bf16.vlgmr.msra.gmra.mrb[4].mxu1 %vm200_vm1, %v952_v30  ;;  %v750_v49 = vor.u32 %v749_v48, %v745_v47 }
  0x22   : >> { %512 = vmatprep.mubr.bf16.mxu0 %v1047_v5  ;;  %558 = vmatpush1.bf16.msra.mxu1 %v552_v31 }
  0x23   : >> { %977 = vmatprep.subr.msk.bf16.mxu0 %vm204_vm0, %v615_v32  ;;  %589 = vmatprep.mubr.bf16.mxu1 %v1047_v5 }
  0x24   : >> { %985 = vmatprep.subr.msk.bf16.mxu1 %vm204_vm0, %v682_v33  ;;  %v815_v33 = vsub.s32 0, %v814_v22 }
  0x28   : >> { %964 = vmatmul.mubr.msk.bf16.vlgmr.msra.gmra.mrb[8].mxu0 %vm200_vm1, %v960_v37  ;;  %v816_v37 = vrot.slane %v1079_v0, %v815_v33 }
  0x29   : >> { %626 = vmatpush1.bf16.msra.mxu0 %v620_v39  ;;  %971 = vmatmul.mubr.msk.bf16.vlgmr.msra.gmra.mrb[8].mxu1 %vm200_vm1, %v538_v38  ;;  %v820_v39 = vrot.slane %v1079_v0, %v819_v36 }
  0x2a   : >> { %657 = vmatprep.mubr.bf16.mxu0 %v1047_v5  ;;  %693 = vmatpush1.bf16.msra.mxu1 %v687_v40 }
  0x2b   : >> { %992 = vmatprep.subr.msk.bf16.mxu0 %vm204_vm0, %v759_v41  ;;  %724 = vmatprep.mubr.bf16.mxu1 %v1047_v5 }
  0x30   : >> { %978 = vmatmul.mubr.msk.bf16.vlgmr.msra.gmra.mrb[12].mxu0 %vm200_vm1, %v974_v44 }
  0x31   : >> { %770 = vmatpush1.bf16.msra.mxu0 %v764_v45  ;;  %986 = vmatmul.mubr.msk.bf16.vlgmr.msra.gmra.mrb[12].mxu1 %vm200_vm1, %v982_v46 }
  0x32   : >> { %801 = vmatprep.mubr.bf16.mxu0 %v1047_v5 }
  0x38   : >> { %993 = vmatmul.mubr.msk.bf16.vlgmr.msra.gmra.mrb[16].mxu0 %vm200_vm1, %v750_v49 }
  0xeb   : >> { %v245_v50 = vpop.f32.mrb[0].mxu0 }
  0xec   : >> { %v304_v51 = vpop.f32.mrb[0].mxu1  ;;  %v247_v52 = vpop.f32.mrb[1].mxu0 }
  0xed   : >> { %v305_v53 = vadd.f32 %v304_v51, %v245_v50  ;;  %v306_v54 = vpop.f32.mrb[1].mxu1  ;;  %v249_v55 = vpop.f32.mrb[2].mxu0 }
  0xee   : >> { %v307_v56 = vadd.f32 %v306_v54, %v247_v52  ;;  %v250_v57 = vpop.f32.mrb[3].mxu0  ;;  %v308_v58 = vpop.f32.mrb[2].mxu1 }
  0xef   : >> { %v309_v59 = vpop.f32.mrb[3].mxu1 }
  0xf3   : >> { %v379_v60 = vpop.f32.mrb[4].mxu0 }
  0xf4   : >> { %v386_v61 = vadd.f32 %v379_v60, %v305_v53  ;;  %v381_v62 = vpop.f32.mrb[5].mxu0  ;;  %v447_v63 = vpop.f32.mrb[4].mxu1 }
  0xf5   : >> { %v387_v1 = vadd.f32 %v381_v62, %v307_v56  ;;  %v383_v2 = vpop.f32.mrb[6].mxu0  ;;  %v449_v3 = vpop.f32.mrb[5].mxu1 }
  0xf6   : >> { %v454_v4 = vadd.f32 %v447_v63, %v386_v61  ;;  %v384_v5 = vpop.f32.mrb[7].mxu0  ;;  %v451_v6 = vpop.f32.mrb[6].mxu1 }
  0xf7   : >> { %v455_v7 = vadd.f32 %v449_v3, %v387_v1  ;;  %v452_v8 = vpop.f32.mrb[7].mxu1 }
  0xfb   : >> { %v514_v9 = vpop.f32.mrb[8].mxu0 }
  0xfc   : >> { %v521_v10 = vadd.f32 %v514_v9, %v454_v4  ;;  %v516_v11 = vpop.f32.mrb[9].mxu0  ;;  %v591_v12 = vpop.f32.mrb[8].mxu1 }
  0xfd   : >> { %v522_v13 = vadd.f32 %v516_v11, %v455_v7  ;;  %v518_v14 = vpop.f32.mrb[10].mxu0  ;;  %v593_v15 = vpop.f32.mrb[9].mxu1 }
  0xfe   : >> { %v598_v16 = vadd.f32 %v591_v12, %v521_v10  ;;  %v519_v17 = vpop.f32.mrb[11].mxu0  ;;  %v595_v18 = vpop.f32.mrb[10].mxu1 }
  0xff   : >> { %v599_v20 = vadd.f32 %v593_v15, %v522_v13  ;;  %v596_v21 = vpop.f32.mrb[11].mxu1 }
 0x103   : >> { %v659_v23 = vpop.f32.mrb[12].mxu0 }
 0x104   : >> { %v666_v24 = vadd.f32 %v659_v23, %v598_v16  ;;  %v661_v25 = vpop.f32.mrb[13].mxu0  ;;  %v726_v26 = vpop.f32.mrb[12].mxu1 }
 0x105   : >> { %v667_v27 = vadd.f32 %v661_v25, %v599_v20  ;;  %v663_v28 = vpop.f32.mrb[14].mxu0  ;;  %v728_v29 = vpop.f32.mrb[13].mxu1 }
 0x106   : >> { %v733_v30 = vadd.f32 %v726_v26, %v666_v24  ;;  %v664_v31 = vpop.f32.mrb[15].mxu0  ;;  %v730_v32 = vpop.f32.mrb[14].mxu1 }
 0x107   : >> { %v734_v34 = vadd.f32 %v728_v29, %v667_v27  ;;  %v731_v35 = vpop.f32.mrb[15].mxu1 }
 0x10b   : >> { %v803_v38 = vpop.f32.mrb[16].mxu0 }
 0x10c   : >> { %v810_v40 = vadd.f32 %v803_v38, %v733_v30  ;;  %v805_v41 = vpop.f32.mrb[17].mxu0 }
 0x10d   : >> { %v811_v42 = vadd.f32 %v805_v41, %v734_v34  ;;  %v807_v43 = vpop.f32.mrb[18].mxu0 }
 0x10e   : >> { %v823_v44 = vadd.f32 %v816_v37, %v810_v40  ;;  %v808_v45 = vpop.f32.mrb[19].mxu0 }
 0x10f   : >> { %v824_v46 = vadd.f32 %v820_v39, %v811_v42  ;;  %177 = sbr.rel (!%p175_p4) target bundleno = 17 (0x11), region = 84 }
 0x110   : >> { %v825_v47 = vmax.f32 %v823_v44, 0.0 }
 0x111   : >> { %v826_v48 = vmax.f32 %v824_v46, 0.0 }
 0x113   : >> { %v1008_v49 = vpack.c.bf16 %v826_v48, %v825_v47 }
 0x115   : >> { %837 = vst [vmem:[%s836_s21] sm:$0xff] %v1008_v49 }
 0x116 PF: > { %s13_s12 = sadd.s32 1, %s1041_s12  }
 0x117   : > { %p10_p5 = scmp.ge.s32.totalorder %s13_s12, 4  }
 0x119   :  { %12 = sbr.rel (!%p10_p5) target bundleno = 1 (0x1), region = 95 }

// kernel: fcdiscriminator_img_forward.4
= control target key start
LH: loop header
LB: loop body
LE: loop exit
PB: predicated region body
PF: predicated region fallthrough
CT: control target
= control target key end

     0   :  { %s3660_s12 = smov 0   ;;  %s4617_s0 = inlined_call_operand.vmem [shape: bf16[2,10,2,5,256], index: 0, kind: input, shape index: {}]   ;;  %s4618_s1 = inlined_call_operand.vmem [shape: bf16[3,3,256,256], index: 1, kind: input, shape index: {}]   ;;  %s4619_s2 = inlined_call_operand.vmem [shape: f32[1,256], index: 2, kind: input, shape index: {}]   ;;  %s4620_s3 = inlined_call_operand.vmem [shape: bf16[2,4,4,256], index: 3, kind: output, shape index: {}]  }
   0x1 LB: > { %s2549_s13 = sadd.s32 4294967295, %s3634_s12   ;;  %p2553_p0 = scmp.ge.s32.totalorder %s3634_s12, 1  ;;  %s3634_s12 = sphi %s3660_s12, %s13_s12  }
   0x2   : > { %p137_p1 = scmp.lt.s32.totalorder %s3634_s12, 3 }
   0x4   : > { %p138_p2 = pnand %p2553_p0, %p137_p1 }
   0x5   : > { %p161_p3 = scmp.lt.s32.totalorder (!%p138_p2), %s2549_s13, 1  ;;  %v3671_v0 = vld [vmem:[%s4619_s2] sm:$0x3] (!%p138_p2)  ;;  %s3683_s24 = smov (!%p138_p2), 0  }
   0x6   : > { %141 = sbr.rel (%p138_p2) target bundleno = 560 (0x230), region = 32 }
   0xd   : > { %s4622_s13 = smov (!%p161_p3, %s2549_s13), 1 }
   0xe   : > { %s3157_s16 = smul.u32 160, %s4622_s13  ;;  %s3146_s17 = sshll.u32 %s4622_s13, 4 }
   0xf   : > { %s3676_s20 = scalar_lea.vmem %s4620_s3, %s3146_s17 }
  0x10   : > { %s3681_s23 = scalar_lea.vmem %s4617_s0, %s3157_s16 }
  0x11 LB: >> { %v3174_v1 = vld [vmem:[%s4618_s1 + $0x104] ss:$8 sps:$4 sm:$0xff]   ;;  %v3178_v3 = vld [vmem:[%s4618_s1 + $0x100] ss:$8 sps:$4 sm:$0xff]   ;;  %v3180_v5 = vld [vmem:[%s4618_s1 + $0x114] ss:$8 sps:$4 sm:$0xff]   ;;  %s3638_s24 = sphi %s3683_s24, %s177_s24  }
  0x12   : >> { %v3176_v2 = vld [vmem:[%s4618_s1 + $0x4] ss:$8 sps:$4 sm:$0xff]   ;;  %419 = vmatprep.subr.bf16.mxu0 %v3174_v1  ;;  %v3179_v4 = vld [vmem:[%s4618_s1] ss:$8 sps:$4 sm:$0xff]   ;;  %v3182_v6 = vld [vmem:[%s4618_s1 + $0x14] ss:$8 sps:$4 sm:$0xff]  }
  0x13   : >> { %627 = vmatprep.subr.bf16.mxu1 %v3176_v2  ;;  %420 = vmatpush1.bf16.msra.mxu0 %v3178_v3  ;;  %v3184_v7 = vld [vmem:[%s4618_s1 + $0x110] ss:$8 sps:$4 sm:$0xff]   ;;  %v3186_v9 = vld [vmem:[%s4618_s1 + $0x124] ss:$8 sps:$4 sm:$0xff]   ;;  %v3190_v11 = vld [vmem:[%s4618_s1 + $0x120] ss:$8 sps:$4 sm:$0xff]  }
  0x14   : >> { %628 = vmatpush1.bf16.msra.mxu1 %v3179_v4  ;;  %421 = vmatprep.subr.bf16.mxu0 %v3180_v5  ;;  %v3185_v8 = vld [vmem:[%s4618_s1 + $0x10] ss:$8 sps:$4 sm:$0xff]   ;;  %v3188_v10 = vld [vmem:[%s4618_s1 + $0x24] ss:$8 sps:$4 sm:$0xff]   ;;  %v3191_v12 = vld [vmem:[%s4618_s1 + $0x20] ss:$8 sps:$4 sm:$0xff]  }
  0x15   : >> { %629 = vmatprep.subr.bf16.mxu1 %v3182_v6  ;;  %v3192_v13 = vld [vmem:[%s4618_s1 + $0x134] ss:$8 sps:$4 sm:$0xff]   ;;  %v3196_v15 = vld [vmem:[%s4618_s1 + $0x130] ss:$8 sps:$4 sm:$0xff]   ;;  %v3198_v17 = vld [vmem:[%s4618_s1 + $0x144] ss:$8 sps:$4 sm:$0xff]  }
  0x16   : >> { %v3194_v14 = vld [vmem:[%s4618_s1 + $0x34] ss:$8 sps:$4 sm:$0xff]   ;;  %v3197_v16 = vld [vmem:[%s4618_s1 + $0x30] ss:$8 sps:$4 sm:$0xff]   ;;  %v3200_v18 = vld [vmem:[%s4618_s1 + $0x44] ss:$8 sps:$4 sm:$0xff]  }
  0x17   : >> { %422 = vmatpush1.bf16.msra.mxu0 %v3184_v7  ;;  %v3202_v19 = vld [vmem:[%s4618_s1 + $0x140] ss:$8 sps:$4 sm:$0xff]   ;;  %v3204_v21 = vld [vmem:[%s4618_s1 + $0x154] ss:$8 sps:$4 sm:$0xff]   ;;  %v3208_v23 = vld [vmem:[%s4618_s1 + $0x150] ss:$8 sps:$4 sm:$0xff]  }
  0x18   : >> { %630 = vmatpush1.bf16.msra.mxu1 %v3185_v8  ;;  %423 = vmatprep.subr.bf16.mxu0 %v3186_v9  ;;  %v3203_v20 = vld [vmem:[%s4618_s1 + $0x40] ss:$8 sps:$4 sm:$0xff]   ;;  %v3206_v22 = vld [vmem:[%s4618_s1 + $0x54] ss:$8 sps:$4 sm:$0xff]   ;;  %v3209_v24 = vld [vmem:[%s4618_s1 + $0x50] ss:$8 sps:$4 sm:$0xff]  }
  0x19   : >> { %631 = vmatprep.subr.bf16.mxu1 %v3188_v10  ;;  %v3210_v25 = vld [vmem:[%s4618_s1 + $0x164] ss:$8 sps:$4 sm:$0xff]   ;;  %v3214_v27 = vld [vmem:[%s4618_s1 + $0x160] ss:$8 sps:$4 sm:$0xff]   ;;  %v3216_v29 = vld [vmem:[%s4618_s1 + $0x174] ss:$8 sps:$4 sm:$0xff]  }
  0x1a   : >> { %v3212_v26 = vld [vmem:[%s4618_s1 + $0x64] ss:$8 sps:$4 sm:$0xff]   ;;  %v3215_v28 = vld [vmem:[%s4618_s1 + $0x60] ss:$8 sps:$4 sm:$0xff]   ;;  %v3218_v30 = vld [vmem:[%s4618_s1 + $0x74] ss:$8 sps:$4 sm:$0xff]  }
  0x1b   : >> { %424 = vmatpush1.bf16.msra.mxu0 %v3190_v11  ;;  %v3220_v31 = vld [vmem:[%s4618_s1 + $0x170] ss:$8 sps:$4 sm:$0xff]   ;;  %v3222_v33 = vld [vmem:[%s4618_s1 + $0x184] ss:$8 sps:$4 sm:$0xff]   ;;  %v3226_v35 = vld [vmem:[%s4618_s1 + $0x180] ss:$8 sps:$4 sm:$0xff]  }
  0x1c   : >> { %632 = vmatpush1.bf16.msra.mxu1 %v3191_v12  ;;  %425 = vmatprep.subr.bf16.mxu0 %v3192_v13  ;;  %v3221_v32 = vld [vmem:[%s4618_s1 + $0x70] ss:$8 sps:$4 sm:$0xff]   ;;  %v3224_v34 = vld [vmem:[%s4618_s1 + $0x84] ss:$8 sps:$4 sm:$0xff]   ;;  %v3227_v36 = vld [vmem:[%s4618_s1 + $0x80] ss:$8 sps:$4 sm:$0xff]  }
  0x1d   : >> { %633 = vmatprep.subr.bf16.mxu1 %v3194_v14  ;;  %v3228_v37 = vld [vmem:[%s4618_s1 + $0x194] ss:$8 sps:$4 sm:$0xff]   ;;  %v3232_v39 = vld [vmem:[%s4618_s1 + $0x190] ss:$8 sps:$4 sm:$0xff]   ;;  %v3234_v41 = vld [vmem:[%s4618_s1 + $0x1a4] ss:$8 sps:$4 sm:$0xff]  }
  0x1e   : >> { %v3230_v38 = vld [vmem:[%s4618_s1 + $0x94] ss:$8 sps:$4 sm:$0xff]   ;;  %v3233_v40 = vld [vmem:[%s4618_s1 + $0x90] ss:$8 sps:$4 sm:$0xff]   ;;  %s3148_s11 = sshll.u32 %s3638_s24, 5  ;;  %s3156_s21 = sshll.u32 %s3638_s24, 2 }
  0x1f   : >> { %426 = vmatpush1.bf16.msra.mxu0 %v3196_v15  ;;  %v3236_v42 = vld [vmem:[%s4618_s1 + $0xa4] ss:$8 sps:$4 sm:$0xff]   ;;  %v3238_v43 = vld [vmem:[%s4618_s1 + $0x1a0] ss:$8 sps:$4 sm:$0xff]   ;;  %s3822_s19 = scalar_lea.vmem %s3681_s23, %s3148_s11  ;;  %v3240_v45 = vld [vmem:[%s4618_s1 + $0x1b4] ss:$8 sps:$4 sm:$0xff]   ;;  %s2461_s22 = scalar_lea.vmem %s3676_s20, %s3156_s21 }
  0x20   : >> { %634 = vmatpush1.bf16.msra.mxu1 %v3197_v16  ;;  %427 = vmatprep.subr.bf16.mxu0 %v3198_v17  ;;  %v3239_v44 = vld [vmem:[%s4618_s1 + $0xa0] ss:$8 sps:$4 sm:$0xff]   ;;  %v3242_v46 = vld [vmem:[%s4618_s1 + $0xb4] ss:$8 sps:$4 sm:$0xff]   ;;  %v3244_v50 = vld [vmem:[%s4618_s1 + $0x1b0] ss:$8 sps:$4 sm:$0xff]  }
  0x21   : >> { %635 = vmatprep.subr.bf16.mxu1 %v3200_v18  ;;  %v2562_v47 = vld [vmem:[%s3822_s19 + $0x8] sm:$0x33]  ;;  %v182_v49 = vld [vmem:[%s3822_s19] sm:$0x33]  ;;  %v3245_v51 = vld [vmem:[%s4618_s1 + $0xb0] ss:$8 sps:$4 sm:$0xff]  }
  0x22   : >> { %v2596_v48 = vcombine.high %v2562_v47, %v2562_v47  ;;  %v2630_v52 = vcombine.high %v182_v49, %v182_v49  ;;  %v3246_v53 = vld [vmem:[%s4618_s1 + $0x1c4] ss:$8 sps:$4 sm:$0xff]   ;;  %v3250_v55 = vld [vmem:[%s4618_s1 + $0x1c0] ss:$8 sps:$4 sm:$0xff]   ;;  %v3252_v57 = vld [vmem:[%s4618_s1 + $0x1d4] ss:$8 sps:$4 sm:$0xff]   ;;  %v2595_v8 = vcombine.low %v2562_v47, %v2562_v47  ;;  %v2629_v9 = vcombine.low %v182_v49, %v182_v49 }
  0x23   : >> { %428 = vmatpush1.bf16.msra.mxu0 %v3202_v19  ;;  %v3248_v54 = vld [vmem:[%s4618_s1 + $0xc4] ss:$8 sps:$4 sm:$0xff]   ;;  %v3251_v56 = vld [vmem:[%s4618_s1 + $0xc0] ss:$8 sps:$4 sm:$0xff]   ;;  %v3254_v58 = vld [vmem:[%s4618_s1 + $0xd4] ss:$8 sps:$4 sm:$0xff]  }
  0x24   : >> { %636 = vmatpush1.bf16.msra.mxu1 %v3203_v20  ;;  %429 = vmatprep.subr.bf16.mxu0 %v3204_v21  ;;  %v3256_v59 = vld [vmem:[%s4618_s1 + $0x1d0] ss:$8 sps:$4 sm:$0xff]   ;;  %v3258_v61 = vld [vmem:[%s4618_s1 + $0x1e4] ss:$8 sps:$4 sm:$0xff]   ;;  %v3262_v63 = vld [vmem:[%s4618_s1 + $0x1e0] ss:$8 sps:$4 sm:$0xff]  }
  0x25   : >> { %637 = vmatprep.subr.bf16.mxu1 %v3206_v22  ;;  %451 = vmatprep.mubr.bf16.mxu0 %v2596_v48  ;;  %v3257_v60 = vld [vmem:[%s4618_s1 + $0xd0] ss:$8 sps:$4 sm:$0xff]   ;;  %v3260_v62 = vld [vmem:[%s4618_s1 + $0xe4] ss:$8 sps:$4 sm:$0xff]   ;;  %v3263_v1 = vld [vmem:[%s4618_s1 + $0xe0] ss:$8 sps:$4 sm:$0xff]  }
  0x26   : >> { %659 = vmatprep.mubr.bf16.mxu1 %v2630_v52  ;;  %v3264_v2 = vld [vmem:[%s4618_s1 + $0x1f4] ss:$8 sps:$4 sm:$0xff]   ;;  %v3268_v4 = vld [vmem:[%s4618_s1 + $0x1f0] ss:$8 sps:$4 sm:$0xff]   ;;  %v3276_v6 = vld [vmem:[%s4618_s1 + $0x204] ss:$8 sps:$4 sm:$0xff]  }
  0x27   : >> { %430 = vmatpush1.bf16.msra.mxu0 %v3208_v23  ;;  %v3266_v3 = vld [vmem:[%s4618_s1 + $0xf4] ss:$8 sps:$4 sm:$0xff]   ;;  %v3269_v5 = vld [vmem:[%s4618_s1 + $0xf0] ss:$8 sps:$4 sm:$0xff]   ;;  %v3279_v7 = vld [vmem:[%s4618_s1 + $0x304] ss:$8 sps:$4 sm:$0xff]  }
  0x28   : >> { %638 = vmatpush1.bf16.msra.mxu1 %v3209_v24  ;;  %431 = vmatprep.subr.bf16.mxu0 %v3210_v25  ;;  %v3274_v10 = vld [vmem:[%s4618_s1 + $0x200] ss:$8 sps:$4 sm:$0xff]   ;;  %v3282_v12 = vld [vmem:[%s4618_s1 + $0x214] ss:$8 sps:$4 sm:$0xff]   ;;  %v3280_v14 = vld [vmem:[%s4618_s1 + $0x210] ss:$8 sps:$4 sm:$0xff]  }
  0x29   : >> { %639 = vmatprep.subr.bf16.mxu1 %v3212_v26  ;;  %v3277_v11 = vld [vmem:[%s4618_s1 + $0x300] ss:$8 sps:$4 sm:$0xff]   ;;  %v3285_v13 = vld [vmem:[%s4618_s1 + $0x314] ss:$8 sps:$4 sm:$0xff]   ;;  %v3283_v15 = vld [vmem:[%s4618_s1 + $0x310] ss:$8 sps:$4 sm:$0xff]  }
  0x2a   : >> { %v3288_v16 = vld [vmem:[%s4618_s1 + $0x224] ss:$8 sps:$4 sm:$0xff]   ;;  %v3286_v18 = vld [vmem:[%s4618_s1 + $0x220] ss:$8 sps:$4 sm:$0xff]   ;;  %v3294_v20 = vld [vmem:[%s4618_s1 + $0x234] ss:$8 sps:$4 sm:$0xff]  }
  0x2b   : >> { %432 = vmatpush1.bf16.msra.mxu0 %v3214_v27  ;;  %v3291_v17 = vld [vmem:[%s4618_s1 + $0x324] ss:$8 sps:$4 sm:$0xff]   ;;  %v3289_v19 = vld [vmem:[%s4618_s1 + $0x320] ss:$8 sps:$4 sm:$0xff]   ;;  %v3297_v21 = vld [vmem:[%s4618_s1 + $0x334] ss:$8 sps:$4 sm:$0xff]  }
  0x2c   : >> { %640 = vmatpush1.bf16.msra.mxu1 %v3215_v28  ;;  %433 = vmatprep.subr.bf16.mxu0 %v3216_v29  ;;  %v3292_v22 = vld [vmem:[%s4618_s1 + $0x230] ss:$8 sps:$4 sm:$0xff]   ;;  %v3300_v24 = vld [vmem:[%s4618_s1 + $0x244] ss:$8 sps:$4 sm:$0xff]   ;;  %v3298_v26 = vld [vmem:[%s4618_s1 + $0x240] ss:$8 sps:$4 sm:$0xff]  }
  0x2d   : >> { %641 = vmatprep.subr.bf16.mxu1 %v3218_v30  ;;  %v3295_v23 = vld [vmem:[%s4618_s1 + $0x330] ss:$8 sps:$4 sm:$0xff]   ;;  %v3303_v25 = vld [vmem:[%s4618_s1 + $0x344] ss:$8 sps:$4 sm:$0xff]   ;;  %v3301_v27 = vld [vmem:[%s4618_s1 + $0x340] ss:$8 sps:$4 sm:$0xff]  }
  0x2e   : >> { %v3306_v28 = vld [vmem:[%s4618_s1 + $0x254] ss:$8 sps:$4 sm:$0xff]   ;;  %v3304_v30 = vld [vmem:[%s4618_s1 + $0x250] ss:$8 sps:$4 sm:$0xff]   ;;  %v3324_v47 = vld [vmem:[%s4618_s1 + $0x284] ss:$8 sps:$4 sm:$0xff]  }
  0x2f   : >> { %434 = vmatpush1.bf16.msra.mxu0 %v3220_v31  ;;  %v3309_v29 = vld [vmem:[%s4618_s1 + $0x354] ss:$8 sps:$4 sm:$0xff]   ;;  %v3307_v31 = vld [vmem:[%s4618_s1 + $0x350] ss:$8 sps:$4 sm:$0xff]   ;;  %v3327_v48 = vld [vmem:[%s4618_s1 + $0x384] ss:$8 sps:$4 sm:$0xff]  }
  0x30   : >> { %642 = vmatpush1.bf16.msra.mxu1 %v3221_v32  ;;  %435 = vmatprep.subr.bf16.mxu0 %v3222_v33  ;;  %v3312_v32 = vld [vmem:[%s4618_s1 + $0x264] ss:$8 sps:$4 sm:$0xff]   ;;  %v3330_v52 = vld [vmem:[%s4618_s1 + $0x294] ss:$8 sps:$4 sm:$0xff]   ;;  %s177_s24 = sadd.s32 1, %s3638_s24  }
  0x31   : >> { %643 = vmatprep.subr.bf16.mxu1 %v3224_v34  ;;  %v3315_v33 = vld [vmem:[%s4618_s1 + $0x364] ss:$8 sps:$4 sm:$0xff]   ;;  %p174_p4 = scmp.ge.s32.totalorder %s177_s24, 4  }
  0x32   : >> { %v3965_v34 = vld [vmem:[%s3822_s19] sm:$0x77] }
  0x33   : >> { %436 = vmatpush1.bf16.msra.mxu0 %v3226_v35  ;;  %v3310_v35 = vld [vmem:[%s4618_s1 + $0x260] ss:$8 sps:$4 sm:$0xff]  }
  0x34   : >> { %644 = vmatpush1.bf16.msra.mxu1 %v3227_v36  ;;  %437 = vmatprep.subr.bf16.mxu0 %v3228_v37  ;;  %v2696_v36 = vcombine.high %v3965_v34, %v3965_v34  ;;  %v3973_v37 = vld [vmem:[%s3822_s19 + $0x10] sm:$0x33] }
  0x35   : >> { %645 = vmatprep.subr.bf16.mxu1 %v3230_v38  ;;  %v3313_v38 = vld [vmem:[%s4618_s1 + $0x360] ss:$8 sps:$4 sm:$0xff]  }
  0x37   : >> { %438 = vmatpush1.bf16.msra.mxu0 %v3232_v39  ;;  %v2765_v39 = vcombine.high %v3973_v37, %v3973_v37 }
  0x38   : >> { %646 = vmatpush1.bf16.msra.mxu1 %v3233_v40  ;;  %439 = vmatprep.subr.bf16.mxu0 %v3234_v41  ;;  %v3318_v40 = vld [vmem:[%s4618_s1 + $0x274] ss:$8 sps:$4 sm:$0xff]  }
  0x39   : >> { %647 = vmatprep.subr.bf16.mxu1 %v3236_v42  ;;  %v3321_v41 = vld [vmem:[%s4618_s1 + $0x374] ss:$8 sps:$4 sm:$0xff]   ;;  %v715_v42 = vshrl.u32 %v2696_v36, 16 }
  0x3b   : >> { %440 = vmatpush1.bf16.msra.mxu0 %v3238_v43  ;;  %v717_v43 = vshll.u32 %v2696_v36, 16  ;;  %v3391_v36 = vld [vmem:[%s4618_s1 + $0x524] ss:$8 sps:$4 sm:$0xff]  }
  0x3c   : >> { %648 = vmatpush1.bf16.msra.mxu1 %v3239_v44  ;;  %441 = vmatprep.subr.bf16.mxu0 %v3240_v45  ;;  %v3316_v45 = vld [vmem:[%s4618_s1 + $0x270] ss:$8 sps:$4 sm:$0xff]  }
  0x3d   : >> { %649 = vmatprep.subr.bf16.mxu1 %v3242_v46  ;;  %v719_v44 = vrot.slane %v717_v43, 1  ;;  %v3319_v46 = vld [vmem:[%s4618_s1 + $0x370] ss:$8 sps:$4 sm:$0xff]   ;;  %v3397_v43 = vld [vmem:[%s4618_s1 + $0x534] ss:$8 sps:$4 sm:$0xff]  }
  0x3f   : >> { %442 = vmatpush1.bf16.msra.mxu0 %v3244_v50  ;;  %v720_v49 = vor.u32 %v719_v44, %v715_v42  ;;  %v3322_v50 = vld [vmem:[%s4618_s1 + $0x280] ss:$8 sps:$4 sm:$0xff]  }
  0x40   : >> { %650 = vmatpush1.bf16.msra.mxu1 %v3245_v51  ;;  %443 = vmatprep.subr.bf16.mxu0 %v3246_v53  ;;  %v3325_v51 = vld [vmem:[%s4618_s1 + $0x380] ss:$8 sps:$4 sm:$0xff]   ;;  %v3333_v53 = vld [vmem:[%s4618_s1 + $0x394] ss:$8 sps:$4 sm:$0xff]  }
  0x41   : >> { %651 = vmatprep.subr.bf16.mxu1 %v3248_v54  ;;  %v3328_v54 = vld [vmem:[%s4618_s1 + $0x290] ss:$8 sps:$4 sm:$0xff]  }
  0x43   : >> { %444 = vmatpush1.bf16.msra.mxu0 %v3250_v55  ;;  %v3331_v55 = vld [vmem:[%s4618_s1 + $0x390] ss:$8 sps:$4 sm:$0xff]  }
  0x44   : >> { %652 = vmatpush1.bf16.msra.mxu1 %v3251_v56  ;;  %445 = vmatprep.subr.bf16.mxu0 %v3252_v57  ;;  %v3336_v56 = vld [vmem:[%s4618_s1 + $0x2a4] ss:$8 sps:$4 sm:$0xff]  }
  0x45   : >> { %653 = vmatprep.subr.bf16.mxu1 %v3254_v58  ;;  %v3339_v57 = vld [vmem:[%s4618_s1 + $0x3a4] ss:$8 sps:$4 sm:$0xff]   ;;  %v3334_v58 = vld [vmem:[%s4618_s1 + $0x2a0] ss:$8 sps:$4 sm:$0xff]  }
  0x47   : >> { %446 = vmatpush1.bf16.msra.mxu0 %v3256_v59  ;;  %v3337_v59 = vld [vmem:[%s4618_s1 + $0x3a0] ss:$8 sps:$4 sm:$0xff]  }
  0x48   : >> { %654 = vmatpush1.bf16.msra.mxu1 %v3257_v60  ;;  %447 = vmatprep.subr.bf16.mxu0 %v3258_v61  ;;  %v3342_v60 = vld [vmem:[%s4618_s1 + $0x2b4] ss:$8 sps:$4 sm:$0xff]  }
  0x49   : >> { %655 = vmatprep.subr.bf16.mxu1 %v3260_v62  ;;  %v3345_v61 = vld [vmem:[%s4618_s1 + $0x3b4] ss:$8 sps:$4 sm:$0xff]   ;;  %v3340_v62 = vld [vmem:[%s4618_s1 + $0x2b0] ss:$8 sps:$4 sm:$0xff]  }
  0x4b   : >> { %448 = vmatpush1.bf16.msra.mxu0 %v3262_v63  ;;  %v3343_v63 = vld [vmem:[%s4618_s1 + $0x3b0] ss:$8 sps:$4 sm:$0xff]  }
  0x4c   : >> { %656 = vmatpush1.bf16.msra.mxu1 %v3263_v1  ;;  %449 = vmatprep.subr.bf16.mxu0 %v3264_v2  ;;  %v3348_v1 = vld [vmem:[%s4618_s1 + $0x2c4] ss:$8 sps:$4 sm:$0xff]  }
  0x4d   : >> { %657 = vmatprep.subr.bf16.mxu1 %v3266_v3  ;;  %v3351_v2 = vld [vmem:[%s4618_s1 + $0x3c4] ss:$8 sps:$4 sm:$0xff]   ;;  %v3346_v3 = vld [vmem:[%s4618_s1 + $0x2c0] ss:$8 sps:$4 sm:$0xff]  }
  0x4f   : >> { %450 = vmatpush1.bf16.msra.mxu0 %v3268_v4  ;;  %v3349_v4 = vld [vmem:[%s4618_s1 + $0x3c0] ss:$8 sps:$4 sm:$0xff]  }
  0x50   : >> { %658 = vmatpush1.bf16.msra.mxu1 %v3269_v5  ;;  %883 = vmatprep.subr.bf16.mxu0 %v3276_v6  ;;  %v3354_v5 = vld [vmem:[%s4618_s1 + $0x2d4] ss:$8 sps:$4 sm:$0xff]  }
  0x51   : >> { %1131 = vmatprep.subr.bf16.mxu1 %v3279_v7  ;;  %v3357_v6 = vld [vmem:[%s4618_s1 + $0x3d4] ss:$8 sps:$4 sm:$0xff]   ;;  %v2695_v7 = vcombine.low %v3965_v34, %v3965_v34  ;;  %v3388_v34 = vld [vmem:[%s4618_s1 + $0x424] ss:$8 sps:$4 sm:$0xff]  }
  0x52   : >> { %452 = vmatmul.mubr.bf16.vlgmr.msra.gmra.mrb[0].mxu0 %v2595_v8  ;;  %v3352_v8 = vld [vmem:[%s4618_s1 + $0x2d0] ss:$8 sps:$4 sm:$0xff]  }
  0x53   : >> { %660 = vmatmul.mubr.bf16.vlgmr.msra.gmra.mrb[0].mxu1 %v2629_v9  ;;  %884 = vmatpush1.bf16.msra.mxu0 %v3274_v10  ;;  %v3355_v9 = vld [vmem:[%s4618_s1 + $0x3d0] ss:$8 sps:$4 sm:$0xff]   ;;  %v3360_v10 = vld [vmem:[%s4618_s1 + $0x2e4] ss:$8 sps:$4 sm:$0xff]  }
  0x54   : >> { %1132 = vmatpush1.bf16.msra.mxu1 %v3277_v11  ;;  %885 = vmatprep.subr.bf16.mxu0 %v3282_v12  ;;  %v3363_v11 = vld [vmem:[%s4618_s1 + $0x3e4] ss:$8 sps:$4 sm:$0xff]   ;;  %v710_v12 = vshll.u32 %v2695_v7, 16 }
  0x55   : >> { %1133 = vmatprep.subr.bf16.mxu1 %v3285_v13  ;;  %1163 = vmatprep.mubr.bf16.mxu1 %v2765_v39  ;;  %v3358_v13 = vld [vmem:[%s4618_s1 + $0x2e0] ss:$8 sps:$4 sm:$0xff]  }
  0x56   : >> { %915 = vmatprep.mubr.bf16.mxu0 %v720_v49  ;;  %v3386_v39 = vld [vmem:[%s4618_s1 + $0x420] ss:$8 sps:$4 sm:$0xff]  }
  0x57   : >> { %886 = vmatpush1.bf16.msra.mxu0 %v3280_v14  ;;  %v3361_v14 = vld [vmem:[%s4618_s1 + $0x3e0] ss:$8 sps:$4 sm:$0xff]  }
  0x58   : >> { %1134 = vmatpush1.bf16.msra.mxu1 %v3283_v15  ;;  %887 = vmatprep.subr.bf16.mxu0 %v3288_v16  ;;  %v3366_v15 = vld [vmem:[%s4618_s1 + $0x2f4] ss:$8 sps:$4 sm:$0xff]   ;;  %v3398_v49 = vld [vmem:[%s4618_s1 + $0x440] ss:$8 sps:$4 sm:$0xff]  }
  0x59   : >> { %1135 = vmatprep.subr.bf16.mxu1 %v3291_v17  ;;  %v3369_v16 = vld [vmem:[%s4618_s1 + $0x3f4] ss:$8 sps:$4 sm:$0xff]   ;;  %v708_v17 = vshrl.u32 %v2695_v7, 16  ;;  %v3431_v7 = vld [vmem:[%s4618_s1 + $0x590] ss:$8 sps:$4 sm:$0xff]  }
  0x5b   : >> { %888 = vmatpush1.bf16.msra.mxu0 %v3286_v18  ;;  %v712_v18 = vrot.slane %v710_v12, 1  ;;  %v3442_v12 = vld [vmem:[%s4618_s1 + $0x4b4] ss:$8 sps:$4 sm:$0xff]  }
  0x5c   : >> { %1136 = vmatpush1.bf16.msra.mxu1 %v3289_v19  ;;  %889 = vmatprep.subr.bf16.mxu0 %v3294_v20  ;;  %v3364_v19 = vld [vmem:[%s4618_s1 + $0x2f0] ss:$8 sps:$4 sm:$0xff]  }
  0x5d   : >> { %1137 = vmatprep.subr.bf16.mxu1 %v3297_v21  ;;  %v3367_v20 = vld [vmem:[%s4618_s1 + $0x3f0] ss:$8 sps:$4 sm:$0xff]   ;;  %v3374_v21 = vld [vmem:[%s4618_s1 + $0x404] ss:$8 sps:$4 sm:$0xff]  }
  0x5f   : >> { %890 = vmatpush1.bf16.msra.mxu0 %v3292_v22  ;;  %v3379_v22 = vld [vmem:[%s4618_s1 + $0x504] ss:$8 sps:$4 sm:$0xff]  }
  0x60   : >> { %1138 = vmatpush1.bf16.msra.mxu1 %v3295_v23  ;;  %891 = vmatprep.subr.bf16.mxu0 %v3300_v24  ;;  %v713_v23 = vor.u32 %v712_v18, %v708_v17  ;;  %v2764_v24 = vcombine.low %v3973_v37, %v3973_v37  ;;  %v3451_v17 = vld [vmem:[%s4618_s1 + $0x5c4] ss:$8 sps:$4 sm:$0xff]   ;;  %v3446_v18 = vld [vmem:[%s4618_s1 + $0x4c0] ss:$8 sps:$4 sm:$0xff]  }
  0x61   : >> { %1139 = vmatprep.subr.bf16.mxu1 %v3303_v25  ;;  %v3372_v25 = vld [vmem:[%s4618_s1 + $0x400] ss:$8 sps:$4 sm:$0xff]  }
  0x63   : >> { %892 = vmatpush1.bf16.msra.mxu0 %v3298_v26  ;;  %v3377_v26 = vld [vmem:[%s4618_s1 + $0x500] ss:$8 sps:$4 sm:$0xff]  }
  0x64   : >> { %1140 = vmatpush1.bf16.msra.mxu1 %v3301_v27  ;;  %893 = vmatprep.subr.bf16.mxu0 %v3306_v28  ;;  %v3382_v27 = vld [vmem:[%s4618_s1 + $0x414] ss:$8 sps:$4 sm:$0xff]  }
  0x65   : >> { %1141 = vmatprep.subr.bf16.mxu1 %v3309_v29  ;;  %v3385_v28 = vld [vmem:[%s4618_s1 + $0x514] ss:$8 sps:$4 sm:$0xff]  }
  0x66   : >> { %v4111_v29 = vld [vmem:[%s3822_s19 + $0x18] sm:$0x33] }
  0x67   : >> { %894 = vmatpush1.bf16.msra.mxu0 %v3304_v30  ;;  %v3380_v30 = vld [vmem:[%s4618_s1 + $0x410] ss:$8 sps:$4 sm:$0xff]  }
  0x68   : >> { %1142 = vmatpush1.bf16.msra.mxu1 %v3307_v31  ;;  %895 = vmatprep.subr.bf16.mxu0 %v3312_v32  ;;  %v3383_v31 = vld [vmem:[%s4618_s1 + $0x510] ss:$8 sps:$4 sm:$0xff]   ;;  %v2835_v32 = vcombine.high %v4111_v29, %v4111_v29 }
  0x69   : >> { %1143 = vmatprep.subr.bf16.mxu1 %v3315_v33  ;;  %v4122_v33 = vld [vmem:[%s3822_s19 + $0x10] sm:$0x77] }
  0x6b   : >> { %896 = vmatpush1.bf16.msra.mxu0 %v3310_v35  ;;  %v2902_v35 = vcombine.high %v4122_v33, %v4122_v33 }
  0x6c   : >> { %1144 = vmatpush1.bf16.msra.mxu1 %v3313_v38  ;;  %897 = vmatprep.subr.bf16.mxu0 %v3318_v40  ;;  %v3389_v40 = vld [vmem:[%s4618_s1 + $0x520] ss:$8 sps:$4 sm:$0xff]  }
  0x6d   : >> { %1145 = vmatprep.subr.bf16.mxu1 %v3321_v41  ;;  %v1468_v37 = vshrl.u32 %v2902_v35, 16  ;;  %v1470_v38 = vshll.u32 %v2902_v35, 16  ;;  %v3394_v41 = vld [vmem:[%s4618_s1 + $0x434] ss:$8 sps:$4 sm:$0xff]  }
  0x6f   : >> { %898 = vmatpush1.bf16.msra.mxu0 %v3316_v45  ;;  %v1472_v42 = vrot.slane %v1470_v38, 1  ;;  %v3392_v45 = vld [vmem:[%s4618_s1 + $0x430] ss:$8 sps:$4 sm:$0xff]   ;;  %v3479_v38 = vld [vmem:[%s4618_s1 + $0x704] ss:$8 sps:$4 sm:$0xff]  }
  0x70   : >> { %1146 = vmatpush1.bf16.msra.mxu1 %v3319_v46  ;;  %899 = vmatprep.subr.bf16.mxu0 %v3324_v47  ;;  %v3395_v46 = vld [vmem:[%s4618_s1 + $0x530] ss:$8 sps:$4 sm:$0xff]   ;;  %v3400_v47 = vld [vmem:[%s4618_s1 + $0x444] ss:$8 sps:$4 sm:$0xff]  }
  0x71   : >> { %1147 = vmatprep.subr.bf16.mxu1 %v3327_v48  ;;  %v1473_v44 = vor.u32 %v1472_v42, %v1468_v37  ;;  %v3403_v48 = vld [vmem:[%s4618_s1 + $0x544] ss:$8 sps:$4 sm:$0xff]  }
  0x72   : >> { %v3474_v37 = vld [vmem:[%s4618_s1 + $0x604] ss:$8 sps:$4 sm:$0xff]  }
  0x73   : >> { %900 = vmatpush1.bf16.msra.mxu0 %v3322_v50  ;;  %v3401_v50 = vld [vmem:[%s4618_s1 + $0x540] ss:$8 sps:$4 sm:$0xff]  }
  0x74   : >> { %1148 = vmatpush1.bf16.msra.mxu1 %v3325_v51  ;;  %901 = vmatprep.subr.bf16.mxu0 %v3330_v52  ;;  %v3406_v51 = vld [vmem:[%s4618_s1 + $0x454] ss:$8 sps:$4 sm:$0xff]  }
  0x75   : >> { %1149 = vmatprep.subr.bf16.mxu1 %v3333_v53  ;;  %v3409_v52 = vld [vmem:[%s4618_s1 + $0x554] ss:$8 sps:$4 sm:$0xff]   ;;  %v3404_v53 = vld [vmem:[%s4618_s1 + $0x450] ss:$8 sps:$4 sm:$0xff]  }
  0x77   : >> { %902 = vmatpush1.bf16.msra.mxu0 %v3328_v54  ;;  %v3407_v54 = vld [vmem:[%s4618_s1 + $0x550] ss:$8 sps:$4 sm:$0xff]  }
  0x78   : >> { %1150 = vmatpush1.bf16.msra.mxu1 %v3331_v55  ;;  %903 = vmatprep.subr.bf16.mxu0 %v3336_v56  ;;  %v3412_v55 = vld [vmem:[%s4618_s1 + $0x464] ss:$8 sps:$4 sm:$0xff]  }
  0x79   : >> { %1151 = vmatprep.subr.bf16.mxu1 %v3339_v57  ;;  %v3415_v56 = vld [vmem:[%s4618_s1 + $0x564] ss:$8 sps:$4 sm:$0xff]   ;;  %v3410_v57 = vld [vmem:[%s4618_s1 + $0x460] ss:$8 sps:$4 sm:$0xff]  }
  0x7b   : >> { %904 = vmatpush1.bf16.msra.mxu0 %v3334_v58  ;;  %v3413_v58 = vld [vmem:[%s4618_s1 + $0x560] ss:$8 sps:$4 sm:$0xff]  }
  0x7c   : >> { %1152 = vmatpush1.bf16.msra.mxu1 %v3337_v59  ;;  %905 = vmatprep.subr.bf16.mxu0 %v3342_v60  ;;  %v3418_v59 = vld [vmem:[%s4618_s1 + $0x474] ss:$8 sps:$4 sm:$0xff]  }
  0x7d   : >> { %1153 = vmatprep.subr.bf16.mxu1 %v3345_v61  ;;  %v3421_v60 = vld [vmem:[%s4618_s1 + $0x574] ss:$8 sps:$4 sm:$0xff]   ;;  %v3416_v61 = vld [vmem:[%s4618_s1 + $0x470] ss:$8 sps:$4 sm:$0xff]  }
  0x7f   : >> { %906 = vmatpush1.bf16.msra.mxu0 %v3340_v62  ;;  %v3419_v62 = vld [vmem:[%s4618_s1 + $0x570] ss:$8 sps:$4 sm:$0xff]  }
  0x80   : >> { %1154 = vmatpush1.bf16.msra.mxu1 %v3343_v63  ;;  %907 = vmatprep.subr.bf16.mxu0 %v3348_v1  ;;  %v3424_v63 = vld [vmem:[%s4618_s1 + $0x484] ss:$8 sps:$4 sm:$0xff]  }
  0x81   : >> { %1155 = vmatprep.subr.bf16.mxu1 %v3351_v2  ;;  %v3427_v1 = vld [vmem:[%s4618_s1 + $0x584] ss:$8 sps:$4 sm:$0xff]   ;;  %v3422_v2 = vld [vmem:[%s4618_s1 + $0x480] ss:$8 sps:$4 sm:$0xff]  }
  0x83   : >> { %908 = vmatpush1.bf16.msra.mxu0 %v3346_v3  ;;  %v3425_v3 = vld [vmem:[%s4618_s1 + $0x580] ss:$8 sps:$4 sm:$0xff]  }
  0x84   : >> { %1156 = vmatpush1.bf16.msra.mxu1 %v3349_v4  ;;  %909 = vmatprep.subr.bf16.mxu0 %v3354_v5  ;;  %v3430_v4 = vld [vmem:[%s4618_s1 + $0x494] ss:$8 sps:$4 sm:$0xff]  }
  0x85   : >> { %1157 = vmatprep.subr.bf16.mxu1 %v3357_v6  ;;  %v3433_v5 = vld [vmem:[%s4618_s1 + $0x594] ss:$8 sps:$4 sm:$0xff]   ;;  %v3428_v6 = vld [vmem:[%s4618_s1 + $0x490] ss:$8 sps:$4 sm:$0xff]  }
  0x87   : >> { %910 = vmatpush1.bf16.msra.mxu0 %v3352_v8  ;;  %v3436_v8 = vld [vmem:[%s4618_s1 + $0x4a4] ss:$8 sps:$4 sm:$0xff]  }
  0x88   : >> { %1158 = vmatpush1.bf16.msra.mxu1 %v3355_v9  ;;  %911 = vmatprep.subr.bf16.mxu0 %v3360_v10  ;;  %v3439_v9 = vld [vmem:[%s4618_s1 + $0x5a4] ss:$8 sps:$4 sm:$0xff]   ;;  %v3434_v10 = vld [vmem:[%s4618_s1 + $0x4a0] ss:$8 sps:$4 sm:$0xff]  }
  0x89   : >> { %1159 = vmatprep.subr.bf16.mxu1 %v3363_v11  ;;  %v3437_v11 = vld [vmem:[%s4618_s1 + $0x5a0] ss:$8 sps:$4 sm:$0xff]  }
  0x8b   : >> { %912 = vmatpush1.bf16.msra.mxu0 %v3358_v13  ;;  %v3445_v13 = vld [vmem:[%s4618_s1 + $0x5b4] ss:$8 sps:$4 sm:$0xff]  }
  0x8c   : >> { %1160 = vmatpush1.bf16.msra.mxu1 %v3361_v14  ;;  %913 = vmatprep.subr.bf16.mxu0 %v3366_v15  ;;  %v3440_v14 = vld [vmem:[%s4618_s1 + $0x4b0] ss:$8 sps:$4 sm:$0xff]  }
  0x8d   : >> { %1161 = vmatprep.subr.bf16.mxu1 %v3369_v16  ;;  %v3443_v15 = vld [vmem:[%s4618_s1 + $0x5b0] ss:$8 sps:$4 sm:$0xff]   ;;  %v3448_v16 = vld [vmem:[%s4618_s1 + $0x4c4] ss:$8 sps:$4 sm:$0xff]  }
  0x8f   : >> { %914 = vmatpush1.bf16.msra.mxu0 %v3364_v19  ;;  %v3449_v19 = vld [vmem:[%s4618_s1 + $0x5c0] ss:$8 sps:$4 sm:$0xff]  }
  0x90   : >> { %1162 = vmatpush1.bf16.msra.mxu1 %v3367_v20  ;;  %1378 = vmatprep.subr.bf16.mxu0 %v3374_v21  ;;  %v3454_v20 = vld [vmem:[%s4618_s1 + $0x4d4] ss:$8 sps:$4 sm:$0xff]  }
  0x91   : >> { %1636 = vmatprep.subr.bf16.mxu1 %v3379_v22  ;;  %v3457_v21 = vld [vmem:[%s4618_s1 + $0x5d4] ss:$8 sps:$4 sm:$0xff]   ;;  %v3452_v22 = vld [vmem:[%s4618_s1 + $0x4d0] ss:$8 sps:$4 sm:$0xff]  }
  0x92   : >> { %916 = vmatmul.mubr.bf16.vlgmr.msra.gmra.mrb[4].mxu0 %v713_v23  ;;  %v2901_v23 = vcombine.low %v4122_v33, %v4122_v33  ;;  %v3464_v33 = vld [vmem:[%s4618_s1 + $0x4f0] ss:$8 sps:$4 sm:$0xff]  }
  0x93   : >> { %1164 = vmatmul.mubr.bf16.vlgmr.msra.gmra.mrb[4].mxu1 %v2764_v24  ;;  %1379 = vmatpush1.bf16.msra.mxu0 %v3372_v25  ;;  %v3455_v24 = vld [vmem:[%s4618_s1 + $0x5d0] ss:$8 sps:$4 sm:$0xff]   ;;  %v3460_v25 = vld [vmem:[%s4618_s1 + $0x4e4] ss:$8 sps:$4 sm:$0xff]  }
  0x94   : >> { %1637 = vmatpush1.bf16.msra.mxu1 %v3377_v26  ;;  %1380 = vmatprep.subr.bf16.mxu0 %v3382_v27  ;;  %v3463_v26 = vld [vmem:[%s4618_s1 + $0x5e4] ss:$8 sps:$4 sm:$0xff]   ;;  %v3458_v27 = vld [vmem:[%s4618_s1 + $0x4e0] ss:$8 sps:$4 sm:$0xff]  }
  0x95   : >> { %1638 = vmatprep.subr.bf16.mxu1 %v3385_v28  ;;  %1410 = vmatprep.mubr.bf16.mxu0 %v2835_v32  ;;  %v1463_v28 = vshll.u32 %v2901_v23, 16  ;;  %v3469_v32 = vld [vmem:[%s4618_s1 + $0x5f4] ss:$8 sps:$4 sm:$0xff]  }
  0x96   : >> { %1668 = vmatprep.mubr.bf16.mxu1 %v1473_v44  ;;  %v3477_v44 = vld [vmem:[%s4618_s1 + $0x700] ss:$8 sps:$4 sm:$0xff]  }
  0x97   : >> { %1381 = vmatpush1.bf16.msra.mxu0 %v3380_v30  ;;  %v3461_v30 = vld [vmem:[%s4618_s1 + $0x5e0] ss:$8 sps:$4 sm:$0xff]   ;;  %v1465_v35 = vrot.slane %v1463_v28, 1  ;;  %v3551_v28 = vld [vmem:[%s4618_s1 + $0x7c4] ss:$8 sps:$4 sm:$0xff]  }
  0x98   : >> { %1639 = vmatpush1.bf16.msra.mxu1 %v3383_v31  ;;  %1382 = vmatprep.subr.bf16.mxu0 %v3388_v34  ;;  %v3466_v31 = vld [vmem:[%s4618_s1 + $0x4f4] ss:$8 sps:$4 sm:$0xff]   ;;  %v1461_v34 = vshrl.u32 %v2901_v23, 16 }
  0x99   : >> { %1640 = vmatprep.subr.bf16.mxu1 %v3391_v36  ;;  %v3467_v36 = vld [vmem:[%s4618_s1 + $0x5f0] ss:$8 sps:$4 sm:$0xff]   ;;  %v3542_v23 = vld [vmem:[%s4618_s1 + $0x6b4] ss:$8 sps:$4 sm:$0xff]  }
  0x9a   : >> { %v1466_v42 = vor.u32 %v1465_v35, %v1461_v34  ;;  %v4471_v34 = vld [vmem:[%s3822_s19 + $0x20] sm:$0x77]  ;;  %v3552_v35 = vld [vmem:[%s4618_s1 + $0x6d0] ss:$8 sps:$4 sm:$0xff]  }
  0x9b   : >> { %1383 = vmatpush1.bf16.msra.mxu0 %v3386_v39  ;;  %v3472_v39 = vld [vmem:[%s4618_s1 + $0x600] ss:$8 sps:$4 sm:$0xff]  }
  0x9c   : >> { %1641 = vmatpush1.bf16.msra.mxu1 %v3389_v40  ;;  %1384 = vmatprep.subr.bf16.mxu0 %v3394_v41  ;;  %v4306_v40 = vld [vmem:[%s3822_s19 + $0x20] sm:$0x33]  ;;  %v2834_v41 = vcombine.low %v4111_v29, %v4111_v29 }
  0x9d   : >> { %1642 = vmatprep.subr.bf16.mxu1 %v3397_v43  ;;  %v4311_v43 = vld [vmem:[%s3822_s19 + $0x28] sm:$0x33]  ;;  %v2971_v29 = vcombine.high %v4306_v40, %v4306_v40 }
  0x9f   : >> { %1385 = vmatpush1.bf16.msra.mxu0 %v3392_v45  ;;  %v3482_v45 = vld [vmem:[%s4618_s1 + $0x614] ss:$8 sps:$4 sm:$0xff]  }
  0xa0   : >> { %1643 = vmatpush1.bf16.msra.mxu1 %v3395_v46  ;;  %1386 = vmatprep.subr.bf16.mxu0 %v3400_v47  ;;  %v3485_v46 = vld [vmem:[%s4618_s1 + $0x714] ss:$8 sps:$4 sm:$0xff]   ;;  %v3041_v47 = vcombine.high %v4311_v43, %v4311_v43 }
  0xa1   : >> { %1644 = vmatprep.subr.bf16.mxu1 %v3403_v48  ;;  %v3480_v48 = vld [vmem:[%s4618_s1 + $0x610] ss:$8 sps:$4 sm:$0xff]  }
  0xa3   : >> { %1387 = vmatpush1.bf16.msra.mxu0 %v3398_v49  ;;  %v3483_v49 = vld [vmem:[%s4618_s1 + $0x710] ss:$8 sps:$4 sm:$0xff]  }
  0xa4   : >> { %1645 = vmatpush1.bf16.msra.mxu1 %v3401_v50  ;;  %1388 = vmatprep.subr.bf16.mxu0 %v3406_v51  ;;  %v3488_v50 = vld [vmem:[%s4618_s1 + $0x624] ss:$8 sps:$4 sm:$0xff]  }
  0xa5   : >> { %1646 = vmatprep.subr.bf16.mxu1 %v3409_v52  ;;  %v3491_v51 = vld [vmem:[%s4618_s1 + $0x724] ss:$8 sps:$4 sm:$0xff]   ;;  %v3486_v52 = vld [vmem:[%s4618_s1 + $0x620] ss:$8 sps:$4 sm:$0xff]  }
  0xa7   : >> { %1389 = vmatpush1.bf16.msra.mxu0 %v3404_v53  ;;  %v3489_v53 = vld [vmem:[%s4618_s1 + $0x720] ss:$8 sps:$4 sm:$0xff]  }
  0xa8   : >> { %1647 = vmatpush1.bf16.msra.mxu1 %v3407_v54  ;;  %1390 = vmatprep.subr.bf16.mxu0 %v3412_v55  ;;  %v3494_v54 = vld [vmem:[%s4618_s1 + $0x634] ss:$8 sps:$4 sm:$0xff]  }
  0xa9   : >> { %1648 = vmatprep.subr.bf16.mxu1 %v3415_v56  ;;  %v3497_v55 = vld [vmem:[%s4618_s1 + $0x734] ss:$8 sps:$4 sm:$0xff]   ;;  %v3492_v56 = vld [vmem:[%s4618_s1 + $0x630] ss:$8 sps:$4 sm:$0xff]  }
  0xab   : >> { %1391 = vmatpush1.bf16.msra.mxu0 %v3410_v57  ;;  %v3495_v57 = vld [vmem:[%s4618_s1 + $0x730] ss:$8 sps:$4 sm:$0xff]  }
  0xac   : >> { %1649 = vmatpush1.bf16.msra.mxu1 %v3413_v58  ;;  %1392 = vmatprep.subr.bf16.mxu0 %v3418_v59  ;;  %v3500_v58 = vld [vmem:[%s4618_s1 + $0x644] ss:$8 sps:$4 sm:$0xff]  }
  0xad   : >> { %1650 = vmatprep.subr.bf16.mxu1 %v3421_v60  ;;  %v3503_v59 = vld [vmem:[%s4618_s1 + $0x744] ss:$8 sps:$4 sm:$0xff]   ;;  %v3498_v60 = vld [vmem:[%s4618_s1 + $0x640] ss:$8 sps:$4 sm:$0xff]  }
  0xaf   : >> { %1393 = vmatpush1.bf16.msra.mxu0 %v3416_v61  ;;  %v3501_v61 = vld [vmem:[%s4618_s1 + $0x740] ss:$8 sps:$4 sm:$0xff]  }
  0xb0   : >> { %1651 = vmatpush1.bf16.msra.mxu1 %v3419_v62  ;;  %1394 = vmatprep.subr.bf16.mxu0 %v3424_v63  ;;  %v3506_v62 = vld [vmem:[%s4618_s1 + $0x654] ss:$8 sps:$4 sm:$0xff]  }
  0xb1   : >> { %1652 = vmatprep.subr.bf16.mxu1 %v3427_v1  ;;  %v3509_v63 = vld [vmem:[%s4618_s1 + $0x754] ss:$8 sps:$4 sm:$0xff]   ;;  %v3504_v1 = vld [vmem:[%s4618_s1 + $0x650] ss:$8 sps:$4 sm:$0xff]  }
  0xb3   : >> { %1395 = vmatpush1.bf16.msra.mxu0 %v3422_v2  ;;  %v3507_v2 = vld [vmem:[%s4618_s1 + $0x750] ss:$8 sps:$4 sm:$0xff]  }
  0xb4   : >> { %1653 = vmatpush1.bf16.msra.mxu1 %v3425_v3  ;;  %1396 = vmatprep.subr.bf16.mxu0 %v3430_v4  ;;  %v3512_v3 = vld [vmem:[%s4618_s1 + $0x664] ss:$8 sps:$4 sm:$0xff]  }
  0xb5   : >> { %1654 = vmatprep.subr.bf16.mxu1 %v3433_v5  ;;  %v3515_v4 = vld [vmem:[%s4618_s1 + $0x764] ss:$8 sps:$4 sm:$0xff]   ;;  %v3510_v5 = vld [vmem:[%s4618_s1 + $0x660] ss:$8 sps:$4 sm:$0xff]  }
  0xb7   : >> { %1397 = vmatpush1.bf16.msra.mxu0 %v3428_v6  ;;  %v3513_v6 = vld [vmem:[%s4618_s1 + $0x760] ss:$8 sps:$4 sm:$0xff]  }
  0xb8   : >> { %1655 = vmatpush1.bf16.msra.mxu1 %v3431_v7  ;;  %1398 = vmatprep.subr.bf16.mxu0 %v3436_v8  ;;  %v3518_v7 = vld [vmem:[%s4618_s1 + $0x674] ss:$8 sps:$4 sm:$0xff]  }
  0xb9   : >> { %1656 = vmatprep.subr.bf16.mxu1 %v3439_v9  ;;  %v3521_v8 = vld [vmem:[%s4618_s1 + $0x774] ss:$8 sps:$4 sm:$0xff]   ;;  %v3516_v9 = vld [vmem:[%s4618_s1 + $0x670] ss:$8 sps:$4 sm:$0xff]  }
  0xbb   : >> { %1399 = vmatpush1.bf16.msra.mxu0 %v3434_v10  ;;  %v3519_v10 = vld [vmem:[%s4618_s1 + $0x770] ss:$8 sps:$4 sm:$0xff]  }
  0xbc   : >> { %1657 = vmatpush1.bf16.msra.mxu1 %v3437_v11  ;;  %1400 = vmatprep.subr.bf16.mxu0 %v3442_v12  ;;  %v3524_v11 = vld [vmem:[%s4618_s1 + $0x684] ss:$8 sps:$4 sm:$0xff]  }
  0xbd   : >> { %1658 = vmatprep.subr.bf16.mxu1 %v3445_v13  ;;  %v3527_v12 = vld [vmem:[%s4618_s1 + $0x784] ss:$8 sps:$4 sm:$0xff]   ;;  %v3522_v13 = vld [vmem:[%s4618_s1 + $0x680] ss:$8 sps:$4 sm:$0xff]  }
  0xbf   : >> { %1401 = vmatpush1.bf16.msra.mxu0 %v3440_v14  ;;  %v3525_v14 = vld [vmem:[%s4618_s1 + $0x780] ss:$8 sps:$4 sm:$0xff]  }
  0xc0   : >> { %1659 = vmatpush1.bf16.msra.mxu1 %v3443_v15  ;;  %1402 = vmatprep.subr.bf16.mxu0 %v3448_v16  ;;  %v3530_v15 = vld [vmem:[%s4618_s1 + $0x694] ss:$8 sps:$4 sm:$0xff]  }
  0xc1   : >> { %1660 = vmatprep.subr.bf16.mxu1 %v3451_v17  ;;  %v3533_v16 = vld [vmem:[%s4618_s1 + $0x794] ss:$8 sps:$4 sm:$0xff]   ;;  %v3528_v17 = vld [vmem:[%s4618_s1 + $0x690] ss:$8 sps:$4 sm:$0xff]  }
  0xc3   : >> { %1403 = vmatpush1.bf16.msra.mxu0 %v3446_v18  ;;  %v3531_v18 = vld [vmem:[%s4618_s1 + $0x790] ss:$8 sps:$4 sm:$0xff]  }
  0xc4   : >> { %1661 = vmatpush1.bf16.msra.mxu1 %v3449_v19  ;;  %1404 = vmatprep.subr.bf16.mxu0 %v3454_v20  ;;  %v3536_v19 = vld [vmem:[%s4618_s1 + $0x6a4] ss:$8 sps:$4 sm:$0xff]  }
  0xc5   : >> { %1662 = vmatprep.subr.bf16.mxu1 %v3457_v21  ;;  %v3539_v20 = vld [vmem:[%s4618_s1 + $0x7a4] ss:$8 sps:$4 sm:$0xff]   ;;  %v3534_v21 = vld [vmem:[%s4618_s1 + $0x6a0] ss:$8 sps:$4 sm:$0xff]  }
  0xc7   : >> { %1405 = vmatpush1.bf16.msra.mxu0 %v3452_v22  ;;  %v3537_v22 = vld [vmem:[%s4618_s1 + $0x7a0] ss:$8 sps:$4 sm:$0xff]  }
  0xc8   : >> { %1663 = vmatpush1.bf16.msra.mxu1 %v3455_v24  ;;  %1406 = vmatprep.subr.bf16.mxu0 %v3460_v25  ;;  %v3545_v24 = vld [vmem:[%s4618_s1 + $0x7b4] ss:$8 sps:$4 sm:$0xff]   ;;  %v3540_v25 = vld [vmem:[%s4618_s1 + $0x6b0] ss:$8 sps:$4 sm:$0xff]  }
  0xc9   : >> { %1664 = vmatprep.subr.bf16.mxu1 %v3463_v26  ;;  %v3543_v26 = vld [vmem:[%s4618_s1 + $0x7b0] ss:$8 sps:$4 sm:$0xff]  }
  0xcb   : >> { %1407 = vmatpush1.bf16.msra.mxu0 %v3458_v27  ;;  %v3548_v27 = vld [vmem:[%s4618_s1 + $0x6c4] ss:$8 sps:$4 sm:$0xff]  }
  0xcc   : >> { %1665 = vmatpush1.bf16.msra.mxu1 %v3461_v30  ;;  %1408 = vmatprep.subr.bf16.mxu0 %v3466_v31  ;;  %v3546_v30 = vld [vmem:[%s4618_s1 + $0x6c0] ss:$8 sps:$4 sm:$0xff]  }
  0xcd   : >> { %1666 = vmatprep.subr.bf16.mxu1 %v3469_v32  ;;  %v3549_v31 = vld [vmem:[%s4618_s1 + $0x7c0] ss:$8 sps:$4 sm:$0xff]   ;;  %v3554_v32 = vld [vmem:[%s4618_s1 + $0x6d4] ss:$8 sps:$4 sm:$0xff]  }
  0xcf   : >> { %1409 = vmatpush1.bf16.msra.mxu0 %v3464_v33  ;;  %v3557_v33 = vld [vmem:[%s4618_s1 + $0x7d4] ss:$8 sps:$4 sm:$0xff]  }
  0xd0   : >> { %1667 = vmatpush1.bf16.msra.mxu1 %v3467_v36  ;;  %1884 = vmatprep.subr.bf16.mxu0 %v3474_v37  ;;  %v3555_v36 = vld [vmem:[%s4618_s1 + $0x7d0] ss:$8 sps:$4 sm:$0xff]   ;;  %v3108_v37 = vcombine.high %v4471_v34, %v4471_v34 }
  0xd1   : >> { %2131 = vmatprep.subr.bf16.mxu1 %v3479_v38  ;;  %v3560_v38 = vld [vmem:[%s4618_s1 + $0x6e4] ss:$8 sps:$4 sm:$0xff]  }
  0xd2   : >> { %1411 = vmatmul.mubr.bf16.vlgmr.msra.gmra.mrb[8].mxu0 %v2834_v41  ;;  %v3558_v41 = vld [vmem:[%s4618_s1 + $0x6e0] ss:$8 sps:$4 sm:$0xff]  }
  0xd3   : >> { %1669 = vmatmul.mubr.bf16.vlgmr.msra.gmra.mrb[8].mxu1 %v1466_v42  ;;  %1885 = vmatpush1.bf16.msra.mxu0 %v3472_v39  ;;  %v3563_v39 = vld [vmem:[%s4618_s1 + $0x7e4] ss:$8 sps:$4 sm:$0xff]   ;;  %v3561_v42 = vld [vmem:[%s4618_s1 + $0x7e0] ss:$8 sps:$4 sm:$0xff]  }
  0xd4   : >> { %2132 = vmatpush1.bf16.msra.mxu1 %v3477_v44  ;;  %1886 = vmatprep.subr.bf16.mxu0 %v3482_v45  ;;  %v2223_v44 = vshll.u32 %v3108_v37, 16  ;;  %v3566_v45 = vld [vmem:[%s4618_s1 + $0x6f4] ss:$8 sps:$4 sm:$0xff]  }
  0xd5   : >> { %2133 = vmatprep.subr.bf16.mxu1 %v3485_v46  ;;  %1916 = vmatprep.mubr.bf16.mxu0 %v2971_v29  ;;  %v3569_v46 = vld [vmem:[%s4618_s1 + $0x7f4] ss:$8 sps:$4 sm:$0xff]   ;;  %v3564_v29 = vld [vmem:[%s4618_s1 + $0x6f0] ss:$8 sps:$4 sm:$0xff]  }
  0xd6   : >> { %2163 = vmatprep.mubr.bf16.mxu1 %v3041_v47  ;;  %v3567_v47 = vld [vmem:[%s4618_s1 + $0x7f0] ss:$8 sps:$4 sm:$0xff]  }
  0xd7   : >> { %1887 = vmatpush1.bf16.msra.mxu0 %v3480_v48  ;;  %v2221_v48 = vshrl.u32 %v3108_v37, 16 }
  0xd8   : >> { %2134 = vmatpush1.bf16.msra.mxu1 %v3483_v49  ;;  %1888 = vmatprep.subr.bf16.mxu0 %v3488_v50  ;;  %v2225_v49 = vrot.slane %v2223_v44, 1  ;;  %v3574_v50 = vld [vmem:[%s4618_s1 + $0x804] ss:$8 sps:$4 sm:$0xff]  }
  0xd9   : >> { %2135 = vmatprep.subr.bf16.mxu1 %v3491_v51  ;;  %v2970_v51 = vcombine.low %v4306_v40, %v4306_v40  ;;  %v3577_v40 = vld [vmem:[%s4618_s1 + $0x810] ss:$8 sps:$4 sm:$0xff]  }
  0xdb   : >> { %1889 = vmatpush1.bf16.msra.mxu0 %v3486_v52  ;;  %v3040_v52 = vcombine.low %v4311_v43, %v4311_v43  ;;  %v3582_v43 = vld [vmem:[%s4618_s1 + $0x824] ss:$8 sps:$4 sm:$0xff]  }
  0xdc   : >> { %2136 = vmatpush1.bf16.msra.mxu1 %v3489_v53  ;;  %1890 = vmatprep.subr.bf16.mxu0 %v3494_v54  ;;  %v3572_v53 = vld [vmem:[%s4618_s1 + $0x800] ss:$8 sps:$4 sm:$0xff]   ;;  %v2226_v54 = vor.u32 %v2225_v49, %v2221_v48 }
  0xdd   : >> { %2137 = vmatprep.subr.bf16.mxu1 %v3497_v55  ;;  %v3579_v55 = vld [vmem:[%s4618_s1 + $0x814] ss:$8 sps:$4 sm:$0xff]  }
  0xdf   : >> { %1891 = vmatpush1.bf16.msra.mxu0 %v3492_v56  ;;  %v3580_v56 = vld [vmem:[%s4618_s1 + $0x820] ss:$8 sps:$4 sm:$0xff]  }
  0xe0   : >> { %2138 = vmatpush1.bf16.msra.mxu1 %v3495_v57  ;;  %1892 = vmatprep.subr.bf16.mxu0 %v3500_v58  ;;  %v3585_v57 = vld [vmem:[%s4618_s1 + $0x834] ss:$8 sps:$4 sm:$0xff]   ;;  %v3583_v58 = vld [vmem:[%s4618_s1 + $0x830] ss:$8 sps:$4 sm:$0xff]  }
  0xe1   : >> { %2139 = vmatprep.subr.bf16.mxu1 %v3503_v59  ;;  %v3588_v59 = vld [vmem:[%s4618_s1 + $0x844] ss:$8 sps:$4 sm:$0xff]  }
  0xe3   : >> { %1893 = vmatpush1.bf16.msra.mxu0 %v3498_v60  ;;  %v3586_v60 = vld [vmem:[%s4618_s1 + $0x840] ss:$8 sps:$4 sm:$0xff]  }
  0xe4   : >> { %2140 = vmatpush1.bf16.msra.mxu1 %v3501_v61  ;;  %1894 = vmatprep.subr.bf16.mxu0 %v3506_v62  ;;  %v3591_v61 = vld [vmem:[%s4618_s1 + $0x854] ss:$8 sps:$4 sm:$0xff]   ;;  %v3589_v62 = vld [vmem:[%s4618_s1 + $0x850] ss:$8 sps:$4 sm:$0xff]  }
  0xe5   : >> { %2141 = vmatprep.subr.bf16.mxu1 %v3509_v63  ;;  %v3594_v63 = vld [vmem:[%s4618_s1 + $0x864] ss:$8 sps:$4 sm:$0xff]  }
  0xe7   : >> { %1895 = vmatpush1.bf16.msra.mxu0 %v3504_v1 }
  0xe8   : >> { %2142 = vmatpush1.bf16.msra.mxu1 %v3507_v2  ;;  %1896 = vmatprep.subr.bf16.mxu0 %v3512_v3 }
  0xe9   : >> { %2143 = vmatprep.subr.bf16.mxu1 %v3515_v4 }
  0xeb   : >> { %1897 = vmatpush1.bf16.msra.mxu0 %v3510_v5 }
  0xec   : >> { %2144 = vmatpush1.bf16.msra.mxu1 %v3513_v6  ;;  %1898 = vmatprep.subr.bf16.mxu0 %v3518_v7 }
  0xed   : >> { %2145 = vmatprep.subr.bf16.mxu1 %v3521_v8  ;;  %v3592_v8 = vld [vmem:[%s4618_s1 + $0x860] ss:$8 sps:$4 sm:$0xff]  }
  0xef   : >> { %1899 = vmatpush1.bf16.msra.mxu0 %v3516_v9 }
  0xf0   : >> { %2146 = vmatpush1.bf16.msra.mxu1 %v3519_v10  ;;  %1900 = vmatprep.subr.bf16.mxu0 %v3524_v11  ;;  %v3597_v11 = vld [vmem:[%s4618_s1 + $0x874] ss:$8 sps:$4 sm:$0xff]  }
  0xf1   : >> { %2147 = vmatprep.subr.bf16.mxu1 %v3527_v12 }
  0xf3   : >> { %1901 = vmatpush1.bf16.msra.mxu0 %v3522_v13  ;;  %v3595_v13 = vld [vmem:[%s4618_s1 + $0x870] ss:$8 sps:$4 sm:$0xff]  }
  0xf4   : >> { %2148 = vmatpush1.bf16.msra.mxu1 %v3525_v14  ;;  %1902 = vmatprep.subr.bf16.mxu0 %v3530_v15  ;;  %v3600_v14 = vld [vmem:[%s4618_s1 + $0x884] ss:$8 sps:$4 sm:$0xff]   ;;  %v3598_v15 = vld [vmem:[%s4618_s1 + $0x880] ss:$8 sps:$4 sm:$0xff]  }
  0xf5   : >> { %2149 = vmatprep.subr.bf16.mxu1 %v3533_v16  ;;  %v3603_v16 = vld [vmem:[%s4618_s1 + $0x894] ss:$8 sps:$4 sm:$0xff]  }
  0xf7   : >> { %1903 = vmatpush1.bf16.msra.mxu0 %v3528_v17  ;;  %v3601_v17 = vld [vmem:[%s4618_s1 + $0x890] ss:$8 sps:$4 sm:$0xff]  }
  0xf8   : >> { %2150 = vmatpush1.bf16.msra.mxu1 %v3531_v18  ;;  %1904 = vmatprep.subr.bf16.mxu0 %v3536_v19  ;;  %v3606_v18 = vld [vmem:[%s4618_s1 + $0x8a4] ss:$8 sps:$4 sm:$0xff]   ;;  %v3604_v19 = vld [vmem:[%s4618_s1 + $0x8a0] ss:$8 sps:$4 sm:$0xff]  }
  0xf9   : >> { %2151 = vmatprep.subr.bf16.mxu1 %v3539_v20  ;;  %v3609_v20 = vld [vmem:[%s4618_s1 + $0x8b4] ss:$8 sps:$4 sm:$0xff]  }
  0xfb   : >> { %1905 = vmatpush1.bf16.msra.mxu0 %v3534_v21  ;;  %v3607_v21 = vld [vmem:[%s4618_s1 + $0x8b0] ss:$8 sps:$4 sm:$0xff]  }
  0xfc   : >> { %2152 = vmatpush1.bf16.msra.mxu1 %v3537_v22  ;;  %1906 = vmatprep.subr.bf16.mxu0 %v3542_v23  ;;  %v3612_v22 = vld [vmem:[%s4618_s1 + $0x8c4] ss:$8 sps:$4 sm:$0xff]   ;;  %v3610_v23 = vld [vmem:[%s4618_s1 + $0x8c0] ss:$8 sps:$4 sm:$0xff]  }
  0xfd   : >> { %2153 = vmatprep.subr.bf16.mxu1 %v3545_v24  ;;  %v3615_v24 = vld [vmem:[%s4618_s1 + $0x8d4] ss:$8 sps:$4 sm:$0xff]  }
  0xff   : >> { %1907 = vmatpush1.bf16.msra.mxu0 %v3540_v25  ;;  %v3107_v25 = vcombine.low %v4471_v34, %v4471_v34  ;;  %v3619_v34 = vld [vmem:[%s4618_s1 + $0x8f0] ss:$8 sps:$4 sm:$0xff]  }
 0x100   : >> { %2154 = vmatpush1.bf16.msra.mxu1 %v3543_v26  ;;  %1908 = vmatprep.subr.bf16.mxu0 %v3548_v27  ;;  %v3613_v26 = vld [vmem:[%s4618_s1 + $0x8d0] ss:$8 sps:$4 sm:$0xff]   ;;  %v3618_v27 = vld [vmem:[%s4618_s1 + $0x8e4] ss:$8 sps:$4 sm:$0xff]  }
 0x101   : >> { %2155 = vmatprep.subr.bf16.mxu1 %v3551_v28  ;;  %v2216_v28 = vshll.u32 %v3107_v25, 16 }
 0x103   : >> { %1909 = vmatpush1.bf16.msra.mxu0 %v3546_v30  ;;  %v3616_v30 = vld [vmem:[%s4618_s1 + $0x8e0] ss:$8 sps:$4 sm:$0xff]  }
 0x104   : >> { %2156 = vmatpush1.bf16.msra.mxu1 %v3549_v31  ;;  %1910 = vmatprep.subr.bf16.mxu0 %v3554_v32  ;;  %v3621_v31 = vld [vmem:[%s4618_s1 + $0x8f4] ss:$8 sps:$4 sm:$0xff]   ;;  %v2214_v32 = vshrl.u32 %v3107_v25, 16 }
 0x105   : >> { %2157 = vmatprep.subr.bf16.mxu1 %v3557_v33  ;;  %v2218_v33 = vrot.slane %v2216_v28, 1 }
 0x107   : >> { %1911 = vmatpush1.bf16.msra.mxu0 %v3552_v35  ;;  %v2219_v35 = vor.u32 %v2218_v33, %v2214_v32 }
 0x108   : >> { %2158 = vmatpush1.bf16.msra.mxu1 %v3555_v36  ;;  %1912 = vmatprep.subr.bf16.mxu0 %v3560_v38 }
 0x109   : >> { %2159 = vmatprep.subr.bf16.mxu1 %v3563_v39 }
 0x10b   : >> { %1913 = vmatpush1.bf16.msra.mxu0 %v3558_v41 }
 0x10c   : >> { %2160 = vmatpush1.bf16.msra.mxu1 %v3561_v42  ;;  %1914 = vmatprep.subr.bf16.mxu0 %v3566_v45 }
 0x10d   : >> { %2161 = vmatprep.subr.bf16.mxu1 %v3569_v46 }
 0x10f   : >> { %1915 = vmatpush1.bf16.msra.mxu0 %v3564_v29 }
 0x110   : >> { %2162 = vmatpush1.bf16.msra.mxu1 %v3567_v47  ;;  %2389 = vmatprep.subr.bf16.mxu0 %v3574_v50 }
 0x112   : >> { %1917 = vmatmul.mubr.bf16.vlgmr.msra.gmra.mrb[12].mxu0 %v2970_v51 }
 0x113   : >> { %2164 = vmatmul.mubr.bf16.vlgmr.msra.gmra.mrb[12].mxu1 %v3040_v52  ;;  %2390 = vmatpush1.bf16.msra.mxu0 %v3572_v53 }
 0x114   : >> { %2421 = vmatprep.mubr.bf16.mxu0 %v2226_v54  ;;  %2391 = vmatprep.subr.bf16.mxu0 %v3579_v55 }
 0x117   : >> { %2392 = vmatpush1.bf16.msra.mxu0 %v3577_v40 }
 0x118   : >> { %2393 = vmatprep.subr.bf16.mxu0 %v3582_v43 }
 0x11b   : >> { %2394 = vmatpush1.bf16.msra.mxu0 %v3580_v56 }
 0x11c   : >> { %2395 = vmatprep.subr.bf16.mxu0 %v3585_v57 }
 0x11f   : >> { %2396 = vmatpush1.bf16.msra.mxu0 %v3583_v58 }
 0x120   : >> { %2397 = vmatprep.subr.bf16.mxu0 %v3588_v59 }
 0x123   : >> { %2398 = vmatpush1.bf16.msra.mxu0 %v3586_v60 }
 0x124   : >> { %2399 = vmatprep.subr.bf16.mxu0 %v3591_v61 }
 0x125   : >> { %v453_v1 = vpop.f32.mrb[0].mxu0 }
 0x126   : >> { %v661_v2 = vpop.f32.mrb[0].mxu1  ;;  %v455_v4 = vpop.f32.mrb[1].mxu0 }
 0x127   : >> { %v662_v3 = vadd.f32 %v661_v2, %v453_v1  ;;  %v663_v5 = vpop.f32.mrb[1].mxu1  ;;  %v457_v7 = vpop.f32.mrb[2].mxu0  ;;  %2400 = vmatpush1.bf16.msra.mxu0 %v3589_v62 }
 0x128   : >> { %v664_v6 = vadd.f32 %v663_v5, %v455_v4  ;;  %v665_v9 = vpop.f32.mrb[2].mxu1  ;;  %v458_v10 = vpop.f32.mrb[3].mxu0  ;;  %2401 = vmatprep.subr.bf16.mxu0 %v3594_v63 }
 0x129   : >> { %v666_v12 = vpop.f32.mrb[3].mxu1 }
 0x12b   : >> { %2402 = vmatpush1.bf16.msra.mxu0 %v3592_v8  ;;  %v2433_v8 = vlaneseq }
 0x12c   : >> { %2403 = vmatprep.subr.bf16.mxu0 %v3597_v11 }
 0x12d   : >> { %v2434_v9 = vshrl.u32 %v2433_v8, 7 }
 0x12f   : >> { %2404 = vmatpush1.bf16.msra.mxu0 %v3595_v13  ;;  %v2435_v10 = vsub.s32 0, %v2434_v9  ;;  %v2439_v11 = vsub.s32 1, %v2434_v9 }
 0x130   : >> { %2405 = vmatprep.subr.bf16.mxu0 %v3600_v14 }
 0x131   : >> { %v2436_v12 = vrot.slane %v3671_v0, %v2435_v10  ;;  %v2440_v14 = vrot.slane %v3671_v0, %v2439_v11 }
 0x133   : >> { %2406 = vmatpush1.bf16.msra.mxu0 %v3598_v15 }
 0x134   : >> { %2407 = vmatprep.subr.bf16.mxu0 %v3603_v16 }
 0x137   : >> { %2408 = vmatpush1.bf16.msra.mxu0 %v3601_v17 }
 0x138   : >> { %2409 = vmatprep.subr.bf16.mxu0 %v3606_v18 }
 0x13b   : >> { %2410 = vmatpush1.bf16.msra.mxu0 %v3604_v19 }
 0x13c   : >> { %2411 = vmatprep.subr.bf16.mxu0 %v3609_v20 }
 0x13f   : >> { %2412 = vmatpush1.bf16.msra.mxu0 %v3607_v21 }
 0x140   : >> { %2413 = vmatprep.subr.bf16.mxu0 %v3612_v22 }
 0x143   : >> { %2414 = vmatpush1.bf16.msra.mxu0 %v3610_v23 }
 0x144   : >> { %2415 = vmatprep.subr.bf16.mxu0 %v3615_v24 }
 0x147   : >> { %2416 = vmatpush1.bf16.msra.mxu0 %v3613_v26 }
 0x148   : >> { %2417 = vmatprep.subr.bf16.mxu0 %v3618_v27 }
 0x14b   : >> { %2418 = vmatpush1.bf16.msra.mxu0 %v3616_v30 }
 0x14c   : >> { %2419 = vmatprep.subr.bf16.mxu0 %v3621_v31 }
 0x14f   : >> { %2420 = vmatpush1.bf16.msra.mxu0 %v3619_v34 }
 0x152   : >> { %2422 = vmatmul.mubr.bf16.vlgmr.msra.gmra.mrb[16].mxu0 %v2219_v35 }
 0x165   : >> { %v917_v36 = vpop.f32.mrb[4].mxu0 }
 0x166   : >> { %v1165_v37 = vpop.f32.mrb[4].mxu1  ;;  %v924_v38 = vadd.f32 %v917_v36, %v662_v3  ;;  %v919_v39 = vpop.f32.mrb[5].mxu0 }
 0x167   : >> { %v1167_v41 = vpop.f32.mrb[5].mxu1  ;;  %v925_v42 = vadd.f32 %v919_v39, %v664_v6  ;;  %v921_v44 = vpop.f32.mrb[6].mxu0 }
 0x168   : >> { %v1169_v45 = vpop.f32.mrb[6].mxu1  ;;  %v1172_v46 = vadd.f32 %v1165_v37, %v924_v38  ;;  %v922_v29 = vpop.f32.mrb[7].mxu0 }
 0x169   : >> { %v1170_v47 = vpop.f32.mrb[7].mxu1  ;;  %v1173_v48 = vadd.f32 %v1167_v41, %v925_v42 }
 0x1a5   : >> { %v1412_v49 = vpop.f32.mrb[8].mxu0 }
 0x1a6   : >> { %v1670_v50 = vpop.f32.mrb[8].mxu1  ;;  %v1419_v51 = vadd.f32 %v1412_v49, %v1172_v46  ;;  %v1414_v52 = vpop.f32.mrb[9].mxu0 }
 0x1a7   : >> { %v1672_v53 = vpop.f32.mrb[9].mxu1  ;;  %v1420_v54 = vadd.f32 %v1414_v52, %v1173_v48  ;;  %v1416_v55 = vpop.f32.mrb[10].mxu0 }
 0x1a8   : >> { %v1674_v40 = vpop.f32.mrb[10].mxu1  ;;  %v1677_v43 = vadd.f32 %v1670_v50, %v1419_v51  ;;  %v1417_v56 = vpop.f32.mrb[11].mxu0 }
 0x1a9   : >> { %v1675_v57 = vpop.f32.mrb[11].mxu1  ;;  %v1678_v58 = vadd.f32 %v1672_v53, %v1420_v54 }
 0x1e5   : >> { %v1918_v59 = vpop.f32.mrb[12].mxu0 }
 0x1e6   : >> { %v2165_v60 = vpop.f32.mrb[12].mxu1  ;;  %v1925_v61 = vadd.f32 %v1918_v59, %v1677_v43  ;;  %v1920_v62 = vpop.f32.mrb[13].mxu0 }
 0x1e7   : >> { %v2167_v63 = vpop.f32.mrb[13].mxu1  ;;  %v1926_v1 = vadd.f32 %v1920_v62, %v1678_v58  ;;  %v1922_v2 = vpop.f32.mrb[14].mxu0 }
 0x1e8   : >> { %v2169_v3 = vpop.f32.mrb[14].mxu1  ;;  %v2172_v4 = vadd.f32 %v2165_v60, %v1925_v61  ;;  %v1923_v5 = vpop.f32.mrb[15].mxu0 }
 0x1e9   : >> { %v2170_v6 = vpop.f32.mrb[15].mxu1  ;;  %v2173_v7 = vadd.f32 %v2167_v63, %v1926_v1 }
 0x225   : >> { %v2423_v13 = vpop.f32.mrb[16].mxu0 }
 0x226   : >> { %v2430_v15 = vadd.f32 %v2423_v13, %v2172_v4  ;;  %v2425_v16 = vpop.f32.mrb[17].mxu0 }
 0x227   : >> { %v2431_v17 = vadd.f32 %v2425_v16, %v2173_v7  ;;  %v2427_v18 = vpop.f32.mrb[18].mxu0 }
 0x228   : >> { %v2443_v19 = vadd.f32 %v2436_v12, %v2430_v15  ;;  %v2428_v20 = vpop.f32.mrb[19].mxu0 }
 0x229   : >> { %v2444_v21 = vadd.f32 %v2440_v14, %v2431_v17  ;;  %176 = sbr.rel (!%p174_p4) target bundleno = 17 (0x11), region = 84 }
 0x22a   : >> { %v2445_v22 = vmax.f32 %v2443_v19, 0.0 }
 0x22b   : >> { %v2446_v23 = vmax.f32 %v2444_v21, 0.0 }
 0x22d   : >> { %v3141_v24 = vpack.c.bf16 %v2446_v23, %v2445_v22 }
 0x22f   : >> { %3143 = vst.sshfl [vmem:[%s2461_s22] sm:$0x33 pattern:$0x76325410] %v3141_v24 }
 0x230 PF: > { %s13_s12 = sadd.s32 1, %s3634_s12  }
 0x231   : > { %p10_p5 = scmp.ge.s32.totalorder %s13_s12, 4  }
 0x233   :  { %12 = sbr.rel (!%p10_p5) target bundleno = 1 (0x1), region = 95 }

// kernel: fcdiscriminator_img_forward.5
= control target key start
LH: loop header
LB: loop body
LE: loop exit
PB: predicated region body
PF: predicated region fallthrough
CT: control target
= control target key end

     0   :  { %s3930_s20 = smov 0   ;;  %s5004_s0 = inlined_call_operand.vmem [shape: bf16[2,6,2,3,256], index: 0, kind: input, shape index: {}]   ;;  %s5005_s1 = inlined_call_operand.vmem [shape: bf16[3,3,256,256], index: 1, kind: input, shape index: {}]   ;;  %s5006_s2 = inlined_call_operand.vmem [shape: f32[1,256], index: 2, kind: input, shape index: {}]   ;;  %s5007_s3 = inlined_call_operand.vmem [shape: f32[256,1], index: 3, kind: input, shape index: {}]   ;;  %s5008_s4 = inlined_call_operand.<no memory space> [shape: f32[1,1], index: 4, kind: input, shape index: {}]   ;;  %s5009_s5 = inlined_call_operand.vmem [shape: f32[2,1,1], index: 5, kind: output, shape index: {}]  }
   0x1   :  { %v10_v0 = vstv %s5008_s4 }
   0x2   :  { %11 = vst [vmem:[#allocation2] sm:$0x1] %v10_v0 }
   0x3 LB: > { %s2741_s21 = sadd.s32 4294967295, %s3883_s20   ;;  %p2745_p0 = scmp.ge.s32.totalorder %s3883_s20, 1  ;;  %s3883_s20 = sphi %s3930_s20, %s17_s20  }
   0x4   : > { %p189_p1 = scmp.lt.s32.totalorder %s3883_s20, 3 }
   0x6   : > { %p190_p2 = pnand %p2745_p0, %p189_p1 }
   0x7   : > { %p215_p3 = scmp.lt.s32.totalorder (!%p190_p2), %s2741_s21, 1  ;;  %v3941_v1 = vld [vmem:[%s5006_s2] sm:$0x3] (!%p190_p2)  ;;  %v3955_v2 = vmov (!%p190_p2), 0.0   ;;  %v3957_v3 = vmov (!%p190_p2), 0.0   ;;  %s3959_s30 = smov (!%p190_p2), 0  }
   0x8   : > { %193 = sbr.rel (%p190_p2) target bundleno = 828 (0x33c), region = 40 }
   0xf   : > { %s5014_s21 = smov (!%p215_p3, %s2741_s21), 1 }
  0x10   : > { %s3400_s4 = smul.u32 48, %s5014_s21  ;;  %s222_s26 = scalar_lea.vmem %s5009_s5, %s5014_s21 }
  0x12   : > { %s3953_s29 = scalar_lea.vmem %s5004_s0, %s3400_s4 }
  0x13 LB: >> { %v3433_v4 = vld [vmem:[%s5005_s1 + $0x104] ss:$8 sps:$4 sm:$0xff]   ;;  %v3437_v6 = vld [vmem:[%s5005_s1 + $0x100] ss:$8 sps:$4 sm:$0xff]   ;;  %v3439_v8 = vld [vmem:[%s5005_s1 + $0x114] ss:$8 sps:$4 sm:$0xff]   ;;  %s3895_s30 = sphi %s3959_s30, %s229_s30   ;;  %v3891_v3 = vphi %v3957_v3, %v5012_v3   ;;  %v3887_v2 = vphi %v3955_v2, %v5011_v2  }
  0x14   : >> { %v3435_v5 = vld [vmem:[%s5005_s1 + $0x4] ss:$8 sps:$4 sm:$0xff]   ;;  %477 = vmatprep.subr.bf16.mxu0 %v3433_v4  ;;  %v3438_v7 = vld [vmem:[%s5005_s1] ss:$8 sps:$4 sm:$0xff]   ;;  %v3441_v9 = vld [vmem:[%s5005_s1 + $0x14] ss:$8 sps:$4 sm:$0xff]  }
  0x15   : >> { %689 = vmatprep.subr.bf16.mxu1 %v3435_v5  ;;  %478 = vmatpush1.bf16.msra.mxu0 %v3437_v6  ;;  %v3443_v10 = vld [vmem:[%s5005_s1 + $0x110] ss:$8 sps:$4 sm:$0xff]   ;;  %v3445_v12 = vld [vmem:[%s5005_s1 + $0x124] ss:$8 sps:$4 sm:$0xff]   ;;  %v3449_v14 = vld [vmem:[%s5005_s1 + $0x120] ss:$8 sps:$4 sm:$0xff]  }
  0x16   : >> { %690 = vmatpush1.bf16.msra.mxu1 %v3438_v7  ;;  %479 = vmatprep.subr.bf16.mxu0 %v3439_v8  ;;  %v3444_v11 = vld [vmem:[%s5005_s1 + $0x10] ss:$8 sps:$4 sm:$0xff]   ;;  %v3447_v13 = vld [vmem:[%s5005_s1 + $0x24] ss:$8 sps:$4 sm:$0xff]   ;;  %v3450_v15 = vld [vmem:[%s5005_s1 + $0x20] ss:$8 sps:$4 sm:$0xff]  }
  0x17   : >> { %691 = vmatprep.subr.bf16.mxu1 %v3441_v9  ;;  %v3451_v16 = vld [vmem:[%s5005_s1 + $0x134] ss:$8 sps:$4 sm:$0xff]   ;;  %v3455_v18 = vld [vmem:[%s5005_s1 + $0x130] ss:$8 sps:$4 sm:$0xff]   ;;  %v3457_v20 = vld [vmem:[%s5005_s1 + $0x144] ss:$8 sps:$4 sm:$0xff]  }
  0x18   : >> { %v3453_v17 = vld [vmem:[%s5005_s1 + $0x34] ss:$8 sps:$4 sm:$0xff]   ;;  %v3456_v19 = vld [vmem:[%s5005_s1 + $0x30] ss:$8 sps:$4 sm:$0xff]   ;;  %v3459_v21 = vld [vmem:[%s5005_s1 + $0x44] ss:$8 sps:$4 sm:$0xff]  }
  0x19   : >> { %480 = vmatpush1.bf16.msra.mxu0 %v3443_v10  ;;  %v3461_v22 = vld [vmem:[%s5005_s1 + $0x140] ss:$8 sps:$4 sm:$0xff]   ;;  %v3463_v24 = vld [vmem:[%s5005_s1 + $0x154] ss:$8 sps:$4 sm:$0xff]   ;;  %v3467_v26 = vld [vmem:[%s5005_s1 + $0x150] ss:$8 sps:$4 sm:$0xff]  }
  0x1a   : >> { %692 = vmatpush1.bf16.msra.mxu1 %v3444_v11  ;;  %481 = vmatprep.subr.bf16.mxu0 %v3445_v12  ;;  %v3462_v23 = vld [vmem:[%s5005_s1 + $0x40] ss:$8 sps:$4 sm:$0xff]   ;;  %v3465_v25 = vld [vmem:[%s5005_s1 + $0x54] ss:$8 sps:$4 sm:$0xff]   ;;  %v3468_v27 = vld [vmem:[%s5005_s1 + $0x50] ss:$8 sps:$4 sm:$0xff]  }
  0x1b   : >> { %693 = vmatprep.subr.bf16.mxu1 %v3447_v13  ;;  %v3469_v28 = vld [vmem:[%s5005_s1 + $0x164] ss:$8 sps:$4 sm:$0xff]   ;;  %v3473_v30 = vld [vmem:[%s5005_s1 + $0x160] ss:$8 sps:$4 sm:$0xff]   ;;  %v3475_v32 = vld [vmem:[%s5005_s1 + $0x174] ss:$8 sps:$4 sm:$0xff]  }
  0x1c   : >> { %v3471_v29 = vld [vmem:[%s5005_s1 + $0x64] ss:$8 sps:$4 sm:$0xff]   ;;  %v3474_v31 = vld [vmem:[%s5005_s1 + $0x60] ss:$8 sps:$4 sm:$0xff]   ;;  %v3477_v33 = vld [vmem:[%s5005_s1 + $0x74] ss:$8 sps:$4 sm:$0xff]  }
  0x1d   : >> { %482 = vmatpush1.bf16.msra.mxu0 %v3449_v14  ;;  %v3479_v34 = vld [vmem:[%s5005_s1 + $0x170] ss:$8 sps:$4 sm:$0xff]   ;;  %v3481_v36 = vld [vmem:[%s5005_s1 + $0x184] ss:$8 sps:$4 sm:$0xff]   ;;  %v3485_v38 = vld [vmem:[%s5005_s1 + $0x180] ss:$8 sps:$4 sm:$0xff]  }
  0x1e   : >> { %694 = vmatpush1.bf16.msra.mxu1 %v3450_v15  ;;  %483 = vmatprep.subr.bf16.mxu0 %v3451_v16  ;;  %v3480_v35 = vld [vmem:[%s5005_s1 + $0x70] ss:$8 sps:$4 sm:$0xff]   ;;  %v3483_v37 = vld [vmem:[%s5005_s1 + $0x84] ss:$8 sps:$4 sm:$0xff]   ;;  %v3486_v39 = vld [vmem:[%s5005_s1 + $0x80] ss:$8 sps:$4 sm:$0xff]  }
  0x1f   : >> { %695 = vmatprep.subr.bf16.mxu1 %v3453_v17  ;;  %v3487_v40 = vld [vmem:[%s5005_s1 + $0x194] ss:$8 sps:$4 sm:$0xff]   ;;  %v3491_v42 = vld [vmem:[%s5005_s1 + $0x190] ss:$8 sps:$4 sm:$0xff]   ;;  %v3493_v44 = vld [vmem:[%s5005_s1 + $0x1a4] ss:$8 sps:$4 sm:$0xff]  }
  0x20   : >> { %v3489_v41 = vld [vmem:[%s5005_s1 + $0x94] ss:$8 sps:$4 sm:$0xff]   ;;  %v3492_v43 = vld [vmem:[%s5005_s1 + $0x90] ss:$8 sps:$4 sm:$0xff]   ;;  %v3495_v45 = vld [vmem:[%s5005_s1 + $0xa4] ss:$8 sps:$4 sm:$0xff]  }
  0x21   : >> { %484 = vmatpush1.bf16.msra.mxu0 %v3455_v18  ;;  %s3325_s6 = sshll.u32 %s3895_s30, 4  ;;  %v3497_v46 = vld [vmem:[%s5005_s1 + $0x1a0] ss:$8 sps:$4 sm:$0xff]   ;;  %v3499_v48 = vld [vmem:[%s5005_s1 + $0x1b4] ss:$8 sps:$4 sm:$0xff]   ;;  %vm2537_vm0 = vcmask 1041408  }
  0x22   : >> { %696 = vmatpush1.bf16.msra.mxu1 %v3456_v19  ;;  %485 = vmatprep.subr.bf16.mxu0 %v3457_v20  ;;  %v3498_v47 = vld [vmem:[%s5005_s1 + $0xa0] ss:$8 sps:$4 sm:$0xff]   ;;  %s4107_s13 = scalar_lea.vmem %s3953_s29, %s3325_s6  ;;  %v3501_v49 = vld [vmem:[%s5005_s1 + $0xb4] ss:$8 sps:$4 sm:$0xff]   ;;  %v3503_v50 = vld [vmem:[%s5005_s1 + $0x1b0] ss:$8 sps:$4 sm:$0xff]  }
  0x23   : >> { %697 = vmatprep.subr.bf16.mxu1 %v3459_v21  ;;  %v2785_v51 = vld.sshfl [vmem:[%s4107_s13 + $0x4] sm:$0x11 pattern:$0x76325410]  ;;  %v3504_v52 = vld [vmem:[%s5005_s1 + $0xb0] ss:$8 sps:$4 sm:$0xff]  }
  0x24   : >> { %v314_v53 = vcombine.high %v2785_v51, %v2785_v51  ;;  %v2818_v54 = vld.sshfl [vmem:[%s4107_s13] sm:$0x11 pattern:$0x76325410]  ;;  %v3505_v55 = vld [vmem:[%s5005_s1 + $0x1c4] ss:$8 sps:$4 sm:$0xff]  }
  0x25   : >> { %486 = vmatpush1.bf16.msra.mxu0 %v3461_v22  ;;  %v3507_v56 = vld [vmem:[%s5005_s1 + $0xc4] ss:$8 sps:$4 sm:$0xff]   ;;  %v526_v57 = vcombine.high %v2818_v54, %v2818_v54  ;;  %v3509_v58 = vld [vmem:[%s5005_s1 + $0x1c0] ss:$8 sps:$4 sm:$0xff]   ;;  %v3511_v60 = vld [vmem:[%s5005_s1 + $0x1d4] ss:$8 sps:$4 sm:$0xff]  }
  0x26   : >> { %698 = vmatpush1.bf16.msra.mxu1 %v3462_v23  ;;  %487 = vmatprep.subr.bf16.mxu0 %v3463_v24  ;;  %v3510_v59 = vld [vmem:[%s5005_s1 + $0xc0] ss:$8 sps:$4 sm:$0xff]   ;;  %v3513_v61 = vld [vmem:[%s5005_s1 + $0xd4] ss:$8 sps:$4 sm:$0xff]   ;;  %v3515_v62 = vld [vmem:[%s5005_s1 + $0x1d0] ss:$8 sps:$4 sm:$0xff]  }
  0x27   : >> { %699 = vmatprep.subr.bf16.mxu1 %v3465_v25  ;;  %509 = vmatprep.mubr.bf16.mxu0 %v314_v53  ;;  %v3516_v63 = vld [vmem:[%s5005_s1 + $0xd0] ss:$8 sps:$4 sm:$0xff]   ;;  %v3517_v0 = vld [vmem:[%s5005_s1 + $0x1e4] ss:$8 sps:$4 sm:$0xff]   ;;  %v3521_v5 = vld [vmem:[%s5005_s1 + $0x1e0] ss:$8 sps:$4 sm:$0xff]  }
  0x28   : >> { %721 = vmatprep.mubr.bf16.mxu1 %v526_v57  ;;  %v3519_v4 = vld [vmem:[%s5005_s1 + $0xe4] ss:$8 sps:$4 sm:$0xff]   ;;  %v3522_v6 = vld [vmem:[%s5005_s1 + $0xe0] ss:$8 sps:$4 sm:$0xff]   ;;  %v3523_v7 = vld [vmem:[%s5005_s1 + $0x1f4] ss:$8 sps:$4 sm:$0xff]  }
  0x29   : >> { %488 = vmatpush1.bf16.msra.mxu0 %v3467_v26  ;;  %v3525_v8 = vld [vmem:[%s5005_s1 + $0xf4] ss:$8 sps:$4 sm:$0xff]   ;;  %v3527_v9 = vld [vmem:[%s5005_s1 + $0x1f0] ss:$8 sps:$4 sm:$0xff]   ;;  %v3531_v11 = vld [vmem:[%s5005_s1 + $0x204] ss:$8 sps:$4 sm:$0xff]  }
  0x2a   : >> { %700 = vmatpush1.bf16.msra.mxu1 %v3468_v27  ;;  %489 = vmatprep.subr.bf16.mxu0 %v3469_v28  ;;  %v3528_v10 = vld [vmem:[%s5005_s1 + $0xf0] ss:$8 sps:$4 sm:$0xff]   ;;  %v3534_v12 = vld [vmem:[%s5005_s1 + $0x304] ss:$8 sps:$4 sm:$0xff]   ;;  %v3529_v13 = vld [vmem:[%s5005_s1 + $0x200] ss:$8 sps:$4 sm:$0xff]  }
  0x2b   : >> { %701 = vmatprep.subr.bf16.mxu1 %v3471_v29  ;;  %v3532_v14 = vld [vmem:[%s5005_s1 + $0x300] ss:$8 sps:$4 sm:$0xff]   ;;  %v3537_v15 = vld [vmem:[%s5005_s1 + $0x214] ss:$8 sps:$4 sm:$0xff]   ;;  %v3535_v17 = vld [vmem:[%s5005_s1 + $0x210] ss:$8 sps:$4 sm:$0xff]  }
  0x2c   : >> { %v3540_v16 = vld [vmem:[%s5005_s1 + $0x314] ss:$8 sps:$4 sm:$0xff]   ;;  %v3538_v18 = vld [vmem:[%s5005_s1 + $0x310] ss:$8 sps:$4 sm:$0xff]   ;;  %v3543_v19 = vld [vmem:[%s5005_s1 + $0x224] ss:$8 sps:$4 sm:$0xff]  }
  0x2d   : >> { %490 = vmatpush1.bf16.msra.mxu0 %v3473_v30  ;;  %v3546_v20 = vld [vmem:[%s5005_s1 + $0x324] ss:$8 sps:$4 sm:$0xff]   ;;  %v3541_v21 = vld [vmem:[%s5005_s1 + $0x220] ss:$8 sps:$4 sm:$0xff]   ;;  %v3549_v23 = vld [vmem:[%s5005_s1 + $0x234] ss:$8 sps:$4 sm:$0xff]  }
  0x2e   : >> { %702 = vmatpush1.bf16.msra.mxu1 %v3474_v31  ;;  %491 = vmatprep.subr.bf16.mxu0 %v3475_v32  ;;  %v3544_v22 = vld [vmem:[%s5005_s1 + $0x320] ss:$8 sps:$4 sm:$0xff]   ;;  %v3552_v24 = vld [vmem:[%s5005_s1 + $0x334] ss:$8 sps:$4 sm:$0xff]   ;;  %v3547_v25 = vld [vmem:[%s5005_s1 + $0x230] ss:$8 sps:$4 sm:$0xff]  }
  0x2f   : >> { %703 = vmatprep.subr.bf16.mxu1 %v3477_v33  ;;  %v3550_v26 = vld [vmem:[%s5005_s1 + $0x330] ss:$8 sps:$4 sm:$0xff]   ;;  %v3555_v27 = vld [vmem:[%s5005_s1 + $0x244] ss:$8 sps:$4 sm:$0xff]   ;;  %v3553_v29 = vld [vmem:[%s5005_s1 + $0x240] ss:$8 sps:$4 sm:$0xff]  }
  0x30   : >> { %v3558_v28 = vld [vmem:[%s5005_s1 + $0x344] ss:$8 sps:$4 sm:$0xff]   ;;  %v3556_v30 = vld [vmem:[%s5005_s1 + $0x340] ss:$8 sps:$4 sm:$0xff]   ;;  %v3561_v31 = vld [vmem:[%s5005_s1 + $0x254] ss:$8 sps:$4 sm:$0xff]  }
  0x31   : >> { %492 = vmatpush1.bf16.msra.mxu0 %v3479_v34  ;;  %v3564_v32 = vld [vmem:[%s5005_s1 + $0x354] ss:$8 sps:$4 sm:$0xff]   ;;  %v3559_v33 = vld [vmem:[%s5005_s1 + $0x250] ss:$8 sps:$4 sm:$0xff]   ;;  %v3577_v53 = vld [vmem:[%s5005_s1 + $0x280] ss:$8 sps:$4 sm:$0xff]  }
  0x32   : >> { %704 = vmatpush1.bf16.msra.mxu1 %v3480_v35  ;;  %493 = vmatprep.subr.bf16.mxu0 %v3481_v36  ;;  %v3562_v34 = vld [vmem:[%s5005_s1 + $0x350] ss:$8 sps:$4 sm:$0xff]   ;;  %v3567_v35 = vld [vmem:[%s5005_s1 + $0x264] ss:$8 sps:$4 sm:$0xff]   ;;  %s229_s30 = sadd.s32 1, %s3895_s30  }
  0x33   : >> { %705 = vmatprep.subr.bf16.mxu1 %v3483_v37  ;;  %v3570_v36 = vld [vmem:[%s5005_s1 + $0x364] ss:$8 sps:$4 sm:$0xff]   ;;  %v3565_v37 = vld [vmem:[%s5005_s1 + $0x260] ss:$8 sps:$4 sm:$0xff]   ;;  %v3583_v57 = vld [vmem:[%s5005_s1 + $0x290] ss:$8 sps:$4 sm:$0xff]  }
  0x34   : >> { %p226_p4 = scmp.ge.s32.totalorder %s229_s30, 2  }
  0x35   : >> { %494 = vmatpush1.bf16.msra.mxu0 %v3485_v38  ;;  %v3568_v38 = vld [vmem:[%s5005_s1 + $0x360] ss:$8 sps:$4 sm:$0xff]   ;;  %vm2657_vm1 = vcmask (%p226_p4), 0  }
  0x36   : >> { %706 = vmatpush1.bf16.msra.mxu1 %v3486_v39  ;;  %495 = vmatprep.subr.bf16.mxu0 %v3487_v40  ;;  %v4253_v39 = vld.sshfl [vmem:[%s4107_s13] sm:$0x33 pattern:$0x76325410]  ;;  %v3573_v40 = vld [vmem:[%s5005_s1 + $0x274] ss:$8 sps:$4 sm:$0xff]  }
  0x37   : >> { %707 = vmatprep.subr.bf16.mxu1 %v3489_v41  ;;  %v772_v41 = vcombine.high %v4253_v39, %v4253_v39 }
  0x39   : >> { %496 = vmatpush1.bf16.msra.mxu0 %v3491_v42  ;;  %v3576_v42 = vld [vmem:[%s5005_s1 + $0x374] ss:$8 sps:$4 sm:$0xff]  }
  0x3a   : >> { %708 = vmatpush1.bf16.msra.mxu1 %v3492_v43  ;;  %497 = vmatprep.subr.bf16.mxu0 %v3493_v44  ;;  %v4264_v43 = vld.sshfl [vmem:[%s4107_s13 + $0x8] sm:$0x11 pattern:$0x76325410]  ;;  %v781_v44 = vshrl.u32 %v772_v41, 16 }
  0x3b   : >> { %709 = vmatprep.subr.bf16.mxu1 %v3495_v45  ;;  %v783_v45 = vshll.u32 %v772_v41, 16 }
  0x3d   : >> { %498 = vmatpush1.bf16.msra.mxu0 %v3497_v46  ;;  %v1038_v46 = vcombine.high %v4264_v43, %v4264_v43 }
  0x3e   : >> { %710 = vmatpush1.bf16.msra.mxu1 %v3498_v47  ;;  %499 = vmatprep.subr.bf16.mxu0 %v3499_v48  ;;  %v3571_v47 = vld [vmem:[%s5005_s1 + $0x270] ss:$8 sps:$4 sm:$0xff]   ;;  %v785_v48 = vrot.slane %v783_v45, 1  ;;  %v3648_v45 = vld [vmem:[%s5005_s1 + $0x534] ss:$8 sps:$4 sm:$0xff]  }
  0x3f   : >> { %711 = vmatprep.subr.bf16.mxu1 %v3501_v49  ;;  %v3574_v49 = vld [vmem:[%s5005_s1 + $0x370] ss:$8 sps:$4 sm:$0xff]  }
  0x41   : >> { %500 = vmatpush1.bf16.msra.mxu0 %v3503_v50  ;;  %v3579_v50 = vld [vmem:[%s5005_s1 + $0x284] ss:$8 sps:$4 sm:$0xff]  }
  0x42   : >> { %712 = vmatpush1.bf16.msra.mxu1 %v3504_v52  ;;  %501 = vmatprep.subr.bf16.mxu0 %v3505_v55  ;;  %v786_v52 = vor.u32 %v785_v48, %v781_v44  ;;  %v3585_v55 = vld [vmem:[%s5005_s1 + $0x294] ss:$8 sps:$4 sm:$0xff]   ;;  %v3646_v48 = vld [vmem:[%s5005_s1 + $0x530] ss:$8 sps:$4 sm:$0xff]  }
  0x43   : >> { %713 = vmatprep.subr.bf16.mxu1 %v3507_v56  ;;  %v3588_v56 = vld [vmem:[%s5005_s1 + $0x394] ss:$8 sps:$4 sm:$0xff]  }
  0x44   : >> { %v3645_v44 = vld [vmem:[%s5005_s1 + $0x434] ss:$8 sps:$4 sm:$0xff]  }
  0x45   : >> { %502 = vmatpush1.bf16.msra.mxu0 %v3509_v58  ;;  %v3586_v58 = vld [vmem:[%s5005_s1 + $0x390] ss:$8 sps:$4 sm:$0xff]  }
  0x46   : >> { %714 = vmatpush1.bf16.msra.mxu1 %v3510_v59  ;;  %503 = vmatprep.subr.bf16.mxu0 %v3511_v60  ;;  %v3591_v59 = vld [vmem:[%s5005_s1 + $0x2a4] ss:$8 sps:$4 sm:$0xff]  }
  0x47   : >> { %715 = vmatprep.subr.bf16.mxu1 %v3513_v61  ;;  %v3594_v60 = vld [vmem:[%s5005_s1 + $0x3a4] ss:$8 sps:$4 sm:$0xff]   ;;  %v3589_v61 = vld [vmem:[%s5005_s1 + $0x2a0] ss:$8 sps:$4 sm:$0xff]  }
  0x49   : >> { %504 = vmatpush1.bf16.msra.mxu0 %v3515_v62  ;;  %v3592_v62 = vld [vmem:[%s5005_s1 + $0x3a0] ss:$8 sps:$4 sm:$0xff]  }
  0x4a   : >> { %716 = vmatpush1.bf16.msra.mxu1 %v3516_v63  ;;  %505 = vmatprep.subr.bf16.mxu0 %v3517_v0  ;;  %v3597_v63 = vld [vmem:[%s5005_s1 + $0x2b4] ss:$8 sps:$4 sm:$0xff]  }
  0x4b   : >> { %717 = vmatprep.subr.bf16.mxu1 %v3519_v4  ;;  %v3600_v0 = vld [vmem:[%s5005_s1 + $0x3b4] ss:$8 sps:$4 sm:$0xff]   ;;  %v3595_v4 = vld [vmem:[%s5005_s1 + $0x2b0] ss:$8 sps:$4 sm:$0xff]  }
  0x4d   : >> { %506 = vmatpush1.bf16.msra.mxu0 %v3521_v5  ;;  %v3598_v5 = vld [vmem:[%s5005_s1 + $0x3b0] ss:$8 sps:$4 sm:$0xff]  }
  0x4e   : >> { %718 = vmatpush1.bf16.msra.mxu1 %v3522_v6  ;;  %507 = vmatprep.subr.bf16.mxu0 %v3523_v7  ;;  %v3603_v6 = vld [vmem:[%s5005_s1 + $0x2c4] ss:$8 sps:$4 sm:$0xff]  }
  0x4f   : >> { %719 = vmatprep.subr.bf16.mxu1 %v3525_v8  ;;  %v3606_v7 = vld [vmem:[%s5005_s1 + $0x3c4] ss:$8 sps:$4 sm:$0xff]   ;;  %v3601_v8 = vld [vmem:[%s5005_s1 + $0x2c0] ss:$8 sps:$4 sm:$0xff]  }
  0x51   : >> { %508 = vmatpush1.bf16.msra.mxu0 %v3527_v9  ;;  %v3604_v9 = vld [vmem:[%s5005_s1 + $0x3c0] ss:$8 sps:$4 sm:$0xff]  }
  0x52   : >> { %720 = vmatpush1.bf16.msra.mxu1 %v3528_v10  ;;  %949 = vmatprep.subr.bf16.mxu0 %v3531_v11  ;;  %v3609_v10 = vld [vmem:[%s5005_s1 + $0x2d4] ss:$8 sps:$4 sm:$0xff]  }
  0x53   : >> { %1201 = vmatprep.subr.bf16.mxu1 %v3534_v12  ;;  %v3612_v11 = vld [vmem:[%s5005_s1 + $0x3d4] ss:$8 sps:$4 sm:$0xff]   ;;  %v3607_v12 = vld [vmem:[%s5005_s1 + $0x2d0] ss:$8 sps:$4 sm:$0xff]  }
  0x54   : >> { %510 = vmatmul.mubr.bf16.vlgmr.msra.gmra.mrb[0].mxu0 %v2785_v51  ;;  %v3582_v51 = vld [vmem:[%s5005_s1 + $0x384] ss:$8 sps:$4 sm:$0xff]  }
  0x55   : >> { %722 = vmatmul.mubr.bf16.vlgmr.msra.gmra.mrb[0].mxu1 %v2818_v54  ;;  %950 = vmatpush1.bf16.msra.mxu0 %v3529_v13  ;;  %v3580_v54 = vld [vmem:[%s5005_s1 + $0x380] ss:$8 sps:$4 sm:$0xff]   ;;  %v3610_v13 = vld [vmem:[%s5005_s1 + $0x3d0] ss:$8 sps:$4 sm:$0xff]  }
  0x56   : >> { %1202 = vmatpush1.bf16.msra.mxu1 %v3532_v14  ;;  %951 = vmatprep.subr.bf16.mxu0 %v3537_v15  ;;  %v3615_v14 = vld [vmem:[%s5005_s1 + $0x2e4] ss:$8 sps:$4 sm:$0xff]  }
  0x57   : >> { %1203 = vmatprep.subr.bf16.mxu1 %v3540_v16  ;;  %1233 = vmatprep.mubr.bf16.mxu1 %v1038_v46  ;;  %v3618_v15 = vld [vmem:[%s5005_s1 + $0x3e4] ss:$8 sps:$4 sm:$0xff]   ;;  %v3613_v16 = vld [vmem:[%s5005_s1 + $0x2e0] ss:$8 sps:$4 sm:$0xff]  }
  0x58   : >> { %981 = vmatprep.mubr.bf16.mxu0 %v786_v52  ;;  %v3649_v52 = vld [vmem:[%s5005_s1 + $0x440] ss:$8 sps:$4 sm:$0xff]  }
  0x59   : >> { %952 = vmatpush1.bf16.msra.mxu0 %v3535_v17  ;;  %v776_v17 = vshll.u32 %v4253_v39, 16 }
  0x5a   : >> { %1204 = vmatpush1.bf16.msra.mxu1 %v3538_v18  ;;  %953 = vmatprep.subr.bf16.mxu0 %v3543_v19  ;;  %v3616_v18 = vld [vmem:[%s5005_s1 + $0x3e0] ss:$8 sps:$4 sm:$0xff]   ;;  %v3621_v19 = vld [vmem:[%s5005_s1 + $0x2f4] ss:$8 sps:$4 sm:$0xff]  }
  0x5b   : >> { %1205 = vmatprep.subr.bf16.mxu1 %v3546_v20  ;;  %v3624_v20 = vld [vmem:[%s5005_s1 + $0x3f4] ss:$8 sps:$4 sm:$0xff]  }
  0x5d   : >> { %954 = vmatpush1.bf16.msra.mxu0 %v3541_v21  ;;  %v3619_v21 = vld [vmem:[%s5005_s1 + $0x2f0] ss:$8 sps:$4 sm:$0xff]  }
  0x5e   : >> { %1206 = vmatpush1.bf16.msra.mxu1 %v3544_v22  ;;  %955 = vmatprep.subr.bf16.mxu0 %v3549_v23  ;;  %v774_v22 = vshrl.u32 %v4253_v39, 16  ;;  %v778_v23 = vrot.slane %v776_v17, 1  ;;  %v3693_v17 = vld [vmem:[%s5005_s1 + $0x4b4] ss:$8 sps:$4 sm:$0xff]  }
  0x5f   : >> { %1207 = vmatprep.subr.bf16.mxu1 %v3552_v24  ;;  %v3622_v24 = vld [vmem:[%s5005_s1 + $0x3f0] ss:$8 sps:$4 sm:$0xff]  }
  0x61   : >> { %956 = vmatpush1.bf16.msra.mxu0 %v3547_v25  ;;  %v3627_v25 = vld [vmem:[%s5005_s1 + $0x404] ss:$8 sps:$4 sm:$0xff]  }
  0x62   : >> { %1208 = vmatpush1.bf16.msra.mxu1 %v3550_v26  ;;  %957 = vmatprep.subr.bf16.mxu0 %v3555_v27  ;;  %v3630_v26 = vld [vmem:[%s5005_s1 + $0x504] ss:$8 sps:$4 sm:$0xff]   ;;  %v779_v27 = vor.u32 %v778_v23, %v774_v22  ;;  %v3697_v23 = vld [vmem:[%s5005_s1 + $0x4c0] ss:$8 sps:$4 sm:$0xff]  }
  0x63   : >> { %1209 = vmatprep.subr.bf16.mxu1 %v3558_v28  ;;  %v3625_v28 = vld [vmem:[%s5005_s1 + $0x400] ss:$8 sps:$4 sm:$0xff]   ;;  %v3702_v22 = vld [vmem:[%s5005_s1 + $0x5c4] ss:$8 sps:$4 sm:$0xff]  }
  0x65   : >> { %958 = vmatpush1.bf16.msra.mxu0 %v3553_v29  ;;  %v3628_v29 = vld [vmem:[%s5005_s1 + $0x500] ss:$8 sps:$4 sm:$0xff]  }
  0x66   : >> { %1210 = vmatpush1.bf16.msra.mxu1 %v3556_v30  ;;  %959 = vmatprep.subr.bf16.mxu0 %v3561_v31  ;;  %v3633_v30 = vld [vmem:[%s5005_s1 + $0x414] ss:$8 sps:$4 sm:$0xff]  }
  0x67   : >> { %1211 = vmatprep.subr.bf16.mxu1 %v3564_v32  ;;  %v3636_v31 = vld [vmem:[%s5005_s1 + $0x514] ss:$8 sps:$4 sm:$0xff]   ;;  %v3631_v32 = vld [vmem:[%s5005_s1 + $0x410] ss:$8 sps:$4 sm:$0xff]  }
  0x69   : >> { %960 = vmatpush1.bf16.msra.mxu0 %v3559_v33  ;;  %v4394_v33 = vld.sshfl [vmem:[%s4107_s13 + $0xc] sm:$0x11 pattern:$0x76325410] }
  0x6a   : >> { %1212 = vmatpush1.bf16.msra.mxu1 %v3562_v34  ;;  %961 = vmatprep.subr.bf16.mxu0 %v3567_v35  ;;  %v3634_v34 = vld [vmem:[%s5005_s1 + $0x510] ss:$8 sps:$4 sm:$0xff]   ;;  %v1289_v35 = vcombine.high %v4394_v33, %v4394_v33 }
  0x6b   : >> { %1213 = vmatprep.subr.bf16.mxu1 %v3570_v36  ;;  %v3639_v36 = vld [vmem:[%s5005_s1 + $0x424] ss:$8 sps:$4 sm:$0xff]  }
  0x6d   : >> { %962 = vmatpush1.bf16.msra.mxu0 %v3565_v37  ;;  %v4406_v37 = vld.sshfl [vmem:[%s4107_s13 + $0x8] sm:$0x33 pattern:$0x76325410] }
  0x6e   : >> { %1214 = vmatpush1.bf16.msra.mxu1 %v3568_v38  ;;  %963 = vmatprep.subr.bf16.mxu0 %v3573_v40  ;;  %v3642_v38 = vld [vmem:[%s5005_s1 + $0x524] ss:$8 sps:$4 sm:$0xff]   ;;  %v1537_v39 = vcombine.high %v4406_v37, %v4406_v37  ;;  %v3637_v40 = vld [vmem:[%s5005_s1 + $0x420] ss:$8 sps:$4 sm:$0xff]  }
  0x6f   : >> { %1215 = vmatprep.subr.bf16.mxu1 %v3576_v42 }
  0x70   : >> { %v1546_v41 = vshrl.u32 %v1537_v39, 16  ;;  %v1548_v42 = vshll.u32 %v1537_v39, 16  ;;  %v1539_v39 = vshrl.u32 %v4406_v37, 16 }
  0x71   : >> { %964 = vmatpush1.bf16.msra.mxu0 %v3571_v47  ;;  %v3643_v47 = vld [vmem:[%s5005_s1 + $0x430] ss:$8 sps:$4 sm:$0xff]  }
  0x72   : >> { %1216 = vmatpush1.bf16.msra.mxu1 %v3574_v49  ;;  %965 = vmatprep.subr.bf16.mxu0 %v3579_v50  ;;  %v1550_v46 = vrot.slane %v1548_v42, 1  ;;  %v3651_v50 = vld [vmem:[%s5005_s1 + $0x444] ss:$8 sps:$4 sm:$0xff]  }
  0x73   : >> { %1217 = vmatprep.subr.bf16.mxu1 %v3582_v51  ;;  %v3654_v51 = vld [vmem:[%s5005_s1 + $0x544] ss:$8 sps:$4 sm:$0xff]  }
  0x74   : >> { %v1551_v49 = vor.u32 %v1550_v46, %v1546_v41  ;;  %v3718_v41 = vld [vmem:[%s5005_s1 + $0x5f0] ss:$8 sps:$4 sm:$0xff]   ;;  %v3723_v42 = vld [vmem:[%s5005_s1 + $0x604] ss:$8 sps:$4 sm:$0xff]  }
  0x75   : >> { %966 = vmatpush1.bf16.msra.mxu0 %v3577_v53  ;;  %v3652_v53 = vld [vmem:[%s5005_s1 + $0x540] ss:$8 sps:$4 sm:$0xff]   ;;  %v4590_v46 = vld.sshfl [vmem:[%s4107_s13 + $0x14] sm:$0x11 pattern:$0x76325410] }
  0x76   : >> { %1218 = vmatpush1.bf16.msra.mxu1 %v3580_v54  ;;  %967 = vmatprep.subr.bf16.mxu0 %v3585_v55  ;;  %v3657_v54 = vld [vmem:[%s5005_s1 + $0x454] ss:$8 sps:$4 sm:$0xff]  }
  0x77   : >> { %1219 = vmatprep.subr.bf16.mxu1 %v3588_v56  ;;  %v3660_v55 = vld [vmem:[%s5005_s1 + $0x554] ss:$8 sps:$4 sm:$0xff]   ;;  %v3655_v56 = vld [vmem:[%s5005_s1 + $0x450] ss:$8 sps:$4 sm:$0xff]  }
  0x79   : >> { %968 = vmatpush1.bf16.msra.mxu0 %v3583_v57  ;;  %v3658_v57 = vld [vmem:[%s5005_s1 + $0x550] ss:$8 sps:$4 sm:$0xff]  }
  0x7a   : >> { %1220 = vmatpush1.bf16.msra.mxu1 %v3586_v58  ;;  %969 = vmatprep.subr.bf16.mxu0 %v3591_v59  ;;  %v3663_v58 = vld [vmem:[%s5005_s1 + $0x464] ss:$8 sps:$4 sm:$0xff]  }
  0x7b   : >> { %1221 = vmatprep.subr.bf16.mxu1 %v3594_v60  ;;  %v3666_v59 = vld [vmem:[%s5005_s1 + $0x564] ss:$8 sps:$4 sm:$0xff]   ;;  %v3661_v60 = vld [vmem:[%s5005_s1 + $0x460] ss:$8 sps:$4 sm:$0xff]  }
  0x7d   : >> { %970 = vmatpush1.bf16.msra.mxu0 %v3589_v61  ;;  %v3664_v61 = vld [vmem:[%s5005_s1 + $0x560] ss:$8 sps:$4 sm:$0xff]  }
  0x7e   : >> { %1222 = vmatpush1.bf16.msra.mxu1 %v3592_v62  ;;  %971 = vmatprep.subr.bf16.mxu0 %v3597_v63  ;;  %v3669_v62 = vld [vmem:[%s5005_s1 + $0x474] ss:$8 sps:$4 sm:$0xff]  }
  0x7f   : >> { %1223 = vmatprep.subr.bf16.mxu1 %v3600_v0  ;;  %v3672_v63 = vld [vmem:[%s5005_s1 + $0x574] ss:$8 sps:$4 sm:$0xff]   ;;  %v3667_v0 = vld [vmem:[%s5005_s1 + $0x470] ss:$8 sps:$4 sm:$0xff]  }
  0x81   : >> { %972 = vmatpush1.bf16.msra.mxu0 %v3595_v4  ;;  %v3670_v4 = vld [vmem:[%s5005_s1 + $0x570] ss:$8 sps:$4 sm:$0xff]  }
  0x82   : >> { %1224 = vmatpush1.bf16.msra.mxu1 %v3598_v5  ;;  %973 = vmatprep.subr.bf16.mxu0 %v3603_v6  ;;  %v3675_v5 = vld [vmem:[%s5005_s1 + $0x484] ss:$8 sps:$4 sm:$0xff]  }
  0x83   : >> { %1225 = vmatprep.subr.bf16.mxu1 %v3606_v7  ;;  %v3678_v6 = vld [vmem:[%s5005_s1 + $0x584] ss:$8 sps:$4 sm:$0xff]   ;;  %v3673_v7 = vld [vmem:[%s5005_s1 + $0x480] ss:$8 sps:$4 sm:$0xff]  }
  0x85   : >> { %974 = vmatpush1.bf16.msra.mxu0 %v3601_v8  ;;  %v3676_v8 = vld [vmem:[%s5005_s1 + $0x580] ss:$8 sps:$4 sm:$0xff]  }
  0x86   : >> { %1226 = vmatpush1.bf16.msra.mxu1 %v3604_v9  ;;  %975 = vmatprep.subr.bf16.mxu0 %v3609_v10  ;;  %v3681_v9 = vld [vmem:[%s5005_s1 + $0x494] ss:$8 sps:$4 sm:$0xff]  }
  0x87   : >> { %1227 = vmatprep.subr.bf16.mxu1 %v3612_v11  ;;  %v3684_v10 = vld [vmem:[%s5005_s1 + $0x594] ss:$8 sps:$4 sm:$0xff]   ;;  %v3679_v11 = vld [vmem:[%s5005_s1 + $0x490] ss:$8 sps:$4 sm:$0xff]  }
  0x89   : >> { %976 = vmatpush1.bf16.msra.mxu0 %v3607_v12  ;;  %v3682_v12 = vld [vmem:[%s5005_s1 + $0x590] ss:$8 sps:$4 sm:$0xff]  }
  0x8a   : >> { %1228 = vmatpush1.bf16.msra.mxu1 %v3610_v13  ;;  %977 = vmatprep.subr.bf16.mxu0 %v3615_v14  ;;  %v3687_v13 = vld [vmem:[%s5005_s1 + $0x4a4] ss:$8 sps:$4 sm:$0xff]  }
  0x8b   : >> { %1229 = vmatprep.subr.bf16.mxu1 %v3618_v15  ;;  %v3690_v14 = vld [vmem:[%s5005_s1 + $0x5a4] ss:$8 sps:$4 sm:$0xff]   ;;  %v3685_v15 = vld [vmem:[%s5005_s1 + $0x4a0] ss:$8 sps:$4 sm:$0xff]  }
  0x8d   : >> { %978 = vmatpush1.bf16.msra.mxu0 %v3613_v16  ;;  %v3688_v16 = vld [vmem:[%s5005_s1 + $0x5a0] ss:$8 sps:$4 sm:$0xff]  }
  0x8e   : >> { %1230 = vmatpush1.bf16.msra.mxu1 %v3616_v18  ;;  %979 = vmatprep.subr.bf16.mxu0 %v3621_v19  ;;  %v3696_v18 = vld [vmem:[%s5005_s1 + $0x5b4] ss:$8 sps:$4 sm:$0xff]   ;;  %v3691_v19 = vld [vmem:[%s5005_s1 + $0x4b0] ss:$8 sps:$4 sm:$0xff]  }
  0x8f   : >> { %1231 = vmatprep.subr.bf16.mxu1 %v3624_v20  ;;  %v3694_v20 = vld [vmem:[%s5005_s1 + $0x5b0] ss:$8 sps:$4 sm:$0xff]  }
  0x91   : >> { %980 = vmatpush1.bf16.msra.mxu0 %v3619_v21  ;;  %v3699_v21 = vld [vmem:[%s5005_s1 + $0x4c4] ss:$8 sps:$4 sm:$0xff]  }
  0x92   : >> { %1232 = vmatpush1.bf16.msra.mxu1 %v3622_v24  ;;  %1452 = vmatprep.subr.bf16.mxu0 %v3627_v25  ;;  %v3700_v24 = vld [vmem:[%s5005_s1 + $0x5c0] ss:$8 sps:$4 sm:$0xff]   ;;  %v3705_v25 = vld [vmem:[%s5005_s1 + $0x4d4] ss:$8 sps:$4 sm:$0xff]  }
  0x93   : >> { %1714 = vmatprep.subr.bf16.mxu1 %v3630_v26  ;;  %v3708_v26 = vld [vmem:[%s5005_s1 + $0x5d4] ss:$8 sps:$4 sm:$0xff]  }
  0x94   : >> { %982 = vmatmul.mubr.bf16.vlgmr.msra.gmra.mrb[4].mxu0 %v779_v27  ;;  %v3703_v27 = vld [vmem:[%s5005_s1 + $0x4d0] ss:$8 sps:$4 sm:$0xff]  }
  0x95   : >> { %1234 = vmatmul.mubr.bf16.vlgmr.msra.gmra.mrb[4].mxu1 %v4264_v43  ;;  %1453 = vmatpush1.bf16.msra.mxu0 %v3625_v28  ;;  %v3640_v43 = vld [vmem:[%s5005_s1 + $0x520] ss:$8 sps:$4 sm:$0xff]   ;;  %v3706_v28 = vld [vmem:[%s5005_s1 + $0x5d0] ss:$8 sps:$4 sm:$0xff]  }
  0x96   : >> { %1715 = vmatpush1.bf16.msra.mxu1 %v3628_v29  ;;  %1454 = vmatprep.subr.bf16.mxu0 %v3633_v30  ;;  %v3711_v29 = vld [vmem:[%s5005_s1 + $0x4e4] ss:$8 sps:$4 sm:$0xff]  }
  0x97   : >> { %1716 = vmatprep.subr.bf16.mxu1 %v3636_v31  ;;  %1484 = vmatprep.mubr.bf16.mxu0 %v1289_v35  ;;  %v3714_v30 = vld [vmem:[%s5005_s1 + $0x5e4] ss:$8 sps:$4 sm:$0xff]   ;;  %v3709_v31 = vld [vmem:[%s5005_s1 + $0x4e0] ss:$8 sps:$4 sm:$0xff]   ;;  %v3717_v35 = vld [vmem:[%s5005_s1 + $0x4f4] ss:$8 sps:$4 sm:$0xff]  }
  0x98   : >> { %1746 = vmatprep.mubr.bf16.mxu1 %v1551_v49  ;;  %v3732_v49 = vld [vmem:[%s5005_s1 + $0x714] ss:$8 sps:$4 sm:$0xff]  }
  0x99   : >> { %1455 = vmatpush1.bf16.msra.mxu0 %v3631_v32  ;;  %v1541_v32 = vshll.u32 %v4406_v37, 16  ;;  %v3721_v37 = vld [vmem:[%s5005_s1 + $0x600] ss:$8 sps:$4 sm:$0xff]  }
  0x9a   : >> { %1717 = vmatpush1.bf16.msra.mxu1 %v3634_v34  ;;  %1456 = vmatprep.subr.bf16.mxu0 %v3639_v36  ;;  %v3712_v34 = vld [vmem:[%s5005_s1 + $0x5e0] ss:$8 sps:$4 sm:$0xff]   ;;  %v3720_v36 = vld [vmem:[%s5005_s1 + $0x5f4] ss:$8 sps:$4 sm:$0xff]  }
  0x9b   : >> { %1718 = vmatprep.subr.bf16.mxu1 %v3642_v38  ;;  %v3715_v38 = vld [vmem:[%s5005_s1 + $0x4f0] ss:$8 sps:$4 sm:$0xff]  }
  0x9d   : >> { %1457 = vmatpush1.bf16.msra.mxu0 %v3637_v40  ;;  %v1543_v40 = vrot.slane %v1541_v32, 1  ;;  %v3795_v32 = vld [vmem:[%s5005_s1 + $0x6c4] ss:$8 sps:$4 sm:$0xff]  }
  0x9e   : >> { %1719 = vmatpush1.bf16.msra.mxu1 %v3640_v43  ;;  %1458 = vmatprep.subr.bf16.mxu0 %v3645_v44  ;;  %v3726_v43 = vld [vmem:[%s5005_s1 + $0x704] ss:$8 sps:$4 sm:$0xff]   ;;  %v4587_v44 = vld.sshfl [vmem:[%s4107_s13 + $0x10] sm:$0x11 pattern:$0x76325410] }
  0x9f   : >> { %1720 = vmatprep.subr.bf16.mxu1 %v3648_v45  ;;  %v1544_v45 = vor.u32 %v1543_v40, %v1539_v39  ;;  %v3804_v39 = vld [vmem:[%s5005_s1 + $0x7d4] ss:$8 sps:$4 sm:$0xff]   ;;  %v4751_v40 = vld.sshfl [vmem:[%s4107_s13 + $0x10] sm:$0x33 pattern:$0x76325410] }
  0xa1   : >> { %1459 = vmatpush1.bf16.msra.mxu0 %v3643_v47  ;;  %v3724_v47 = vld [vmem:[%s5005_s1 + $0x700] ss:$8 sps:$4 sm:$0xff]  }
  0xa2   : >> { %1721 = vmatpush1.bf16.msra.mxu1 %v3646_v48  ;;  %1460 = vmatprep.subr.bf16.mxu0 %v3651_v50  ;;  %v3729_v48 = vld [vmem:[%s5005_s1 + $0x614] ss:$8 sps:$4 sm:$0xff]   ;;  %v1803_v50 = vcombine.high %v4587_v44, %v4587_v44 }
  0xa3   : >> { %1722 = vmatprep.subr.bf16.mxu1 %v3654_v51  ;;  %v2054_v51 = vcombine.high %v4590_v46, %v4590_v46 }
  0xa5   : >> { %1461 = vmatpush1.bf16.msra.mxu0 %v3649_v52  ;;  %v3727_v52 = vld [vmem:[%s5005_s1 + $0x610] ss:$8 sps:$4 sm:$0xff]  }
  0xa6   : >> { %1723 = vmatpush1.bf16.msra.mxu1 %v3652_v53  ;;  %1462 = vmatprep.subr.bf16.mxu0 %v3657_v54  ;;  %v3730_v53 = vld [vmem:[%s5005_s1 + $0x710] ss:$8 sps:$4 sm:$0xff]   ;;  %v3735_v54 = vld [vmem:[%s5005_s1 + $0x624] ss:$8 sps:$4 sm:$0xff]  }
  0xa7   : >> { %1724 = vmatprep.subr.bf16.mxu1 %v3660_v55  ;;  %v3733_v55 = vld [vmem:[%s5005_s1 + $0x620] ss:$8 sps:$4 sm:$0xff]  }
  0xa9   : >> { %1463 = vmatpush1.bf16.msra.mxu0 %v3655_v56  ;;  %v3736_v56 = vld [vmem:[%s5005_s1 + $0x720] ss:$8 sps:$4 sm:$0xff]  }
  0xaa   : >> { %1725 = vmatpush1.bf16.msra.mxu1 %v3658_v57  ;;  %1464 = vmatprep.subr.bf16.mxu0 %v3663_v58  ;;  %v3741_v57 = vld [vmem:[%s5005_s1 + $0x634] ss:$8 sps:$4 sm:$0xff]  }
  0xab   : >> { %1726 = vmatprep.subr.bf16.mxu1 %v3666_v59  ;;  %v3744_v58 = vld [vmem:[%s5005_s1 + $0x734] ss:$8 sps:$4 sm:$0xff]   ;;  %v3739_v59 = vld [vmem:[%s5005_s1 + $0x630] ss:$8 sps:$4 sm:$0xff]  }
  0xad   : >> { %1465 = vmatpush1.bf16.msra.mxu0 %v3661_v60  ;;  %v3742_v60 = vld [vmem:[%s5005_s1 + $0x730] ss:$8 sps:$4 sm:$0xff]  }
  0xae   : >> { %1727 = vmatpush1.bf16.msra.mxu1 %v3664_v61  ;;  %1466 = vmatprep.subr.bf16.mxu0 %v3669_v62  ;;  %v3747_v61 = vld [vmem:[%s5005_s1 + $0x644] ss:$8 sps:$4 sm:$0xff]  }
  0xaf   : >> { %1728 = vmatprep.subr.bf16.mxu1 %v3672_v63  ;;  %v3750_v62 = vld [vmem:[%s5005_s1 + $0x744] ss:$8 sps:$4 sm:$0xff]   ;;  %v3745_v63 = vld [vmem:[%s5005_s1 + $0x640] ss:$8 sps:$4 sm:$0xff]  }
  0xb1   : >> { %1467 = vmatpush1.bf16.msra.mxu0 %v3667_v0  ;;  %v3748_v0 = vld [vmem:[%s5005_s1 + $0x740] ss:$8 sps:$4 sm:$0xff]  }
  0xb2   : >> { %1729 = vmatpush1.bf16.msra.mxu1 %v3670_v4  ;;  %1468 = vmatprep.subr.bf16.mxu0 %v3675_v5  ;;  %v3753_v4 = vld [vmem:[%s5005_s1 + $0x654] ss:$8 sps:$4 sm:$0xff]  }
  0xb3   : >> { %1730 = vmatprep.subr.bf16.mxu1 %v3678_v6  ;;  %v3756_v5 = vld [vmem:[%s5005_s1 + $0x754] ss:$8 sps:$4 sm:$0xff]   ;;  %v3751_v6 = vld [vmem:[%s5005_s1 + $0x650] ss:$8 sps:$4 sm:$0xff]  }
  0xb5   : >> { %1469 = vmatpush1.bf16.msra.mxu0 %v3673_v7  ;;  %v3754_v7 = vld [vmem:[%s5005_s1 + $0x750] ss:$8 sps:$4 sm:$0xff]  }
  0xb6   : >> { %1731 = vmatpush1.bf16.msra.mxu1 %v3676_v8  ;;  %1470 = vmatprep.subr.bf16.mxu0 %v3681_v9  ;;  %v3759_v8 = vld [vmem:[%s5005_s1 + $0x664] ss:$8 sps:$4 sm:$0xff]  }
  0xb7   : >> { %1732 = vmatprep.subr.bf16.mxu1 %v3684_v10  ;;  %v3762_v9 = vld [vmem:[%s5005_s1 + $0x764] ss:$8 sps:$4 sm:$0xff]   ;;  %v3757_v10 = vld [vmem:[%s5005_s1 + $0x660] ss:$8 sps:$4 sm:$0xff]  }
  0xb9   : >> { %1471 = vmatpush1.bf16.msra.mxu0 %v3679_v11  ;;  %v3760_v11 = vld [vmem:[%s5005_s1 + $0x760] ss:$8 sps:$4 sm:$0xff]  }
  0xba   : >> { %1733 = vmatpush1.bf16.msra.mxu1 %v3682_v12  ;;  %1472 = vmatprep.subr.bf16.mxu0 %v3687_v13  ;;  %v3765_v12 = vld [vmem:[%s5005_s1 + $0x674] ss:$8 sps:$4 sm:$0xff]  }
  0xbb   : >> { %1734 = vmatprep.subr.bf16.mxu1 %v3690_v14  ;;  %v3768_v13 = vld [vmem:[%s5005_s1 + $0x774] ss:$8 sps:$4 sm:$0xff]   ;;  %v3763_v14 = vld [vmem:[%s5005_s1 + $0x670] ss:$8 sps:$4 sm:$0xff]  }
  0xbd   : >> { %1473 = vmatpush1.bf16.msra.mxu0 %v3685_v15  ;;  %v3766_v15 = vld [vmem:[%s5005_s1 + $0x770] ss:$8 sps:$4 sm:$0xff]  }
  0xbe   : >> { %1735 = vmatpush1.bf16.msra.mxu1 %v3688_v16  ;;  %1474 = vmatprep.subr.bf16.mxu0 %v3693_v17  ;;  %v3771_v16 = vld [vmem:[%s5005_s1 + $0x684] ss:$8 sps:$4 sm:$0xff]  }
  0xbf   : >> { %1736 = vmatprep.subr.bf16.mxu1 %v3696_v18  ;;  %v3774_v17 = vld [vmem:[%s5005_s1 + $0x784] ss:$8 sps:$4 sm:$0xff]   ;;  %v3769_v18 = vld [vmem:[%s5005_s1 + $0x680] ss:$8 sps:$4 sm:$0xff]  }
  0xc1   : >> { %1475 = vmatpush1.bf16.msra.mxu0 %v3691_v19  ;;  %v3772_v19 = vld [vmem:[%s5005_s1 + $0x780] ss:$8 sps:$4 sm:$0xff]  }
  0xc2   : >> { %1737 = vmatpush1.bf16.msra.mxu1 %v3694_v20  ;;  %1476 = vmatprep.subr.bf16.mxu0 %v3699_v21  ;;  %v3777_v20 = vld [vmem:[%s5005_s1 + $0x694] ss:$8 sps:$4 sm:$0xff]  }
  0xc3   : >> { %1738 = vmatprep.subr.bf16.mxu1 %v3702_v22  ;;  %v3780_v21 = vld [vmem:[%s5005_s1 + $0x794] ss:$8 sps:$4 sm:$0xff]   ;;  %v3775_v22 = vld [vmem:[%s5005_s1 + $0x690] ss:$8 sps:$4 sm:$0xff]  }
  0xc5   : >> { %1477 = vmatpush1.bf16.msra.mxu0 %v3697_v23  ;;  %v3778_v23 = vld [vmem:[%s5005_s1 + $0x790] ss:$8 sps:$4 sm:$0xff]  }
  0xc6   : >> { %1739 = vmatpush1.bf16.msra.mxu1 %v3700_v24  ;;  %1478 = vmatprep.subr.bf16.mxu0 %v3705_v25  ;;  %v3783_v24 = vld [vmem:[%s5005_s1 + $0x6a4] ss:$8 sps:$4 sm:$0xff]  }
  0xc7   : >> { %1740 = vmatprep.subr.bf16.mxu1 %v3708_v26  ;;  %v3786_v25 = vld [vmem:[%s5005_s1 + $0x7a4] ss:$8 sps:$4 sm:$0xff]   ;;  %v3781_v26 = vld [vmem:[%s5005_s1 + $0x6a0] ss:$8 sps:$4 sm:$0xff]  }
  0xc9   : >> { %1479 = vmatpush1.bf16.msra.mxu0 %v3703_v27  ;;  %v3784_v27 = vld [vmem:[%s5005_s1 + $0x7a0] ss:$8 sps:$4 sm:$0xff]  }
  0xca   : >> { %1741 = vmatpush1.bf16.msra.mxu1 %v3706_v28  ;;  %1480 = vmatprep.subr.bf16.mxu0 %v3711_v29  ;;  %v3789_v28 = vld [vmem:[%s5005_s1 + $0x6b4] ss:$8 sps:$4 sm:$0xff]  }
  0xcb   : >> { %1742 = vmatprep.subr.bf16.mxu1 %v3714_v30  ;;  %v3792_v29 = vld [vmem:[%s5005_s1 + $0x7b4] ss:$8 sps:$4 sm:$0xff]   ;;  %v3787_v30 = vld [vmem:[%s5005_s1 + $0x6b0] ss:$8 sps:$4 sm:$0xff]  }
  0xcd   : >> { %1481 = vmatpush1.bf16.msra.mxu0 %v3709_v31  ;;  %v3790_v31 = vld [vmem:[%s5005_s1 + $0x7b0] ss:$8 sps:$4 sm:$0xff]  }
  0xce   : >> { %1743 = vmatpush1.bf16.msra.mxu1 %v3712_v34  ;;  %1482 = vmatprep.subr.bf16.mxu0 %v3717_v35  ;;  %v3798_v34 = vld [vmem:[%s5005_s1 + $0x7c4] ss:$8 sps:$4 sm:$0xff]   ;;  %v3793_v35 = vld [vmem:[%s5005_s1 + $0x6c0] ss:$8 sps:$4 sm:$0xff]  }
  0xcf   : >> { %1744 = vmatprep.subr.bf16.mxu1 %v3720_v36  ;;  %v3796_v36 = vld [vmem:[%s5005_s1 + $0x7c0] ss:$8 sps:$4 sm:$0xff]  }
  0xd1   : >> { %1483 = vmatpush1.bf16.msra.mxu0 %v3715_v38  ;;  %v3801_v38 = vld [vmem:[%s5005_s1 + $0x6d4] ss:$8 sps:$4 sm:$0xff]  }
  0xd2   : >> { %1745 = vmatpush1.bf16.msra.mxu1 %v3718_v41  ;;  %1966 = vmatprep.subr.bf16.mxu0 %v3723_v42  ;;  %v3799_v41 = vld [vmem:[%s5005_s1 + $0x6d0] ss:$8 sps:$4 sm:$0xff]  }
  0xd3   : >> { %2217 = vmatprep.subr.bf16.mxu1 %v3726_v43  ;;  %v3802_v42 = vld [vmem:[%s5005_s1 + $0x7d0] ss:$8 sps:$4 sm:$0xff]   ;;  %v2302_v43 = vcombine.high %v4751_v40, %v4751_v40 }
  0xd4   : >> { %1485 = vmatmul.mubr.bf16.vlgmr.msra.gmra.mrb[8].mxu0 %v4394_v33  ;;  %v3738_v33 = vld [vmem:[%s5005_s1 + $0x724] ss:$8 sps:$4 sm:$0xff]  }
  0xd5   : >> { %1747 = vmatmul.mubr.bf16.vlgmr.msra.gmra.mrb[8].mxu1 %v1544_v45  ;;  %1967 = vmatpush1.bf16.msra.mxu0 %v3721_v37  ;;  %v3807_v37 = vld [vmem:[%s5005_s1 + $0x6e4] ss:$8 sps:$4 sm:$0xff]  }
  0xd6   : >> { %2218 = vmatpush1.bf16.msra.mxu1 %v3724_v47  ;;  %1968 = vmatprep.subr.bf16.mxu0 %v3729_v48  ;;  %v3810_v45 = vld [vmem:[%s5005_s1 + $0x7e4] ss:$8 sps:$4 sm:$0xff]   ;;  %v3805_v47 = vld [vmem:[%s5005_s1 + $0x6e0] ss:$8 sps:$4 sm:$0xff]  }
  0xd7   : >> { %2219 = vmatprep.subr.bf16.mxu1 %v3732_v49  ;;  %1998 = vmatprep.mubr.bf16.mxu0 %v1803_v50  ;;  %v3808_v48 = vld [vmem:[%s5005_s1 + $0x7e0] ss:$8 sps:$4 sm:$0xff]   ;;  %v2313_v49 = vshll.u32 %v2302_v43, 16  ;;  %v3813_v50 = vld [vmem:[%s5005_s1 + $0x6f4] ss:$8 sps:$4 sm:$0xff]  }
  0xd8   : >> { %2249 = vmatprep.mubr.bf16.mxu1 %v2054_v51  ;;  %v3816_v51 = vld [vmem:[%s5005_s1 + $0x7f4] ss:$8 sps:$4 sm:$0xff]  }
  0xd9   : >> { %1969 = vmatpush1.bf16.msra.mxu0 %v3727_v52  ;;  %v3811_v52 = vld [vmem:[%s5005_s1 + $0x6f0] ss:$8 sps:$4 sm:$0xff]  }
  0xda   : >> { %2220 = vmatpush1.bf16.msra.mxu1 %v3730_v53  ;;  %1970 = vmatprep.subr.bf16.mxu0 %v3735_v54  ;;  %v3814_v53 = vld [vmem:[%s5005_s1 + $0x7f0] ss:$8 sps:$4 sm:$0xff]   ;;  %v2311_v54 = vshrl.u32 %v2302_v43, 16 }
  0xdb   : >> { %2221 = vmatprep.subr.bf16.mxu1 %v3738_v33  ;;  %v2315_v33 = vrot.slane %v2313_v49, 1 }
  0xdd   : >> { %1971 = vmatpush1.bf16.msra.mxu0 %v3733_v55  ;;  %v3819_v55 = vld [vmem:[%s5005_s1 + $0x804] ss:$8 sps:$4 sm:$0xff]  }
  0xde   : >> { %2222 = vmatpush1.bf16.msra.mxu1 %v3736_v56  ;;  %1972 = vmatprep.subr.bf16.mxu0 %v3741_v57  ;;  %v3817_v56 = vld [vmem:[%s5005_s1 + $0x800] ss:$8 sps:$4 sm:$0xff]   ;;  %v2316_v57 = vor.u32 %v2315_v33, %v2311_v54 }
  0xdf   : >> { %2223 = vmatprep.subr.bf16.mxu1 %v3744_v58  ;;  %v3822_v58 = vld [vmem:[%s5005_s1 + $0x814] ss:$8 sps:$4 sm:$0xff]  }
  0xe1   : >> { %1973 = vmatpush1.bf16.msra.mxu0 %v3739_v59  ;;  %v3820_v59 = vld [vmem:[%s5005_s1 + $0x810] ss:$8 sps:$4 sm:$0xff]  }
  0xe2   : >> { %2224 = vmatpush1.bf16.msra.mxu1 %v3742_v60  ;;  %1974 = vmatprep.subr.bf16.mxu0 %v3747_v61  ;;  %v3825_v60 = vld [vmem:[%s5005_s1 + $0x824] ss:$8 sps:$4 sm:$0xff]   ;;  %v3823_v61 = vld [vmem:[%s5005_s1 + $0x820] ss:$8 sps:$4 sm:$0xff]  }
  0xe3   : >> { %2225 = vmatprep.subr.bf16.mxu1 %v3750_v62  ;;  %v3831_v62 = vld [vmem:[%s5005_s1 + $0x844] ss:$8 sps:$4 sm:$0xff]  }
  0xe5   : >> { %1975 = vmatpush1.bf16.msra.mxu0 %v3745_v63  ;;  %v3829_v63 = vld [vmem:[%s5005_s1 + $0x840] ss:$8 sps:$4 sm:$0xff]  }
  0xe6   : >> { %2226 = vmatpush1.bf16.msra.mxu1 %v3748_v0  ;;  %1976 = vmatprep.subr.bf16.mxu0 %v3753_v4  ;;  %v3834_v0 = vld [vmem:[%s5005_s1 + $0x854] ss:$8 sps:$4 sm:$0xff]   ;;  %v3832_v4 = vld [vmem:[%s5005_s1 + $0x850] ss:$8 sps:$4 sm:$0xff]  }
  0xe7   : >> { %2227 = vmatprep.subr.bf16.mxu1 %v3756_v5  ;;  %v3837_v5 = vld [vmem:[%s5005_s1 + $0x864] ss:$8 sps:$4 sm:$0xff]  }
  0xe9   : >> { %1977 = vmatpush1.bf16.msra.mxu0 %v3751_v6 }
  0xea   : >> { %2228 = vmatpush1.bf16.msra.mxu1 %v3754_v7  ;;  %1978 = vmatprep.subr.bf16.mxu0 %v3759_v8 }
  0xeb   : >> { %2229 = vmatprep.subr.bf16.mxu1 %v3762_v9 }
  0xed   : >> { %1979 = vmatpush1.bf16.msra.mxu0 %v3757_v10 }
  0xee   : >> { %2230 = vmatpush1.bf16.msra.mxu1 %v3760_v11  ;;  %1980 = vmatprep.subr.bf16.mxu0 %v3765_v12 }
  0xef   : >> { %2231 = vmatprep.subr.bf16.mxu1 %v3768_v13  ;;  %v3835_v13 = vld [vmem:[%s5005_s1 + $0x860] ss:$8 sps:$4 sm:$0xff]  }
  0xf1   : >> { %1981 = vmatpush1.bf16.msra.mxu0 %v3763_v14 }
  0xf2   : >> { %2232 = vmatpush1.bf16.msra.mxu1 %v3766_v15  ;;  %1982 = vmatprep.subr.bf16.mxu0 %v3771_v16  ;;  %v3840_v16 = vld [vmem:[%s5005_s1 + $0x874] ss:$8 sps:$4 sm:$0xff]  }
  0xf3   : >> { %2233 = vmatprep.subr.bf16.mxu1 %v3774_v17 }
  0xf5   : >> { %1983 = vmatpush1.bf16.msra.mxu0 %v3769_v18  ;;  %v3838_v18 = vld [vmem:[%s5005_s1 + $0x870] ss:$8 sps:$4 sm:$0xff]  }
  0xf6   : >> { %2234 = vmatpush1.bf16.msra.mxu1 %v3772_v19  ;;  %1984 = vmatprep.subr.bf16.mxu0 %v3777_v20  ;;  %v3843_v19 = vld [vmem:[%s5005_s1 + $0x884] ss:$8 sps:$4 sm:$0xff]   ;;  %v3841_v20 = vld [vmem:[%s5005_s1 + $0x880] ss:$8 sps:$4 sm:$0xff]  }
  0xf7   : >> { %2235 = vmatprep.subr.bf16.mxu1 %v3780_v21  ;;  %v3846_v21 = vld [vmem:[%s5005_s1 + $0x894] ss:$8 sps:$4 sm:$0xff]  }
  0xf9   : >> { %1985 = vmatpush1.bf16.msra.mxu0 %v3775_v22  ;;  %v3844_v22 = vld [vmem:[%s5005_s1 + $0x890] ss:$8 sps:$4 sm:$0xff]  }
  0xfa   : >> { %2236 = vmatpush1.bf16.msra.mxu1 %v3778_v23  ;;  %1986 = vmatprep.subr.bf16.mxu0 %v3783_v24  ;;  %v3849_v23 = vld [vmem:[%s5005_s1 + $0x8a4] ss:$8 sps:$4 sm:$0xff]   ;;  %v3847_v24 = vld [vmem:[%s5005_s1 + $0x8a0] ss:$8 sps:$4 sm:$0xff]  }
  0xfb   : >> { %2237 = vmatprep.subr.bf16.mxu1 %v3786_v25  ;;  %v3852_v25 = vld [vmem:[%s5005_s1 + $0x8b4] ss:$8 sps:$4 sm:$0xff]  }
  0xfd   : >> { %1987 = vmatpush1.bf16.msra.mxu0 %v3781_v26  ;;  %v3850_v26 = vld [vmem:[%s5005_s1 + $0x8b0] ss:$8 sps:$4 sm:$0xff]  }
  0xfe   : >> { %2238 = vmatpush1.bf16.msra.mxu1 %v3784_v27  ;;  %1988 = vmatprep.subr.bf16.mxu0 %v3789_v28  ;;  %v3855_v27 = vld [vmem:[%s5005_s1 + $0x8c4] ss:$8 sps:$4 sm:$0xff]   ;;  %v3853_v28 = vld [vmem:[%s5005_s1 + $0x8c0] ss:$8 sps:$4 sm:$0xff]  }
  0xff   : >> { %2239 = vmatprep.subr.bf16.mxu1 %v3792_v29  ;;  %v3858_v29 = vld [vmem:[%s5005_s1 + $0x8d4] ss:$8 sps:$4 sm:$0xff]  }
 0x101   : >> { %1989 = vmatpush1.bf16.msra.mxu0 %v3787_v30  ;;  %v3856_v30 = vld [vmem:[%s5005_s1 + $0x8d0] ss:$8 sps:$4 sm:$0xff]  }
 0x102   : >> { %2240 = vmatpush1.bf16.msra.mxu1 %v3790_v31  ;;  %1990 = vmatprep.subr.bf16.mxu0 %v3795_v32  ;;  %v3861_v31 = vld [vmem:[%s5005_s1 + $0x8e4] ss:$8 sps:$4 sm:$0xff]   ;;  %v2306_v32 = vshll.u32 %v4751_v40, 16 }
 0x103   : >> { %2241 = vmatprep.subr.bf16.mxu1 %v3798_v34  ;;  %v3859_v34 = vld [vmem:[%s5005_s1 + $0x8e0] ss:$8 sps:$4 sm:$0xff]  }
 0x105   : >> { %1991 = vmatpush1.bf16.msra.mxu0 %v3793_v35  ;;  %v3864_v35 = vld [vmem:[%s5005_s1 + $0x8f4] ss:$8 sps:$4 sm:$0xff]  }
 0x106   : >> { %2242 = vmatpush1.bf16.msra.mxu1 %v3796_v36  ;;  %1992 = vmatprep.subr.bf16.mxu0 %v3801_v38  ;;  %v2304_v36 = vshrl.u32 %v4751_v40, 16  ;;  %v2308_v38 = vrot.slane %v2306_v32, 1 }
 0x107   : >> { %2243 = vmatprep.subr.bf16.mxu1 %v3804_v39  ;;  %v3862_v39 = vld [vmem:[%s5005_s1 + $0x8f0] ss:$8 sps:$4 sm:$0xff]  }
 0x109   : >> { %1993 = vmatpush1.bf16.msra.mxu0 %v3799_v41  ;;  %v2309_v41 = vor.u32 %v2308_v38, %v2304_v36 }
 0x10a   : >> { %2244 = vmatpush1.bf16.msra.mxu1 %v3802_v42  ;;  %1994 = vmatprep.subr.bf16.mxu0 %v3807_v37 }
 0x10b   : >> { %2245 = vmatprep.subr.bf16.mxu1 %v3810_v45 }
 0x10d   : >> { %1995 = vmatpush1.bf16.msra.mxu0 %v3805_v47 }
 0x10e   : >> { %2246 = vmatpush1.bf16.msra.mxu1 %v3808_v48  ;;  %1996 = vmatprep.subr.bf16.mxu0 %v3813_v50 }
 0x10f   : >> { %2247 = vmatprep.subr.bf16.mxu1 %v3816_v51 }
 0x111   : >> { %1997 = vmatpush1.bf16.msra.mxu0 %v3811_v52 }
 0x112   : >> { %2248 = vmatpush1.bf16.msra.mxu1 %v3814_v53  ;;  %2479 = vmatprep.subr.bf16.mxu0 %v3819_v55 }
 0x114   : >> { %1999 = vmatmul.mubr.bf16.vlgmr.msra.gmra.mrb[12].mxu0 %v4587_v44  ;;  %v3828_v44 = vld [vmem:[%s5005_s1 + $0x834] ss:$8 sps:$4 sm:$0xff]  }
 0x115   : >> { %2250 = vmatmul.mubr.bf16.vlgmr.msra.gmra.mrb[12].mxu1 %v4590_v46  ;;  %2480 = vmatpush1.bf16.msra.mxu0 %v3817_v56  ;;  %v3826_v46 = vld [vmem:[%s5005_s1 + $0x830] ss:$8 sps:$4 sm:$0xff]  }
 0x116   : >> { %2511 = vmatprep.mubr.bf16.mxu0 %v2316_v57  ;;  %2481 = vmatprep.subr.bf16.mxu0 %v3822_v58 }
 0x119   : >> { %2482 = vmatpush1.bf16.msra.mxu0 %v3820_v59 }
 0x11a   : >> { %2483 = vmatprep.subr.bf16.mxu0 %v3825_v60 }
 0x11d   : >> { %2484 = vmatpush1.bf16.msra.mxu0 %v3823_v61 }
 0x11e   : >> { %2485 = vmatprep.subr.bf16.mxu0 %v3828_v44 }
 0x121   : >> { %2486 = vmatpush1.bf16.msra.mxu0 %v3826_v46 }
 0x122   : >> { %2487 = vmatprep.subr.bf16.mxu0 %v3831_v62 }
 0x125   : >> { %2488 = vmatpush1.bf16.msra.mxu0 %v3829_v63 }
 0x126   : >> { %2489 = vmatprep.subr.bf16.mxu0 %v3834_v0 }
 0x127   : >> { %v511_v6 = vpop.f32.mrb[0].mxu0 }
 0x128   : >> { %v723_v7 = vpop.f32.mrb[0].mxu1  ;;  %v513_v9 = vpop.f32.mrb[1].mxu0 }
 0x129   : >> { %v724_v8 = vadd.f32 %v723_v7, %v511_v6  ;;  %v725_v10 = vpop.f32.mrb[1].mxu1  ;;  %v515_v12 = vpop.f32.mrb[2].mxu0  ;;  %2490 = vmatpush1.bf16.msra.mxu0 %v3832_v4 }
 0x12a   : >> { %v726_v11 = vadd.f32 %v725_v10, %v513_v9  ;;  %v727_v14 = vpop.f32.mrb[2].mxu1  ;;  %v516_v15 = vpop.f32.mrb[3].mxu0  ;;  %2491 = vmatprep.subr.bf16.mxu0 %v3837_v5 }
 0x12b   : >> { %v728_v17 = vpop.f32.mrb[3].mxu1  ;;  %v2523_v14 = vlaneseq }
 0x12d   : >> { %2492 = vmatpush1.bf16.msra.mxu0 %v3835_v13  ;;  %v2524_v15 = vshrl.u32 %v2523_v14, 7 }
 0x12e   : >> { %2493 = vmatprep.subr.bf16.mxu0 %v3840_v16 }
 0x12f   : >> { %v2525_v16 = vsub.s32 0, %v2524_v15  ;;  %v2529_v17 = vsub.s32 1, %v2524_v15  ;;  %v2564_v15 = vld [vmem:[%s5007_s3 + $0x50] sm:$0xff] (%p226_p4) }
 0x131   : >> { %2494 = vmatpush1.bf16.msra.mxu0 %v3838_v18  ;;  %v2526_v18 = vrot.slane %v3941_v1, %v2525_v16  ;;  %v2565_v16 = vld [vmem:[%s5007_s3 + $0x58] sm:$0xff] (%p226_p4) }
 0x132   : >> { %2495 = vmatprep.subr.bf16.mxu0 %v3843_v19 }
 0x135   : >> { %2496 = vmatpush1.bf16.msra.mxu0 %v3841_v20  ;;  %v2530_v20 = vrot.slane %v3941_v1, %v2529_v17  ;;  %v2572_v1 = vld [vmem:[%s5007_s3 + $0x90] sm:$0xff] (%p226_p4)  ;;  %v2582_v17 = vld [vmem:[%s5007_s3 + $0xe0] sm:$0xff] (%p226_p4) }
 0x136   : >> { %2497 = vmatprep.subr.bf16.mxu0 %v3846_v21 }
 0x139   : >> { %2498 = vmatpush1.bf16.msra.mxu0 %v3844_v22 }
 0x13a   : >> { %2499 = vmatprep.subr.bf16.mxu0 %v3849_v23 }
 0x13d   : >> { %2500 = vmatpush1.bf16.msra.mxu0 %v3847_v24 }
 0x13e   : >> { %2501 = vmatprep.subr.bf16.mxu0 %v3852_v25 }
 0x141   : >> { %2502 = vmatpush1.bf16.msra.mxu0 %v3850_v26 }
 0x142   : >> { %2503 = vmatprep.subr.bf16.mxu0 %v3855_v27 }
 0x145   : >> { %2504 = vmatpush1.bf16.msra.mxu0 %v3853_v28 }
 0x146   : >> { %2505 = vmatprep.subr.bf16.mxu0 %v3858_v29 }
 0x149   : >> { %2506 = vmatpush1.bf16.msra.mxu0 %v3856_v30 }
 0x14a   : >> { %2507 = vmatprep.subr.bf16.mxu0 %v3861_v31 }
 0x14d   : >> { %2508 = vmatpush1.bf16.msra.mxu0 %v3859_v34 }
 0x14e   : >> { %2509 = vmatprep.subr.bf16.mxu0 %v3864_v35 }
 0x151   : >> { %2510 = vmatpush1.bf16.msra.mxu0 %v3862_v39 }
 0x154   : >> { %2512 = vmatmul.mubr.bf16.vlgmr.msra.gmra.mrb[16].mxu0 %v2309_v41 }
 0x167   : >> { %v983_v42 = vpop.f32.mrb[4].mxu0 }
 0x168   : >> { %v1235_v43 = vpop.f32.mrb[4].mxu1  ;;  %v990_v37 = vadd.f32 %v983_v42, %v724_v8  ;;  %v985_v45 = vpop.f32.mrb[5].mxu0 }
 0x169   : >> { %v1237_v47 = vpop.f32.mrb[5].mxu1  ;;  %v991_v48 = vadd.f32 %v985_v45, %v726_v11  ;;  %v987_v49 = vpop.f32.mrb[6].mxu0 }
 0x16a   : >> { %v1239_v50 = vpop.f32.mrb[6].mxu1  ;;  %v1242_v51 = vadd.f32 %v1235_v43, %v990_v37  ;;  %v988_v40 = vpop.f32.mrb[7].mxu0 }
 0x16b   : >> { %v1240_v52 = vpop.f32.mrb[7].mxu1  ;;  %v1243_v53 = vadd.f32 %v1237_v47, %v991_v48  ;;  %v2570_v50 = vld [vmem:[%s5007_s3 + $0x80] sm:$0xff] (%p226_p4) }
 0x16c   : > { %v2555_v52 = vld [vmem:[%s5007_s3 + $0x8] sm:$0xff] (%p226_p4) }
 0x1a7   : >> { %v1486_v54 = vpop.f32.mrb[8].mxu0 }
 0x1a8   : >> { %v1748_v33 = vpop.f32.mrb[8].mxu1  ;;  %v1493_v55 = vadd.f32 %v1486_v54, %v1242_v51  ;;  %v1488_v56 = vpop.f32.mrb[9].mxu0  ;;  %v2554_v51 = vld [vmem:[%s5007_s3] sm:$0xff] (%p226_p4) }
 0x1a9   : >> { %v1750_v57 = vpop.f32.mrb[9].mxu1  ;;  %v1494_v58 = vadd.f32 %v1488_v56, %v1243_v53  ;;  %v1490_v59 = vpop.f32.mrb[10].mxu0  ;;  %v3370_v53 = vpack.c.bf16 (%p226_p4), %v2555_v52, %v2554_v51  ;;  %v2574_v56 = vld [vmem:[%s5007_s3 + $0xa0] sm:$0xff] (%p226_p4) }
 0x1aa   : >> { %v1752_v60 = vpop.f32.mrb[10].mxu1  ;;  %v1755_v61 = vadd.f32 %v1748_v33, %v1493_v55  ;;  %v1491_v44 = vpop.f32.mrb[11].mxu0  ;;  %v2556_v33 = vld [vmem:[%s5007_s3 + $0x10] sm:$0xff] (%p226_p4)  ;;  %v2557_v55 = vld [vmem:[%s5007_s3 + $0x18] sm:$0xff] (%p226_p4) }
 0x1ab   : >> { %v1753_v46 = vpop.f32.mrb[11].mxu1  ;;  %v1756_v62 = vadd.f32 %v1750_v57, %v1494_v58  ;;  %v2575_v57 = vld [vmem:[%s5007_s3 + $0xa8] sm:$0xff] (%p226_p4)  ;;  %v3374_v58 = vpack.c.bf16 (%p226_p4), %v2557_v55, %v2556_v33  ;;  %v2558_v60 = vld [vmem:[%s5007_s3 + $0x20] sm:$0xff] (%p226_p4)  ;;  %v2576_v44 = vld [vmem:[%s5007_s3 + $0xb0] sm:$0xff] (%p226_p4) }
 0x1ac   : > { %v3376_v59 = vpack.c.bf16 (%p226_p4), %v2575_v57, %v2574_v56  ;;  %v2577_v46 = vld [vmem:[%s5007_s3 + $0xb8] sm:$0xff] (%p226_p4) }
 0x1e7   : >> { %v2000_v63 = vpop.f32.mrb[12].mxu0 }
 0x1e8   : >> { %v2251_v0 = vpop.f32.mrb[12].mxu1  ;;  %v2007_v4 = vadd.f32 %v2000_v63, %v1755_v61  ;;  %v2002_v5 = vpop.f32.mrb[13].mxu0  ;;  %v2559_v61 = vld [vmem:[%s5007_s3 + $0x28] sm:$0xff] (%p226_p4)  ;;  %v3380_v63 = vpack.c.bf16 (%p226_p4), %v2577_v46, %v2576_v44 }
 0x1e9   : >> { %v2253_v6 = vpop.f32.mrb[13].mxu1  ;;  %v2008_v7 = vadd.f32 %v2002_v5, %v1756_v62  ;;  %v2004_v8 = vpop.f32.mrb[14].mxu0  ;;  %v3378_v62 = vpack.c.bf16 (%p226_p4), %v2559_v61, %v2558_v60  ;;  %v2578_v5 = vld [vmem:[%s5007_s3 + $0xc0] sm:$0xff] (%p226_p4) }
 0x1ea   : >> { %v2255_v9 = vpop.f32.mrb[14].mxu1  ;;  %v2258_v10 = vadd.f32 %v2251_v0, %v2007_v4  ;;  %v2005_v11 = vpop.f32.mrb[15].mxu0  ;;  %v2560_v0 = vld [vmem:[%s5007_s3 + $0x30] sm:$0xff] (%p226_p4)  ;;  %v2561_v4 = vld [vmem:[%s5007_s3 + $0x38] sm:$0xff] (%p226_p4) }
 0x1eb   : >> { %v2256_v12 = vpop.f32.mrb[15].mxu1  ;;  %v2259_v13 = vadd.f32 %v2253_v6, %v2008_v7  ;;  %v2579_v6 = vld [vmem:[%s5007_s3 + $0xc8] sm:$0xff] (%p226_p4)  ;;  %v3382_v7 = vpack.c.bf16 (%p226_p4), %v2561_v4, %v2560_v0  ;;  %v2562_v9 = vld [vmem:[%s5007_s3 + $0x40] sm:$0xff] (%p226_p4)  ;;  %v2580_v11 = vld [vmem:[%s5007_s3 + $0xd0] sm:$0xff] (%p226_p4) }
 0x1ec   : > { %v3384_v8 = vpack.c.bf16 (%p226_p4), %v2579_v6, %v2578_v5  ;;  %v2581_v12 = vld [vmem:[%s5007_s3 + $0xd8] sm:$0xff] (%p226_p4) }
 0x1ed   : > { %v3388_v14 = vpack.c.bf16 (%p226_p4), %v2581_v12, %v2580_v11 }
 0x227   : >> { %v2513_v19 = vpop.f32.mrb[16].mxu0 }
 0x228   : >> { %v2520_v21 = vadd.f32 %v2513_v19, %v2258_v10  ;;  %v2515_v22 = vpop.f32.mrb[17].mxu0  ;;  %v2563_v10 = vld [vmem:[%s5007_s3 + $0x48] sm:$0xff] (%p226_p4)  ;;  %v3390_v19 = vpack.c.bf16 (%p226_p4), %v2565_v16, %v2564_v15 }
 0x229   : >> { %v2521_v23 = vadd.f32 %v2515_v22, %v2259_v13  ;;  %v2517_v24 = vpop.f32.mrb[18].mxu0  ;;  %v3386_v13 = vpack.c.bf16 (%p226_p4), %v2563_v10, %v2562_v9  ;;  %v2567_v22 = vld [vmem:[%s5007_s3 + $0x68] sm:$0xff] (%p226_p4) }
 0x22a   : >> { %v2533_v25 = vadd.f32 %v2526_v18, %v2520_v21  ;;  %v2518_v26 = vpop.f32.mrb[19].mxu0  ;;  %v2583_v18 = vld [vmem:[%s5007_s3 + $0xe8] sm:$0xff] (%p226_p4)  ;;  %v2566_v21 = vld [vmem:[%s5007_s3 + $0x60] sm:$0xff] (%p226_p4)  ;;  %v2585_v24 = vld [vmem:[%s5007_s3 + $0xf8] sm:$0xff] (%p226_p4) }
 0x22b   : >> { %v2534_v27 = vadd.f32 %v2530_v20, %v2521_v23  ;;  %v3392_v20 = vpack.c.bf16 (%p226_p4), %v2583_v18, %v2582_v17  ;;  %v2584_v23 = vld [vmem:[%s5007_s3 + $0xf0] sm:$0xff] (%p226_p4) }
 0x22c   : >> { %v2535_v28 = vmax.f32 %v2533_v25, 0.0  ;;  %v3394_v25 = vpack.c.bf16 (%p226_p4), %v2567_v22, %v2566_v21  ;;  %v3396_v26 = vpack.c.bf16 (%p226_p4), %v2585_v24, %v2584_v23 }
 0x22d   : >> { %v2536_v29 = vmax.f32 %v2534_v27, 0.0  ;;  %v2568_v27 = vld [vmem:[%s5007_s3 + $0x70] sm:$0xff] (%p226_p4) }
 0x22e   : >> { %v2538_v30 = vsel %vm2537_vm0, %v2535_v28, 0.0  ;;  %v2569_v28 = vld [vmem:[%s5007_s3 + $0x78] sm:$0xff] (%p226_p4) }
 0x22f   : >> { %v2539_v31 = vrot.slane %v2538_v30, 4  ;;  %v2545_v32 = vsel %vm2537_vm0, %v2536_v29, 0.0  ;;  %v3398_v29 = vpack.c.bf16 (%p226_p4), %v2569_v28, %v2568_v27 }
 0x230   : >> { %v2546_v34 = vrot.slane %v2545_v32, 4 }
 0x231   : >> { %v2540_v35 = vadd.f32 %v2539_v31, %v2538_v30  ;;  %v2586_v31 = vld [vmem:[#allocation2] sm:$0x1] (%p226_p4) }
 0x232   : >> { %v2547_v36 = vadd.f32 %v2546_v34, %v2545_v32 }
 0x233   : >> { %v2541_v38 = vrot.slane %v2540_v35, 2 }
 0x234   : >> { %v2548_v39 = vrot.slane %v2547_v36, 2 }
 0x235   : >> { %v2542_v41 = vadd.f32 %v2541_v38, %v2540_v35 }
 0x236   : >> { %v2549_v42 = vadd.f32 %v2548_v39, %v2547_v36 }
 0x237   : >> { %v2543_v43 = vrot.slane %v2542_v41, 1 }
 0x238   : >> { %v2550_v37 = vrot.slane %v2549_v42, 1  ;;  %228 = sbr.rel (!%p226_p4) target bundleno = 19 (0x13), region = 91 }
 0x239   : >> { %v2544_v45 = vadd.f32 %v2543_v43, %v2542_v41 }
 0x23a   : >> { %v2551_v47 = vadd.f32 %v2550_v37, %v2549_v42 }
 0x23b   : >> { %v4888_v3 = vadd.f32 %v3891_v3, %v2544_v45  }
 0x23c   : >> { %v2553_v49 = vadd.f32 %v3887_v2, %v2551_v47  }
 0x23d   : >> { %v5010_v48 = vmov %v4888_v3 }
 0x23e   : >> { %v5011_v2 = vmov %v2553_v49  ;;  %v5012_v3 = vmov %v5010_v48  ;;  %2651 = vmatprep.mubr.f32.mxu0 (%p226_p4), %v2553_v49 }
 0x23f   : > { %v2571_v3 = vld [vmem:[%s5007_s3 + $0x88] sm:$0xff]  ;;  %v2573_v2 = vld [vmem:[%s5007_s3 + $0x98] sm:$0xff] }
 0x240   : > { %v3368_v40 = vpack.c.bf16 %v2571_v3, %v2570_v50  ;;  %v3372_v54 = vpack.c.bf16 %v2573_v2, %v2572_v1 }
 0x242   : > { %3369 = vmatprep.subr.bf16.mxu0 %v3368_v40 }
 0x243   : > { %3371 = vmatpush3.bf16.msra.mxu0 %v3370_v53 }
 0x244   : > { %3373 = vmatprep.subr.bf16.mxu0 %v3372_v54 }
 0x247   : > { %3375 = vmatpush3.bf16.msra.mxu0 %v3374_v58 }
 0x248   : > { %3377 = vmatprep.subr.bf16.mxu0 %v3376_v59 }
 0x24b   : > { %3379 = vmatpush3.bf16.msra.mxu0 %v3378_v62 }
 0x24c   : > { %3381 = vmatprep.subr.bf16.mxu0 %v3380_v63 }
 0x24f   : > { %3383 = vmatpush3.bf16.msra.mxu0 %v3382_v7 }
 0x250   : > { %3385 = vmatprep.subr.bf16.mxu0 %v3384_v8 }
 0x253   : > { %3387 = vmatpush3.bf16.msra.mxu0 %v3386_v13 }
 0x254   : > { %3389 = vmatprep.subr.bf16.mxu0 %v3388_v14 }
 0x257   : > { %3391 = vmatpush3.bf16.msra.mxu0 %v3390_v19 }
 0x258   : > { %3393 = vmatprep.subr.bf16.mxu0 %v3392_v20 }
 0x25b   : > { %3395 = vmatpush3.bf16.msra.mxu0 %v3394_v25 }
 0x25c   : > { %3397 = vmatprep.subr.bf16.mxu0 %v3396_v26 }
 0x25f   : > { %3399 = vmatpush3.bf16.msra.mxu0 %v3398_v29 }
 0x262   : > { %2652 = vmatmul.mubr.f32.vlgmr.msra.gmra.mrb[0].mxu0 %v5010_v48 }
 0x335   : > { %v3365_v30 = vpop.f32.mrb[0].mxu0 }
 0x336   : > { %v3366_v32 = vpop.f32.mrb[1].mxu0 }
 0x337   : > { %v3367_v34 = vadd.f32 %v3366_v32, %v3365_v30 }
 0x339   : > { %v2654_v35 = vadd.f32 %v3367_v34, %v2586_v31 }
 0x33b   : > { %2658 = vst.msk [vmem:[%s222_s26] sm:$0x1] %vm2657_vm1, %v2654_v35 }
 0x33c PF: > { %s17_s20 = sadd.s32 1, %s3883_s20  }
 0x33d   : > { %p14_p5 = scmp.ge.s32.totalorder %s17_s20, 4  }
 0x33f   :  { %16 = sbr.rel (!%p14_p5) target bundleno = 3 (0x3), region = 102 }

</bundles_post_ra>
